<compile_context>
chip_gen: v7x
topology: tpu7x:2x2x1
jax: 0.10.0
libtpu: 0.0.40
codegen_flags: <defaults>
</compile_context>

<pallas_src>
import functools

import jax
import jax.numpy as jnp
import numpy as np
from jax.experimental import pallas as pl
from jax.experimental.pallas import tpu as pltpu

LANE = 128


def _round_up(x, m):
    return (x + m - 1) // m * m


# ----------------------------------------------------------------------------
# In-kernel helpers
# ----------------------------------------------------------------------------
def _cols_shift_zero(x):
    """x[:, j-1] / x[:, j+1] with zero padding at the W borders (conv padding)."""
    zero = jnp.zeros_like(x[:, :1])
    left = jnp.concatenate([zero, x[:, :-1]], axis=1)     # value of x[:, j-1]
    right = jnp.concatenate([x[:, 1:], zero], axis=1)     # value of x[:, j+1]
    return left, right


def _cols_shift_clamp(v):
    """x[:, j-1] / x[:, j+1] with edge replication (bilinear clamp)."""
    prev = jnp.concatenate([v[:, :1], v[:, :-1]], axis=1)
    nxt = jnp.concatenate([v[:, 1:], v[:, -1:]], axis=1)
    return prev, nxt


def _dw_pw(x_ext, dw_w, dw_s, dw_b, pw_w_ref, pw_s, pw_b, out_rows):
    """x_ext: (out_rows + 2, W, Cp) f32, rows already zeroed outside the image.

    Returns (out_rows, W, Cop) f32 after dw-conv+BN+ReLU -> 1x1-conv+BN+ReLU.
    """
    _, w, cp = x_ext.shape
    # hoisted: 3 column-shifted views, reused by all 3 row taps
    x_l, x_r = _cols_shift_zero(x_ext)
    views = (x_l, x_ext, x_r)                                 # dx = 0, 1, 2
    acc = jnp.zeros((out_rows, w, cp), jnp.float32)
    for dy in range(3):
        for dx in range(3):
            acc = acc + views[dx][dy:dy + out_rows] * dw_w[dy, dx]
    y = jnp.maximum(acc * dw_s + dw_b, 0.0)                   # f32 elementwise path
    # pointwise 1x1 on the MXU: bf16 operands, f32 accumulation
    z = jnp.dot(y.reshape(out_rows * w, cp).astype(jnp.bfloat16), pw_w_ref[...],
                preferred_element_type=jnp.float32)
    z = jnp.maximum(z * pw_s + pw_b, 0.0)
    return z.reshape(out_rows, w, z.shape[-1])


# ----------------------------------------------------------------------------
# Fused kernel: depthwise 3x3 + BN + ReLU -> pointwise 1x1 (MXU) + BN + ReLU,
# optionally followed by the 2x bilinear upsample (align_corners=False).
# ----------------------------------------------------------------------------
def _fused_dsconv_kernel(top_ref, mid_ref, bot_ref, dw_w_ref, dw_s_ref, dw_b_ref,
                         pw_w_ref, pw_s_ref, pw_b_ref, o_ref, *, fuse_upsample):
    i = pl.program_id(1)
    n_row_blocks = pl.num_programs(1)
    th, w = mid_ref.shape[1], mid_ref.shape[2]

    x = mid_ref[0].astype(jnp.float32)                                     # (TH, W, Cp)
    # halo rows; zeroed at the image border (dw conv zero padding semantics)
    top = jnp.where(i == 0, 0.0, top_ref[0].astype(jnp.float32))
    bot = jnp.where(i == n_row_blocks - 1, 0.0, bot_ref[0].astype(jnp.float32))
    x_ext = jnp.concatenate([top, x, bot], axis=0)

    dw_w = dw_w_ref[...]
    dw_s, dw_b = dw_s_ref[...], dw_b_ref[...]
    pw_s, pw_b = pw_s_ref[...], pw_b_ref[...]

    if not fuse_upsample:
        out = _dw_pw(x_ext, dw_w, dw_s, dw_b, pw_w_ref, pw_s, pw_b, th)
        o_ref[0] = out.astype(o_ref.dtype)
        return

    # Compute TH + 2 rows of the module output (1 halo row each side) so the
    # 2x bilinear upsample of the TH central rows needs no extra HBM pass.
    ext = _dw_pw(x_ext, dw_w, dw_s, dw_b, pw_w_ref, pw_s, pw_b, th + 2)    # (TH+2, W, Cop)
    center = ext[1:th + 1]
    prev = ext[0:th]
    nxt = ext[2:th + 2]
    row = jax.lax.broadcasted_iota(jnp.int32, (th, 1, 1), 0)
    prev = jnp.where((i == 0) & (row == 0), center, prev)                    # edge clamp (top)
    nxt = jnp.where((i == n_row_blocks - 1) & (row == th - 1), center, nxt)  # edge clamp (bottom)
    rows_e = 0.25 * prev + 0.75 * center        # output rows 2g
    rows_o = 0.75 * center + 0.25 * nxt         # output rows 2g + 1

    def upsample_cols(v):
        c_prev, c_next = _cols_shift_clamp(v)
        return 0.25 * c_prev + 0.75 * v, 0.75 * v + 0.25 * c_next

    ee, eo = upsample_cols(rows_e)
    oe, oo = upsample_cols(rows_o)
    # lane-interleave the column phases: (.., W, 2*Cop) is bit-identical to (.., 2W, Cop)
    re = jnp.concatenate([ee, eo], axis=-1)
    ro = jnp.concatenate([oe, oo], axis=-1)
    # interleave rows on the (cheap) major axis -> dense, unmasked store
    out = jnp.stack([re, ro], axis=1).reshape(2 * th, w, re.shape[-1])
    o_ref[0] = out.astype(o_ref.dtype)


# ----------------------------------------------------------------------------
# pallas_call wrappers (grid = (N, H // TH), halo rows via clamped BlockSpecs)
# ----------------------------------------------------------------------------
def _dsconv_call(x, p, th, *, fuse_upsample, out_dtype):
    n, h, w, cp = x.shape
    cop = p["pw_s"].shape[1]
    n_row_blocks = h // th
    kernel = functools.partial(_fused_dsconv_kernel, fuse_upsample=fuse_upsample)

    if fuse_upsample:
        # 2 halo rows each side (needed to also compute the upsample halo in-tile)
        top_spec = pl.BlockSpec(
            (1, 2, w, cp), lambda bn, bi: (bn, jnp.maximum(bi * (th // 2) - 1, 0), 0, 0))
        bot_spec = pl.BlockSpec(
            (1, 2, w, cp), lambda bn, bi: (bn, jnp.minimum((bi + 1) * (th // 2), h // 2 - 1), 0, 0))
        out_shape = jax.ShapeDtypeStruct((n, 2 * h, w, 2 * cop), out_dtype)
        out_spec = pl.BlockSpec((1, 2 * th, w, 2 * cop), lambda bn, bi: (bn, bi, 0, 0))
    else:
        top_spec = pl.BlockSpec(
            (1, 1, w, cp), lambda bn, bi: (bn, jnp.maximum(bi * th - 1, 0), 0, 0))
        bot_spec = pl.BlockSpec(
            (1, 1, w, cp), lambda bn, bi: (bn, jnp.minimum((bi + 1) * th, h - 1), 0, 0))
        out_shape = jax.ShapeDtypeStruct((n, h, w, cop), out_dtype)
        out_spec = pl.BlockSpec((1, th, w, cop), lambda bn, bi: (bn, bi, 0, 0))

    return pl.pallas_call(
        kernel,
        out_shape=out_shape,
        grid=(n, n_row_blocks),
        in_specs=[
            top_spec,
            pl.BlockSpec((1, th, w, cp), lambda bn, bi: (bn, bi, 0, 0)),
            bot_spec,
            pl.BlockSpec((3, 3, cp), lambda bn, bi: (0, 0, 0)),
            pl.BlockSpec((1, cp), lambda bn, bi: (0, 0)),
            pl.BlockSpec((1, cp), lambda bn, bi: (0, 0)),
            pl.BlockSpec((cp, cop), lambda bn, bi: (0, 0)),
            pl.BlockSpec((1, cop), lambda bn, bi: (0, 0)),
            pl.BlockSpec((1, cop), lambda bn, bi: (0, 0)),
        ],
        out_specs=out_spec,
        compiler_params=pltpu.CompilerParams(
            dimension_semantics=("parallel", "parallel"),
            # explicit scoped-VMEM request with headroom: safe on v5e/v6e (128 MiB)
            # and on v7x (64 MiB total VMEM)
            vmem_limit_bytes=32 * 1024 * 1024),
    )(x, x, x, p["dw_w"], p["dw_s"], p["dw_b"], p["pw_w"], p["pw_s"], p["pw_b"])


def _choose_tile_rows(h, w, cp_in, cp_out, budget_bytes=6 * 1024 * 1024):
    """Largest even divisor of H whose double-buffered tiles fit the budget,
    preferring >= 2 row blocks (pipeline depth / both v7x TensorCores)."""

    def tile_bytes(th):
        in_b = (th + 4) * w * cp_in * 4          # padded input rows (worst case f32)
        out_b = 2 * th * w * 2 * cp_out * 4      # worst case: upsampled output tile
        return 2 * (in_b + out_b)                # x2: double buffering

    divisors = [d for d in range(h, 0, -1) if h % d == 0 and d % 2 == 0]
    for th in divisors:
        if 2 * th <= h and tile_bytes(th) <= budget_bytes:
            return th
    for th in divisors:
        if tile_bytes(th) <= budget_bytes:
            return th
    return divisors[-1]


def _pad_module_params(p, cp_in, cp_out):
    """Zero-pad channels to lane-friendly sizes; pw weight stored in bf16 (MXU operand)."""
    cin = p["dw_w"].shape[-1]
    cout = p["pw_w"].shape[-1]
    return dict(
        dw_w=jnp.pad(p["dw_w"], ((0, 0), (0, 0), (0, cp_in - cin))),
        dw_s=jnp.pad(p["dw_scale"], (0, cp_in - cin)).reshape(1, cp_in),
        dw_b=jnp.pad(p["dw_bias"], (0, cp_in - cin)).reshape(1, cp_in),
        pw_w=jnp.pad(p["pw_w"], ((0, cp_in - cin), (0, cp_out - cout))).astype(jnp.bfloat16),
        pw_s=jnp.pad(p["pw_scale"], (0, cp_out - cout)).reshape(1, cp_out),
        pw_b=jnp.pad(p["pw_bias"], (0, cp_out - cout)).reshape(1, cp_out),
    )


# ----------------------------------------------------------------------------
# MC forward (NCHW in / NCHW out, like the PyTorch module)
# ----------------------------------------------------------------------------
@jax.jit
def mc_forward(x_nchw, params):
    n, cin, h, w = x_nchw.shape
    cout = params[1]["pw_w"].shape[-1]
    assert params[0]["pw_w"].shape[-1] == params[1]["dw_w"].shape[-1]
    assert h % 2 == 0, "MC kernel assumes an even input height"
    cp_in = _round_up(cin, LANE)
    cp_mid = _round_up(cout, LANE)

    # NOTE: in a full pipeline keep activations NHWC end-to-end and skip these
    # layout transposes; they are kept for PyTorch (NCHW) interface parity.
    x = jnp.transpose(x_nchw, (0, 2, 3, 1))
    if cp_in != cin:
        x = jnp.pad(x, ((0, 0), (0, 0), (0, 0), (0, cp_in - cin)))

    p0 = _pad_module_params(params[0], cp_in, cp_mid)
    p1 = _pad_module_params(params[1], cp_mid, cp_mid)

    th = _choose_tile_rows(h, w, max(cp_in, cp_mid), cp_mid)

    # module 1 (intermediate kept in bf16: halves the inter-module HBM traffic)
    y = _dsconv_call(x, p0, th, fuse_upsample=False, out_dtype=jnp.bfloat16)
    # module 2 + fused 2x bilinear upsample (lane-interleaved columns)
    z = _dsconv_call(y, p1, th, fuse_upsample=True, out_dtype=x_nchw.dtype)
    z = z.reshape(n, 2 * h, 2 * w, cp_mid)[..., :cout]   # contiguous reshape + channel unpad
    return jnp.transpose(z, (0, 3, 1, 2))


# ----------------------------------------------------------------------------
# Parameter construction (deterministic, synthetic; BN folded -> scale/bias)
# ----------------------------------------------------------------------------
def _fold_bn(key, c, eps=1e-5):
    k1, k2, k3, k4 = jax.random.split(key, 4)
    gamma = 1.0 + 0.1 * jax.random.normal(k1, (c,), jnp.float32)
    beta = 0.1 * jax.random.normal(k2, (c,), jnp.float32)
    mean = 0.05 * jax.random.normal(k3, (c,), jnp.float32)
    var = 1.0 + 0.1 * jax.random.uniform(k4, (c,), jnp.float32)
    scale = gamma / jnp.sqrt(var + eps)
    bias = beta - mean * scale
    return scale, bias


def make_mc_params(key, in_channels, out_channels):
    # NOTE: a real PyTorch depthwise weight (C,1,3,3) maps to dw_w[ky,kx,c] here.
    params = []
    cin = in_channels
    for _ in range(2):
        key, kdw, kpw, kbn1, kbn2 = jax.random.split(key, 5)
        dw_w = 0.1 * jax.random.normal(kdw, (3, 3, cin), jnp.float32)
        pw_w = 0.1 * jax.random.normal(kpw, (cin, out_channels), jnp.float32)
        dw_scale, dw_bias = _fold_bn(kbn1, cin)
        pw_scale, pw_bias = _fold_bn(kbn2, out_channels)
        params.append(dict(dw_w=dw_w, dw_scale=dw_scale, dw_bias=dw_bias,
                           pw_w=pw_w, pw_scale=pw_scale, pw_bias=pw_bias))
        cin = out_channels
    return params


# ----------------------------------------------------------------------------
# Pure-JAX (f32) reference with the same inference-mode semantics
# ----------------------------------------------------------------------------
def _mc_reference(x_nchw, params):
    x = jnp.transpose(x_nchw, (0, 2, 3, 1)).astype(jnp.float32)
    for p in params:
        xp = jnp.pad(x, ((0, 0), (1, 1), (1, 1), (0, 0)))
        n, hp, wp, c = xp.shape
        h, w = hp - 2, wp - 2
        acc = jnp.zeros((n, h, w, c), jnp.float32)
        for dy in range(3):
            for dx in range(3):
                acc = acc + xp[:, dy:dy + h, dx:dx + w, :] * p["dw_w"][dy, dx]
        y = jnp.maximum(acc * p["dw_scale"] + p["dw_bias"], 0.0)
        z = jnp.einsum("nhwc,cd->nhwd", y, p["pw_w"])
        x = jnp.maximum(z * p["pw_scale"] + p["pw_bias"], 0.0)

    def up_axis(v, axis):  # bilinear 2x, align_corners=False
        first = jax.lax.slice_in_dim(v, 0, 1, axis=axis)
        last = jax.lax.slice_in_dim(v, v.shape[axis] - 1, v.shape[axis], axis=axis)
        lo = jax.lax.slice_in_dim(v, 0, v.shape[axis] - 1, axis=axis)
        hi = jax.lax.slice_in_dim(v, 1, v.shape[axis], axis=axis)
        prev = jnp.concatenate([first, lo], axis=axis)
        nxt = jnp.concatenate([hi, last], axis=axis)
        even = 0.25 * prev + 0.75 * v
        odd = 0.75 * v + 0.25 * nxt
        new_shape = list(v.shape)
        new_shape[axis] *= 2
        return jnp.stack([even, odd], axis=axis + 1).reshape(new_shape)

    x = up_axis(x, 1)
    x = up_axis(x, 2)
    return jnp.transpose(x, (0, 3, 1, 2))


if __name__ == "__main__":
    key = jax.random.PRNGKey(0)
    k_x, k_p = jax.random.split(key)

    N, Cin, H, W = 2, 4, 16, 16
    Cout = 8
    x = jax.random.normal(k_x, (N, Cin, H, W), jnp.float32)
    params = make_mc_params(k_p, Cin, Cout)

    out = jax.block_until_ready(mc_forward(x, params))
    assert out.shape == (N, Cout, 2 * H, 2 * W), out.shape

    ref = jax.block_until_ready(_mc_reference(x, params))
    np.testing.assert_allclose(np.asarray(out), np.asarray(ref), rtol=3e-2, atol=3e-2)
    print("KERNEL_OK")
</pallas_src>

<mosaic_0001>
module attributes {stable_mosaic.version = 11 : i64} {
  func.func @_fused_dsconv_kernel(%arg0: i32, %arg1: i32, %arg2: memref<1x1x16x128xf32, #tpu.memory_space<vmem>>, %arg3: memref<1x8x16x128xf32, #tpu.memory_space<vmem>>, %arg4: memref<1x1x16x128xf32, #tpu.memory_space<vmem>>, %arg5: memref<3x3x128xf32, #tpu.memory_space<vmem>>, %arg6: memref<1x128xf32, #tpu.memory_space<vmem>>, %arg7: memref<1x128xf32, #tpu.memory_space<vmem>>, %arg8: memref<128x128xbf16, #tpu.memory_space<vmem>>, %arg9: memref<1x128xf32, #tpu.memory_space<vmem>>, %arg10: memref<1x128xf32, #tpu.memory_space<vmem>>, %arg11: memref<1x8x16x128xbf16, #tpu.memory_space<vmem>>) attributes {dimension_semantics = [#tpu.dimension_semantics<parallel>, #tpu.dimension_semantics<parallel>], iteration_bounds = array<i64: 2, 2>, scalar_prefetch = 0 : i64, scratch_operands = 0 : i64, tpu.core_type = #tpu.core_type<tc>, window_params = [{transform_indices = @transform_0, window_bounds = array<i64: 1, 1, 16, 128>}, {transform_indices = @transform_1, window_bounds = array<i64: 1, 8, 16, 128>}, {transform_indices = @transform_2, window_bounds = array<i64: 1, 1, 16, 128>}, {pipeline_mode = #tpu.pipeline_mode<synchronous>, transform_indices = @transform_3, window_bounds = array<i64: 3, 3, 128>}, {pipeline_mode = #tpu.pipeline_mode<synchronous>, transform_indices = @transform_4, window_bounds = array<i64: 1, 128>}, {pipeline_mode = #tpu.pipeline_mode<synchronous>, transform_indices = @transform_5, window_bounds = array<i64: 1, 128>}, {pipeline_mode = #tpu.pipeline_mode<synchronous>, transform_indices = @transform_6, window_bounds = array<i64: 128, 128>}, {pipeline_mode = #tpu.pipeline_mode<synchronous>, transform_indices = @transform_7, window_bounds = array<i64: 1, 128>}, {pipeline_mode = #tpu.pipeline_mode<synchronous>, transform_indices = @transform_8, window_bounds = array<i64: 1, 128>}, {transform_indices = @transform_9, window_bounds = array<i64: 1, 8, 16, 128>}]} {
    %c0 = arith.constant 0 : index
    %c0_0 = arith.constant 0 : index
    %c0_1 = arith.constant 0 : index
    %c0_2 = arith.constant 0 : index
    %0 = vector.load %arg3[%c0, %c0_0, %c0_1, %c0_2] : memref<1x8x16x128xf32, #tpu.memory_space<vmem>>, vector<1x8x16x128xf32>
    %1 = vector.shape_cast %0 : vector<1x8x16x128xf32> to vector<8x16x128xf32>
    %c0_i32 = arith.constant 0 : i32
    %2 = arith.cmpi eq, %arg1, %c0_i32 : i32
    %c0_3 = arith.constant 0 : index
    %c0_4 = arith.constant 0 : index
    %c0_5 = arith.constant 0 : index
    %c0_6 = arith.constant 0 : index
    %3 = vector.load %arg2[%c0_3, %c0_4, %c0_5, %c0_6] : memref<1x1x16x128xf32, #tpu.memory_space<vmem>>, vector<1x1x16x128xf32>
    %4 = vector.shape_cast %3 : vector<1x1x16x128xf32> to vector<1x16x128xf32>
    %cst = arith.constant 0.000000e+00 : f32
    %5 = vector.broadcast %cst : f32 to vector<1x16x128xf32>
    %6 = arith.select %2, %5, %4 : vector<1x16x128xf32>
    %c1_i32 = arith.constant 1 : i32
    %7 = arith.cmpi eq, %arg1, %c1_i32 : i32
    %c0_7 = arith.constant 0 : index
    %c0_8 = arith.constant 0 : index
    %c0_9 = arith.constant 0 : index
    %c0_10 = arith.constant 0 : index
    %8 = vector.load %arg4[%c0_7, %c0_8, %c0_9, %c0_10] : memref<1x1x16x128xf32, #tpu.memory_space<vmem>>, vector<1x1x16x128xf32>
    %9 = vector.shape_cast %8 : vector<1x1x16x128xf32> to vector<1x16x128xf32>
    %cst_11 = arith.constant 0.000000e+00 : f32
    %10 = vector.broadcast %cst_11 : f32 to vector<1x16x128xf32>
    %11 = arith.select %7, %10, %9 : vector<1x16x128xf32>
    %12 = tpu.concatenate %6, %1, %11 in 0 : vector<1x16x128xf32>, vector<8x16x128xf32>, vector<1x16x128xf32> -> vector<10x16x128xf32>
    %c0_12 = arith.constant 0 : index
    %c0_13 = arith.constant 0 : index
    %c0_14 = arith.constant 0 : index
    %13 = vector.load %arg5[%c0_12, %c0_13, %c0_14] : memref<3x3x128xf32, #tpu.memory_space<vmem>>, vector<3x3x128xf32>
    %c0_15 = arith.constant 0 : index
    %c0_16 = arith.constant 0 : index
    %14 = vector.load %arg6[%c0_15, %c0_16] : memref<1x128xf32, #tpu.memory_space<vmem>>, vector<1x128xf32>
    %c0_17 = arith.constant 0 : index
    %c0_18 = arith.constant 0 : index
    %15 = vector.load %arg7[%c0_17, %c0_18] : memref<1x128xf32, #tpu.memory_space<vmem>>, vector<1x128xf32>
    %c0_19 = arith.constant 0 : index
    %c0_20 = arith.constant 0 : index
    %16 = vector.load %arg9[%c0_19, %c0_20] : memref<1x128xf32, #tpu.memory_space<vmem>>, vector<1x128xf32>
    %c0_21 = arith.constant 0 : index
    %c0_22 = arith.constant 0 : index
    %17 = vector.load %arg10[%c0_21, %c0_22] : memref<1x128xf32, #tpu.memory_space<vmem>>, vector<1x128xf32>
    %cst_23 = arith.constant 0.000000e+00 : f32
    %18 = vector.broadcast %cst_23 : f32 to vector<10x1x128xf32>
    %19 = vector.extract_strided_slice %12 {offsets = [0, 0, 0], sizes = [10, 15, 128], strides = [1, 1, 1]} : vector<10x16x128xf32> to vector<10x15x128xf32>
    %20 = tpu.concatenate %18, %19 in 1 : vector<10x1x128xf32>, vector<10x15x128xf32> -> vector<10x16x128xf32>
    %21 = vector.extract_strided_slice %12 {offsets = [0, 1, 0], sizes = [10, 15, 128], strides = [1, 1, 1]} : vector<10x16x128xf32> to vector<10x15x128xf32>
    %22 = tpu.concatenate %21, %18 in 1 : vector<10x15x128xf32>, vector<10x1x128xf32> -> vector<10x16x128xf32>
    %cst_24 = arith.constant 0.000000e+00 : f32
    %23 = vector.broadcast %cst_24 : f32 to vector<8x16x128xf32>
    %24 = vector.extract_strided_slice %20 {offsets = [0, 0, 0], sizes = [8, 16, 128], strides = [1, 1, 1]} : vector<10x16x128xf32> to vector<8x16x128xf32>
    %25 = vector.extract_strided_slice %13 {offsets = [0, 0, 0], sizes = [1, 1, 128], strides = [1, 1, 1]} : vector<3x3x128xf32> to vector<1x1x128xf32>
    %26 = vector.shape_cast %25 : vector<1x1x128xf32> to vector<128xf32>
    %27 = vector.shape_cast %26 : vector<128xf32> to vector<1x1x128xf32>
    %28 = vector.broadcast %27 : vector<1x1x128xf32> to vector<8x16x128xf32>
    %29 = arith.mulf %24, %28 : vector<8x16x128xf32>
    %30 = arith.addf %23, %29 : vector<8x16x128xf32>
    %31 = vector.extract_strided_slice %12 {offsets = [0, 0, 0], sizes = [8, 16, 128], strides = [1, 1, 1]} : vector<10x16x128xf32> to vector<8x16x128xf32>
    %32 = vector.extract_strided_slice %13 {offsets = [0, 1, 0], sizes = [1, 1, 128], strides = [1, 1, 1]} : vector<3x3x128xf32> to vector<1x1x128xf32>
    %33 = vector.shape_cast %32 : vector<1x1x128xf32> to vector<128xf32>
    %34 = vector.shape_cast %33 : vector<128xf32> to vector<1x1x128xf32>
    %35 = vector.broadcast %34 : vector<1x1x128xf32> to vector<8x16x128xf32>
    %36 = arith.mulf %31, %35 : vector<8x16x128xf32>
    %37 = arith.addf %30, %36 : vector<8x16x128xf32>
    %38 = vector.extract_strided_slice %22 {offsets = [0, 0, 0], sizes = [8, 16, 128], strides = [1, 1, 1]} : vector<10x16x128xf32> to vector<8x16x128xf32>
    %39 = vector.extract_strided_slice %13 {offsets = [0, 2, 0], sizes = [1, 1, 128], strides = [1, 1, 1]} : vector<3x3x128xf32> to vector<1x1x128xf32>
    %40 = vector.shape_cast %39 : vector<1x1x128xf32> to vector<128xf32>
    %41 = vector.shape_cast %40 : vector<128xf32> to vector<1x1x128xf32>
    %42 = vector.broadcast %41 : vector<1x1x128xf32> to vector<8x16x128xf32>
    %43 = arith.mulf %38, %42 : vector<8x16x128xf32>
    %44 = arith.addf %37, %43 : vector<8x16x128xf32>
    %45 = vector.extract_strided_slice %20 {offsets = [1, 0, 0], sizes = [8, 16, 128], strides = [1, 1, 1]} : vector<10x16x128xf32> to vector<8x16x128xf32>
    %46 = vector.extract_strided_slice %13 {offsets = [1, 0, 0], sizes = [1, 1, 128], strides = [1, 1, 1]} : vector<3x3x128xf32> to vector<1x1x128xf32>
    %47 = vector.shape_cast %46 : vector<1x1x128xf32> to vector<128xf32>
    %48 = vector.shape_cast %47 : vector<128xf32> to vector<1x1x128xf32>
    %49 = vector.broadcast %48 : vector<1x1x128xf32> to vector<8x16x128xf32>
    %50 = arith.mulf %45, %49 : vector<8x16x128xf32>
    %51 = arith.addf %44, %50 : vector<8x16x128xf32>
    %52 = vector.extract_strided_slice %12 {offsets = [1, 0, 0], sizes = [8, 16, 128], strides = [1, 1, 1]} : vector<10x16x128xf32> to vector<8x16x128xf32>
    %53 = vector.extract_strided_slice %13 {offsets = [1, 1, 0], sizes = [1, 1, 128], strides = [1, 1, 1]} : vector<3x3x128xf32> to vector<1x1x128xf32>
    %54 = vector.shape_cast %53 : vector<1x1x128xf32> to vector<128xf32>
    %55 = vector.shape_cast %54 : vector<128xf32> to vector<1x1x128xf32>
    %56 = vector.broadcast %55 : vector<1x1x128xf32> to vector<8x16x128xf32>
    %57 = arith.mulf %52, %56 : vector<8x16x128xf32>
    %58 = arith.addf %51, %57 : vector<8x16x128xf32>
    %59 = vector.extract_strided_slice %22 {offsets = [1, 0, 0], sizes = [8, 16, 128], strides = [1, 1, 1]} : vector<10x16x128xf32> to vector<8x16x128xf32>
    %60 = vector.extract_strided_slice %13 {offsets = [1, 2, 0], sizes = [1, 1, 128], strides = [1, 1, 1]} : vector<3x3x128xf32> to vector<1x1x128xf32>
    %61 = vector.shape_cast %60 : vector<1x1x128xf32> to vector<128xf32>
    %62 = vector.shape_cast %61 : vector<128xf32> to vector<1x1x128xf32>
    %63 = vector.broadcast %62 : vector<1x1x128xf32> to vector<8x16x128xf32>
    %64 = arith.mulf %59, %63 : vector<8x16x128xf32>
    %65 = arith.addf %58, %64 : vector<8x16x128xf32>
    %66 = vector.extract_strided_slice %20 {offsets = [2, 0, 0], sizes = [8, 16, 128], strides = [1, 1, 1]} : vector<10x16x128xf32> to vector<8x16x128xf32>
    %67 = vector.extract_strided_slice %13 {offsets = [2, 0, 0], sizes = [1, 1, 128], strides = [1, 1, 1]} : vector<3x3x128xf32> to vector<1x1x128xf32>
    %68 = vector.shape_cast %67 : vector<1x1x128xf32> to vector<128xf32>
    %69 = vector.shape_cast %68 : vector<128xf32> to vector<1x1x128xf32>
    %70 = vector.broadcast %69 : vector<1x1x128xf32> to vector<8x16x128xf32>
    %71 = arith.mulf %66, %70 : vector<8x16x128xf32>
    %72 = arith.addf %65, %71 : vector<8x16x128xf32>
    %73 = vector.extract_strided_slice %12 {offsets = [2, 0, 0], sizes = [8, 16, 128], strides = [1, 1, 1]} : vector<10x16x128xf32> to vector<8x16x128xf32>
    %74 = vector.extract_strided_slice %13 {offsets = [2, 1, 0], sizes = [1, 1, 128], strides = [1, 1, 1]} : vector<3x3x128xf32> to vector<1x1x128xf32>
    %75 = vector.shape_cast %74 : vector<1x1x128xf32> to vector<128xf32>
    %76 = vector.shape_cast %75 : vector<128xf32> to vector<1x1x128xf32>
    %77 = vector.broadcast %76 : vector<1x1x128xf32> to vector<8x16x128xf32>
    %78 = arith.mulf %73, %77 : vector<8x16x128xf32>
    %79 = arith.addf %72, %78 : vector<8x16x128xf32>
    %80 = vector.extract_strided_slice %22 {offsets = [2, 0, 0], sizes = [8, 16, 128], strides = [1, 1, 1]} : vector<10x16x128xf32> to vector<8x16x128xf32>
    %81 = vector.extract_strided_slice %13 {offsets = [2, 2, 0], sizes = [1, 1, 128], strides = [1, 1, 1]} : vector<3x3x128xf32> to vector<1x1x128xf32>
    %82 = vector.shape_cast %81 : vector<1x1x128xf32> to vector<128xf32>
    %83 = vector.shape_cast %82 : vector<128xf32> to vector<1x1x128xf32>
    %84 = vector.broadcast %83 : vector<1x1x128xf32> to vector<8x16x128xf32>
    %85 = arith.mulf %80, %84 : vector<8x16x128xf32>
    %86 = arith.addf %79, %85 : vector<8x16x128xf32>
    %87 = vector.shape_cast %14 : vector<1x128xf32> to vector<1x1x128xf32>
    %88 = vector.broadcast %87 : vector<1x1x128xf32> to vector<8x16x128xf32>
    %89 = arith.mulf %86, %88 : vector<8x16x128xf32>
    %90 = vector.shape_cast %15 : vector<1x128xf32> to vector<1x1x128xf32>
    %91 = vector.broadcast %90 : vector<1x1x128xf32> to vector<8x16x128xf32>
    %92 = arith.addf %89, %91 : vector<8x16x128xf32>
    %cst_25 = arith.constant 0.000000e+00 : f32
    %93 = vector.broadcast %cst_25 : f32 to vector<8x16x128xf32>
    %94 = arith.maximumf %92, %93 : vector<8x16x128xf32>
    %95 = vector.shape_cast %94 : vector<8x16x128xf32> to vector<128x128xf32>
    %96 = arith.truncf %95 : vector<128x128xf32> to vector<128x128xbf16>
    %c0_26 = arith.constant 0 : index
    %c0_27 = arith.constant 0 : index
    %97 = vector.load %arg8[%c0_26, %c0_27] : memref<128x128xbf16, #tpu.memory_space<vmem>>, vector<128x128xbf16>
    %cst_28 = arith.constant dense<0.000000e+00> : vector<128x128xf32>
    %98 = tpu.matmul %96, %97, %cst_28 {dimension_numbers = #tpu.dot_dimension_numbers<[1], [0], [0], [1], [0, 0, 1, 1], [], []>} : vector<128x128xbf16>, vector<128x128xbf16>, vector<128x128xf32> -> vector<128x128xf32>
    %99 = vector.broadcast %16 : vector<1x128xf32> to vector<128x128xf32>
    %100 = arith.mulf %98, %99 : vector<128x128xf32>
    %101 = vector.broadcast %17 : vector<1x128xf32> to vector<128x128xf32>
    %102 = arith.addf %100, %101 : vector<128x128xf32>
    %cst_29 = arith.constant 0.000000e+00 : f32
    %103 = vector.broadcast %cst_29 : f32 to vector<128x128xf32>
    %104 = arith.maximumf %102, %103 : vector<128x128xf32>
    %105 = vector.shape_cast %104 : vector<128x128xf32> to vector<8x16x128xf32>
    %106 = arith.truncf %105 : vector<8x16x128xf32> to vector<8x16x128xbf16>
    %c0_30 = arith.constant 0 : index
    %c0_31 = arith.constant 0 : index
    %c0_32 = arith.constant 0 : index
    %c0_33 = arith.constant 0 : index
    %107 = vector.load %arg11[%c0_30, %c0_31, %c0_32, %c0_33] : memref<1x8x16x128xbf16, #tpu.memory_space<vmem>>, vector<1x8x16x128xbf16>
    %108 = vector.shape_cast %107 : vector<1x8x16x128xbf16> to vector<8x16x128xbf16>
    %109 = vector.shape_cast %106 : vector<8x16x128xbf16> to vector<1x8x16x128xbf16>
    tpu.vector_store %arg11[%c0_30, %c0_31, %c0_32, %c0_33], %109 {strides = array<i32>} : memref<1x8x16x128xbf16, #tpu.memory_space<vmem>>, vector<1x8x16x128xbf16>,
    return
  }
  func.func @transform_0(%arg0: i32, %arg1: i32) -> (i32, i32, i32, i32) {
    %c8_i32 = arith.constant 8 : i32
    %0 = arith.muli %arg1, %c8_i32 : i32
    %c1_i32 = arith.constant 1 : i32
    %1 = arith.subi %0, %c1_i32 : i32
    %c0_i32 = arith.constant 0 : i32
    %2 = arith.maxsi %1, %c0_i32 : i32
    %c0_i32_0 = arith.constant 0 : i32
    %c0_i32_1 = arith.constant 0 : i32
    %c0_i32_2 = arith.constant 0 : i32
    return %arg0, %2, %c0_i32_0, %c0_i32_1 : i32, i32, i32, i32
  }
  func.func @transform_1(%arg0: i32, %arg1: i32) -> (i32, i32, i32, i32) {
    %c0_i32 = arith.constant 0 : i32
    %c0_i32_0 = arith.constant 0 : i32
    %c0_i32_1 = arith.constant 0 : i32
    return %arg0, %arg1, %c0_i32, %c0_i32_0 : i32, i32, i32, i32
  }
  func.func @transform_2(%arg0: i32, %arg1: i32) -> (i32, i32, i32, i32) {
    %c1_i32 = arith.constant 1 : i32
    %0 = arith.addi %arg1, %c1_i32 : i32
    %c8_i32 = arith.constant 8 : i32
    %1 = arith.muli %0, %c8_i32 : i32
    %c15_i32 = arith.constant 15 : i32
    %2 = arith.minsi %1, %c15_i32 : i32
    %c0_i32 = arith.constant 0 : i32
    %c0_i32_0 = arith.constant 0 : i32
    %c0_i32_1 = arith.constant 0 : i32
    return %arg0, %2, %c0_i32, %c0_i32_0 : i32, i32, i32, i32
  }
  func.func @transform_3(%arg0: i32, %arg1: i32) -> (i32, i32, i32) {
    %c0_i32 = arith.constant 0 : i32
    %c0_i32_0 = arith.constant 0 : i32
    %c0_i32_1 = arith.constant 0 : i32
    %c0_i32_2 = arith.constant 0 : i32
    return %c0_i32, %c0_i32_0, %c0_i32_1 : i32, i32, i32
  }
  func.func @transform_4(%arg0: i32, %arg1: i32) -> (i32, i32) {
    %c0_i32 = arith.constant 0 : i32
    %c0_i32_0 = arith.constant 0 : i32
    %c0_i32_1 = arith.constant 0 : i32
    return %c0_i32, %c0_i32_0 : i32, i32
  }
  func.func @transform_5(%arg0: i32, %arg1: i32) -> (i32, i32) {
    %c0_i32 = arith.constant 0 : i32
    %c0_i32_0 = arith.constant 0 : i32
    %c0_i32_1 = arith.constant 0 : i32
    return %c0_i32, %c0_i32_0 : i32, i32
  }
  func.func @transform_6(%arg0: i32, %arg1: i32) -> (i32, i32) {
    %c0_i32 = arith.constant 0 : i32
    %c0_i32_0 = arith.constant 0 : i32
    %c0_i32_1 = arith.constant 0 : i32
    return %c0_i32, %c0_i32_0 : i32, i32
  }
  func.func @transform_7(%arg0: i32, %arg1: i32) -> (i32, i32) {
    %c0_i32 = arith.constant 0 : i32
    %c0_i32_0 = arith.constant 0 : i32
    %c0_i32_1 = arith.constant 0 : i32
    return %c0_i32, %c0_i32_0 : i32, i32
  }
  func.func @transform_8(%arg0: i32, %arg1: i32) -> (i32, i32) {
    %c0_i32 = arith.constant 0 : i32
    %c0_i32_0 = arith.constant 0 : i32
    %c0_i32_1 = arith.constant 0 : i32
    return %c0_i32, %c0_i32_0 : i32, i32
  }
  func.func @transform_9(%arg0: i32, %arg1: i32) -> (i32, i32, i32, i32) {
    %c0_i32 = arith.constant 0 : i32
    %c0_i32_0 = arith.constant 0 : i32
    %c0_i32_1 = arith.constant 0 : i32
    return %arg0, %arg1, %c0_i32, %c0_i32_0 : i32, i32, i32, i32
  }
}

module attributes {stable_mosaic.version = 11 : i64} {
  func.func @_fused_dsconv_kernel(%arg0: i32, %arg1: i32, %arg2: memref<1x2x16x128xbf16, #tpu.memory_space<vmem>>, %arg3: memref<1x8x16x128xbf16, #tpu.memory_space<vmem>>, %arg4: memref<1x2x16x128xbf16, #tpu.memory_space<vmem>>, %arg5: memref<3x3x128xf32, #tpu.memory_space<vmem>>, %arg6: memref<1x128xf32, #tpu.memory_space<vmem>>, %arg7: memref<1x128xf32, #tpu.memory_space<vmem>>, %arg8: memref<128x128xbf16, #tpu.memory_space<vmem>>, %arg9: memref<1x128xf32, #tpu.memory_space<vmem>>, %arg10: memref<1x128xf32, #tpu.memory_space<vmem>>, %arg11: memref<1x16x16x256xf32, #tpu.memory_space<vmem>>) attributes {dimension_semantics = [#tpu.dimension_semantics<parallel>, #tpu.dimension_semantics<parallel>], iteration_bounds = array<i64: 2, 2>, scalar_prefetch = 0 : i64, scratch_operands = 0 : i64, tpu.core_type = #tpu.core_type<tc>, window_params = [{transform_indices = @transform_0, window_bounds = array<i64: 1, 2, 16, 128>}, {transform_indices = @transform_1, window_bounds = array<i64: 1, 8, 16, 128>}, {transform_indices = @transform_2, window_bounds = array<i64: 1, 2, 16, 128>}, {pipeline_mode = #tpu.pipeline_mode<synchronous>, transform_indices = @transform_3, window_bounds = array<i64: 3, 3, 128>}, {pipeline_mode = #tpu.pipeline_mode<synchronous>, transform_indices = @transform_4, window_bounds = array<i64: 1, 128>}, {pipeline_mode = #tpu.pipeline_mode<synchronous>, transform_indices = @transform_5, window_bounds = array<i64: 1, 128>}, {pipeline_mode = #tpu.pipeline_mode<synchronous>, transform_indices = @transform_6, window_bounds = array<i64: 128, 128>}, {pipeline_mode = #tpu.pipeline_mode<synchronous>, transform_indices = @transform_7, window_bounds = array<i64: 1, 128>}, {pipeline_mode = #tpu.pipeline_mode<synchronous>, transform_indices = @transform_8, window_bounds = array<i64: 1, 128>}, {transform_indices = @transform_9, window_bounds = array<i64: 1, 16, 16, 256>}]} {
    %c0 = arith.constant 0 : index
    %c0_0 = arith.constant 0 : index
    %c0_1 = arith.constant 0 : index
    %c0_2 = arith.constant 0 : index
    %0 = vector.load %arg3[%c0, %c0_0, %c0_1, %c0_2] : memref<1x8x16x128xbf16, #tpu.memory_space<vmem>>, vector<1x8x16x128xbf16>
    %1 = vector.shape_cast %0 : vector<1x8x16x128xbf16> to vector<8x16x128xbf16>
    %2 = arith.extf %1 : vector<8x16x128xbf16> to vector<8x16x128xf32>
    %c0_i32 = arith.constant 0 : i32
    %3 = arith.cmpi eq, %arg1, %c0_i32 : i32
    %c0_3 = arith.constant 0 : index
    %c0_4 = arith.constant 0 : index
    %c0_5 = arith.constant 0 : index
    %c0_6 = arith.constant 0 : index
    %4 = vector.load %arg2[%c0_3, %c0_4, %c0_5, %c0_6] : memref<1x2x16x128xbf16, #tpu.memory_space<vmem>>, vector<1x2x16x128xbf16>
    %5 = vector.shape_cast %4 : vector<1x2x16x128xbf16> to vector<2x16x128xbf16>
    %6 = arith.extf %5 : vector<2x16x128xbf16> to vector<2x16x128xf32>
    %cst = arith.constant 0.000000e+00 : f32
    %7 = vector.broadcast %cst : f32 to vector<2x16x128xf32>
    %8 = arith.select %3, %7, %6 : vector<2x16x128xf32>
    %c1_i32 = arith.constant 1 : i32
    %9 = arith.cmpi eq, %arg1, %c1_i32 : i32
    %c0_7 = arith.constant 0 : index
    %c0_8 = arith.constant 0 : index
    %c0_9 = arith.constant 0 : index
    %c0_10 = arith.constant 0 : index
    %10 = vector.load %arg4[%c0_7, %c0_8, %c0_9, %c0_10] : memref<1x2x16x128xbf16, #tpu.memory_space<vmem>>, vector<1x2x16x128xbf16>
    %11 = vector.shape_cast %10 : vector<1x2x16x128xbf16> to vector<2x16x128xbf16>
    %12 = arith.extf %11 : vector<2x16x128xbf16> to vector<2x16x128xf32>
    %cst_11 = arith.constant 0.000000e+00 : f32
    %13 = vector.broadcast %cst_11 : f32 to vector<2x16x128xf32>
    %14 = arith.select %9, %13, %12 : vector<2x16x128xf32>
    %15 = tpu.concatenate %8, %2, %14 in 0 : vector<2x16x128xf32>, vector<8x16x128xf32>, vector<2x16x128xf32> -> vector<12x16x128xf32>
    %c0_12 = arith.constant 0 : index
    %c0_13 = arith.constant 0 : index
    %c0_14 = arith.constant 0 : index
    %16 = vector.load %arg5[%c0_12, %c0_13, %c0_14] : memref<3x3x128xf32, #tpu.memory_space<vmem>>, vector<3x3x128xf32>
    %c0_15 = arith.constant 0 : index
    %c0_16 = arith.constant 0 : index
    %17 = vector.load %arg6[%c0_15, %c0_16] : memref<1x128xf32, #tpu.memory_space<vmem>>, vector<1x128xf32>
    %c0_17 = arith.constant 0 : index
    %c0_18 = arith.constant 0 : index
    %18 = vector.load %arg7[%c0_17, %c0_18] : memref<1x128xf32, #tpu.memory_space<vmem>>, vector<1x128xf32>
    %c0_19 = arith.constant 0 : index
    %c0_20 = arith.constant 0 : index
    %19 = vector.load %arg9[%c0_19, %c0_20] : memref<1x128xf32, #tpu.memory_space<vmem>>, vector<1x128xf32>
    %c0_21 = arith.constant 0 : index
    %c0_22 = arith.constant 0 : index
    %20 = vector.load %arg10[%c0_21, %c0_22] : memref<1x128xf32, #tpu.memory_space<vmem>>, vector<1x128xf32>
    %cst_23 = arith.constant 0.000000e+00 : f32
    %21 = vector.broadcast %cst_23 : f32 to vector<12x1x128xf32>
    %22 = vector.extract_strided_slice %15 {offsets = [0, 0, 0], sizes = [12, 15, 128], strides = [1, 1, 1]} : vector<12x16x128xf32> to vector<12x15x128xf32>
    %23 = tpu.concatenate %21, %22 in 1 : vector<12x1x128xf32>, vector<12x15x128xf32> -> vector<12x16x128xf32>
    %24 = vector.extract_strided_slice %15 {offsets = [0, 1, 0], sizes = [12, 15, 128], strides = [1, 1, 1]} : vector<12x16x128xf32> to vector<12x15x128xf32>
    %25 = tpu.concatenate %24, %21 in 1 : vector<12x15x128xf32>, vector<12x1x128xf32> -> vector<12x16x128xf32>
    %cst_24 = arith.constant 0.000000e+00 : f32
    %26 = vector.broadcast %cst_24 : f32 to vector<10x16x128xf32>
    %27 = vector.extract_strided_slice %23 {offsets = [0, 0, 0], sizes = [10, 16, 128], strides = [1, 1, 1]} : vector<12x16x128xf32> to vector<10x16x128xf32>
    %28 = vector.extract_strided_slice %16 {offsets = [0, 0, 0], sizes = [1, 1, 128], strides = [1, 1, 1]} : vector<3x3x128xf32> to vector<1x1x128xf32>
    %29 = vector.shape_cast %28 : vector<1x1x128xf32> to vector<128xf32>
    %30 = vector.shape_cast %29 : vector<128xf32> to vector<1x1x128xf32>
    %31 = vector.broadcast %30 : vector<1x1x128xf32> to vector<10x16x128xf32>
    %32 = arith.mulf %27, %31 : vector<10x16x128xf32>
    %33 = arith.addf %26, %32 : vector<10x16x128xf32>
    %34 = vector.extract_strided_slice %15 {offsets = [0, 0, 0], sizes = [10, 16, 128], strides = [1, 1, 1]} : vector<12x16x128xf32> to vector<10x16x128xf32>
    %35 = vector.extract_strided_slice %16 {offsets = [0, 1, 0], sizes = [1, 1, 128], strides = [1, 1, 1]} : vector<3x3x128xf32> to vector<1x1x128xf32>
    %36 = vector.shape_cast %35 : vector<1x1x128xf32> to vector<128xf32>
    %37 = vector.shape_cast %36 : vector<128xf32> to vector<1x1x128xf32>
    %38 = vector.broadcast %37 : vector<1x1x128xf32> to vector<10x16x128xf32>
    %39 = arith.mulf %34, %38 : vector<10x16x128xf32>
    %40 = arith.addf %33, %39 : vector<10x16x128xf32>
    %41 = vector.extract_strided_slice %25 {offsets = [0, 0, 0], sizes = [10, 16, 128], strides = [1, 1, 1]} : vector<12x16x128xf32> to vector<10x16x128xf32>
    %42 = vector.extract_strided_slice %16 {offsets = [0, 2, 0], sizes = [1, 1, 128], strides = [1, 1, 1]} : vector<3x3x128xf32> to vector<1x1x128xf32>
    %43 = vector.shape_cast %42 : vector<1x1x128xf32> to vector<128xf32>
    %44 = vector.shape_cast %43 : vector<128xf32> to vector<1x1x128xf32>
    %45 = vector.broadcast %44 : vector<1x1x128xf32> to vector<10x16x128xf32>
    %46 = arith.mulf %41, %45 : vector<10x16x128xf32>
    %47 = arith.addf %40, %46 : vector<10x16x128xf32>
    %48 = vector.extract_strided_slice %23 {offsets = [1, 0, 0], sizes = [10, 16, 128], strides = [1, 1, 1]} : vector<12x16x128xf32> to vector<10x16x128xf32>
    %49 = vector.extract_strided_slice %16 {offsets = [1, 0, 0], sizes = [1, 1, 128], strides = [1, 1, 1]} : vector<3x3x128xf32> to vector<1x1x128xf32>
    %50 = vector.shape_cast %49 : vector<1x1x128xf32> to vector<128xf32>
    %51 = vector.shape_cast %50 : vector<128xf32> to vector<1x1x128xf32>
    %52 = vector.broadcast %51 : vector<1x1x128xf32> to vector<10x16x128xf32>
    %53 = arith.mulf %48, %52 : vector<10x16x128xf32>
    %54 = arith.addf %47, %53 : vector<10x16x128xf32>
    %55 = vector.extract_strided_slice %15 {offsets = [1, 0, 0], sizes = [10, 16, 128], strides = [1, 1, 1]} : vector<12x16x128xf32> to vector<10x16x128xf32>
    %56 = vector.extract_strided_slice %16 {offsets = [1, 1, 0], sizes = [1, 1, 128], strides = [1, 1, 1]} : vector<3x3x128xf32> to vector<1x1x128xf32>
    %57 = vector.shape_cast %56 : vector<1x1x128xf32> to vector<128xf32>
    %58 = vector.shape_cast %57 : vector<128xf32> to vector<1x1x128xf32>
    %59 = vector.broadcast %58 : vector<1x1x128xf32> to vector<10x16x128xf32>
    %60 = arith.mulf %55, %59 : vector<10x16x128xf32>
    %61 = arith.addf %54, %60 : vector<10x16x128xf32>
    %62 = vector.extract_strided_slice %25 {offsets = [1, 0, 0], sizes = [10, 16, 128], strides = [1, 1, 1]} : vector<12x16x128xf32> to vector<10x16x128xf32>
    %63 = vector.extract_strided_slice %16 {offsets = [1, 2, 0], sizes = [1, 1, 128], strides = [1, 1, 1]} : vector<3x3x128xf32> to vector<1x1x128xf32>
    %64 = vector.shape_cast %63 : vector<1x1x128xf32> to vector<128xf32>
    %65 = vector.shape_cast %64 : vector<128xf32> to vector<1x1x128xf32>
    %66 = vector.broadcast %65 : vector<1x1x128xf32> to vector<10x16x128xf32>
    %67 = arith.mulf %62, %66 : vector<10x16x128xf32>
    %68 = arith.addf %61, %67 : vector<10x16x128xf32>
    %69 = vector.extract_strided_slice %23 {offsets = [2, 0, 0], sizes = [10, 16, 128], strides = [1, 1, 1]} : vector<12x16x128xf32> to vector<10x16x128xf32>
    %70 = vector.extract_strided_slice %16 {offsets = [2, 0, 0], sizes = [1, 1, 128], strides = [1, 1, 1]} : vector<3x3x128xf32> to vector<1x1x128xf32>
    %71 = vector.shape_cast %70 : vector<1x1x128xf32> to vector<128xf32>
    %72 = vector.shape_cast %71 : vector<128xf32> to vector<1x1x128xf32>
    %73 = vector.broadcast %72 : vector<1x1x128xf32> to vector<10x16x128xf32>
    %74 = arith.mulf %69, %73 : vector<10x16x128xf32>
    %75 = arith.addf %68, %74 : vector<10x16x128xf32>
    %76 = vector.extract_strided_slice %15 {offsets = [2, 0, 0], sizes = [10, 16, 128], strides = [1, 1, 1]} : vector<12x16x128xf32> to vector<10x16x128xf32>
    %77 = vector.extract_strided_slice %16 {offsets = [2, 1, 0], sizes = [1, 1, 128], strides = [1, 1, 1]} : vector<3x3x128xf32> to vector<1x1x128xf32>
    %78 = vector.shape_cast %77 : vector<1x1x128xf32> to vector<128xf32>
    %79 = vector.shape_cast %78 : vector<128xf32> to vector<1x1x128xf32>
    %80 = vector.broadcast %79 : vector<1x1x128xf32> to vector<10x16x128xf32>
    %81 = arith.mulf %76, %80 : vector<10x16x128xf32>
    %82 = arith.addf %75, %81 : vector<10x16x128xf32>
    %83 = vector.extract_strided_slice %25 {offsets = [2, 0, 0], sizes = [10, 16, 128], strides = [1, 1, 1]} : vector<12x16x128xf32> to vector<10x16x128xf32>
    %84 = vector.extract_strided_slice %16 {offsets = [2, 2, 0], sizes = [1, 1, 128], strides = [1, 1, 1]} : vector<3x3x128xf32> to vector<1x1x128xf32>
    %85 = vector.shape_cast %84 : vector<1x1x128xf32> to vector<128xf32>
    %86 = vector.shape_cast %85 : vector<128xf32> to vector<1x1x128xf32>
    %87 = vector.broadcast %86 : vector<1x1x128xf32> to vector<10x16x128xf32>
    %88 = arith.mulf %83, %87 : vector<10x16x128xf32>
    %89 = arith.addf %82, %88 : vector<10x16x128xf32>
    %90 = vector.shape_cast %17 : vector<1x128xf32> to vector<1x1x128xf32>
    %91 = vector.broadcast %90 : vector<1x1x128xf32> to vector<10x16x128xf32>
    %92 = arith.mulf %89, %91 : vector<10x16x128xf32>
    %93 = vector.shape_cast %18 : vector<1x128xf32> to vector<1x1x128xf32>
    %94 = vector.broadcast %93 : vector<1x1x128xf32> to vector<10x16x128xf32>
    %95 = arith.addf %92, %94 : vector<10x16x128xf32>
    %cst_25 = arith.constant 0.000000e+00 : f32
    %96 = vector.broadcast %cst_25 : f32 to vector<10x16x128xf32>
    %97 = arith.maximumf %95, %96 : vector<10x16x128xf32>
    %98 = vector.shape_cast %97 : vector<10x16x128xf32> to vector<160x128xf32>
    %99 = arith.truncf %98 : vector<160x128xf32> to vector<160x128xbf16>
    %c0_26 = arith.constant 0 : index
    %c0_27 = arith.constant 0 : index
    %100 = vector.load %arg8[%c0_26, %c0_27] : memref<128x128xbf16, #tpu.memory_space<vmem>>, vector<128x128xbf16>
    %cst_28 = arith.constant dense<0.000000e+00> : vector<160x128xf32>
    %101 = tpu.matmul %99, %100, %cst_28 {dimension_numbers = #tpu.dot_dimension_numbers<[1], [0], [0], [1], [0, 0, 1, 1], [], []>} : vector<160x128xbf16>, vector<128x128xbf16>, vector<160x128xf32> -> vector<160x128xf32>
    %102 = vector.broadcast %19 : vector<1x128xf32> to vector<160x128xf32>
    %103 = arith.mulf %101, %102 : vector<160x128xf32>
    %104 = vector.broadcast %20 : vector<1x128xf32> to vector<160x128xf32>
    %105 = arith.addf %103, %104 : vector<160x128xf32>
    %cst_29 = arith.constant 0.000000e+00 : f32
    %106 = vector.broadcast %cst_29 : f32 to vector<160x128xf32>
    %107 = arith.maximumf %105, %106 : vector<160x128xf32>
    %108 = vector.shape_cast %107 : vector<160x128xf32> to vector<10x16x128xf32>
    %109 = vector.extract_strided_slice %108 {offsets = [1, 0, 0], sizes = [8, 16, 128], strides = [1, 1, 1]} : vector<10x16x128xf32> to vector<8x16x128xf32>
    %110 = vector.extract_strided_slice %108 {offsets = [0, 0, 0], sizes = [8, 16, 128], strides = [1, 1, 1]} : vector<10x16x128xf32> to vector<8x16x128xf32>
    %111 = vector.extract_strided_slice %108 {offsets = [2, 0, 0], sizes = [8, 16, 128], strides = [1, 1, 1]} : vector<10x16x128xf32> to vector<8x16x128xf32>
    %112 = tpu.iota {dimensions = array<i32: 0>} : vector<8x1x1xi32>
    %c0_i32_30 = arith.constant 0 : i32
    %113 = arith.cmpi eq, %arg1, %c0_i32_30 : i32
    %c0_i32_31 = arith.constant 0 : i32
    %114 = vector.broadcast %c0_i32_31 : i32 to vector<8x1x1xi32>
    %115 = arith.cmpi eq, %112, %114 : vector<8x1x1xi32>
    %116 = vector.broadcast %113 : i1 to vector<8x1x1xi1>
    %117 = arith.andi %116, %115 : vector<8x1x1xi1>
    %118 = vector.shape_cast %117 : vector<8x1x1xi1> to vector<8x1x1xi1>
    %119 = vector.broadcast %118 : vector<8x1x1xi1> to vector<8x16x128xi1>
    %120 = arith.select %119, %109, %110 : vector<8x16x128xi1>, vector<8x16x128xf32>
    %c1_i32_32 = arith.constant 1 : i32
    %121 = arith.cmpi eq, %arg1, %c1_i32_32 : i32
    %c7_i32 = arith.constant 7 : i32
    %122 = vector.broadcast %c7_i32 : i32 to vector<8x1x1xi32>
    %123 = arith.cmpi eq, %112, %122 : vector<8x1x1xi32>
    %124 = vector.broadcast %121 : i1 to vector<8x1x1xi1>
    %125 = arith.andi %124, %123 : vector<8x1x1xi1>
    %126 = vector.shape_cast %125 : vector<8x1x1xi1> to vector<8x1x1xi1>
    %127 = vector.broadcast %126 : vector<8x1x1xi1> to vector<8x16x128xi1>
    %128 = arith.select %127, %109, %111 : vector<8x16x128xi1>, vector<8x16x128xf32>
    %cst_33 = arith.constant 2.500000e-01 : f32
    %129 = vector.broadcast %cst_33 : f32 to vector<8x16x128xf32>
    %130 = arith.mulf %129, %120 : vector<8x16x128xf32>
    %cst_34 = arith.constant 7.500000e-01 : f32
    %131 = vector.broadcast %cst_34 : f32 to vector<8x16x128xf32>
    %132 = arith.mulf %131, %109 : vector<8x16x128xf32>
    %133 = arith.addf %130, %132 : vector<8x16x128xf32>
    %cst_35 = arith.constant 7.500000e-01 : f32
    %134 = vector.broadcast %cst_35 : f32 to vector<8x16x128xf32>
    %135 = arith.mulf %134, %109 : vector<8x16x128xf32>
    %cst_36 = arith.constant 2.500000e-01 : f32
    %136 = vector.broadcast %cst_36 : f32 to vector<8x16x128xf32>
    %137 = arith.mulf %136, %128 : vector<8x16x128xf32>
    %138 = arith.addf %135, %137 : vector<8x16x128xf32>
    %139 = vector.extract_strided_slice %133 {offsets = [0, 0, 0], sizes = [8, 1, 128], strides = [1, 1, 1]} : vector<8x16x128xf32> to vector<8x1x128xf32>
    %140 = vector.extract_strided_slice %133 {offsets = [0, 0, 0], sizes = [8, 15, 128], strides = [1, 1, 1]} : vector<8x16x128xf32> to vector<8x15x128xf32>
    %141 = tpu.concatenate %139, %140 in 1 : vector<8x1x128xf32>, vector<8x15x128xf32> -> vector<8x16x128xf32>
    %142 = vector.extract_strided_slice %133 {offsets = [0, 1, 0], sizes = [8, 15, 128], strides = [1, 1, 1]} : vector<8x16x128xf32> to vector<8x15x128xf32>
    %143 = vector.extract_strided_slice %133 {offsets = [0, 15, 0], sizes = [8, 1, 128], strides = [1, 1, 1]} : vector<8x16x128xf32> to vector<8x1x128xf32>
    %144 = tpu.concatenate %142, %143 in 1 : vector<8x15x128xf32>, vector<8x1x128xf32> -> vector<8x16x128xf32>
    %cst_37 = arith.constant 2.500000e-01 : f32
    %145 = vector.broadcast %cst_37 : f32 to vector<8x16x128xf32>
    %146 = arith.mulf %145, %141 : vector<8x16x128xf32>
    %cst_38 = arith.constant 7.500000e-01 : f32
    %147 = vector.broadcast %cst_38 : f32 to vector<8x16x128xf32>
    %148 = arith.mulf %147, %133 : vector<8x16x128xf32>
    %149 = arith.addf %146, %148 : vector<8x16x128xf32>
    %cst_39 = arith.constant 7.500000e-01 : f32
    %150 = vector.broadcast %cst_39 : f32 to vector<8x16x128xf32>
    %151 = arith.mulf %150, %133 : vector<8x16x128xf32>
    %cst_40 = arith.constant 2.500000e-01 : f32
    %152 = vector.broadcast %cst_40 : f32 to vector<8x16x128xf32>
    %153 = arith.mulf %152, %144 : vector<8x16x128xf32>
    %154 = arith.addf %151, %153 : vector<8x16x128xf32>
    %155 = vector.extract_strided_slice %138 {offsets = [0, 0, 0], sizes = [8, 1, 128], strides = [1, 1, 1]} : vector<8x16x128xf32> to vector<8x1x128xf32>
    %156 = vector.extract_strided_slice %138 {offsets = [0, 0, 0], sizes = [8, 15, 128], strides = [1, 1, 1]} : vector<8x16x128xf32> to vector<8x15x128xf32>
    %157 = tpu.concatenate %155, %156 in 1 : vector<8x1x128xf32>, vector<8x15x128xf32> -> vector<8x16x128xf32>
    %158 = vector.extract_strided_slice %138 {offsets = [0, 1, 0], sizes = [8, 15, 128], strides = [1, 1, 1]} : vector<8x16x128xf32> to vector<8x15x128xf32>
    %159 = vector.extract_strided_slice %138 {offsets = [0, 15, 0], sizes = [8, 1, 128], strides = [1, 1, 1]} : vector<8x16x128xf32> to vector<8x1x128xf32>
    %160 = tpu.concatenate %158, %159 in 1 : vector<8x15x128xf32>, vector<8x1x128xf32> -> vector<8x16x128xf32>
    %cst_41 = arith.constant 2.500000e-01 : f32
    %161 = vector.broadcast %cst_41 : f32 to vector<8x16x128xf32>
    %162 = arith.mulf %161, %157 : vector<8x16x128xf32>
    %cst_42 = arith.constant 7.500000e-01 : f32
    %163 = vector.broadcast %cst_42 : f32 to vector<8x16x128xf32>
    %164 = arith.mulf %163, %138 : vector<8x16x128xf32>
    %165 = arith.addf %162, %164 : vector<8x16x128xf32>
    %cst_43 = arith.constant 7.500000e-01 : f32
    %166 = vector.broadcast %cst_43 : f32 to vector<8x16x128xf32>
    %167 = arith.mulf %166, %138 : vector<8x16x128xf32>
    %cst_44 = arith.constant 2.500000e-01 : f32
    %168 = vector.broadcast %cst_44 : f32 to vector<8x16x128xf32>
    %169 = arith.mulf %168, %160 : vector<8x16x128xf32>
    %170 = arith.addf %167, %169 : vector<8x16x128xf32>
    %171 = tpu.concatenate %149, %154 in 2 : vector<8x16x128xf32>, vector<8x16x128xf32> -> vector<8x16x256xf32>
    %172 = tpu.concatenate %165, %170 in 2 : vector<8x16x128xf32>, vector<8x16x128xf32> -> vector<8x16x256xf32>
    %173 = vector.shape_cast %171 : vector<8x16x256xf32> to vector<8x1x16x256xf32>
    %174 = vector.shape_cast %172 : vector<8x16x256xf32> to vector<8x1x16x256xf32>
    %175 = tpu.concatenate %173, %174 in 1 : vector<8x1x16x256xf32>, vector<8x1x16x256xf32> -> vector<8x2x16x256xf32>
    %176 = vector.shape_cast %175 : vector<8x2x16x256xf32> to vector<16x16x256xf32>
    %c0_45 = arith.constant 0 : index
    %c0_46 = arith.constant 0 : index
    %c0_47 = arith.constant 0 : index
    %c0_48 = arith.constant 0 : index
    %177 = vector.load %arg11[%c0_45, %c0_46, %c0_47, %c0_48] : memref<1x16x16x256xf32, #tpu.memory_space<vmem>>, vector<1x16x16x256xf32>
    %178 = vector.shape_cast %177 : vector<1x16x16x256xf32> to vector<16x16x256xf32>
    %179 = vector.shape_cast %176 : vector<16x16x256xf32> to vector<1x16x16x256xf32>
    tpu.vector_store %arg11[%c0_45, %c0_46, %c0_47, %c0_48], %179 {strides = array<i32>} : memref<1x16x16x256xf32, #tpu.memory_space<vmem>>, vector<1x16x16x256xf32>,
    return
  }
  func.func @transform_0(%arg0: i32, %arg1: i32) -> (i32, i32, i32, i32) {
    %c4_i32 = arith.constant 4 : i32
    %0 = arith.muli %arg1, %c4_i32 : i32
    %c1_i32 = arith.constant 1 : i32
    %1 = arith.subi %0, %c1_i32 : i32
    %c0_i32 = arith.constant 0 : i32
    %2 = arith.maxsi %1, %c0_i32 : i32
    %c0_i32_0 = arith.constant 0 : i32
    %c0_i32_1 = arith.constant 0 : i32
    %c0_i32_2 = arith.constant 0 : i32
    return %arg0, %2, %c0_i32_0, %c0_i32_1 : i32, i32, i32, i32
  }
  func.func @transform_1(%arg0: i32, %arg1: i32) -> (i32, i32, i32, i32) {
    %c0_i32 = arith.constant 0 : i32
    %c0_i32_0 = arith.constant 0 : i32
    %c0_i32_1 = arith.constant 0 : i32
    return %arg0, %arg1, %c0_i32, %c0_i32_0 : i32, i32, i32, i32
  }
  func.func @transform_2(%arg0: i32, %arg1: i32) -> (i32, i32, i32, i32) {
    %c1_i32 = arith.constant 1 : i32
    %0 = arith.addi %arg1, %c1_i32 : i32
    %c4_i32 = arith.constant 4 : i32
    %1 = arith.muli %0, %c4_i32 : i32
    %c7_i32 = arith.constant 7 : i32
    %2 = arith.minsi %1, %c7_i32 : i32
    %c0_i32 = arith.constant 0 : i32
    %c0_i32_0 = arith.constant 0 : i32
    %c0_i32_1 = arith.constant 0 : i32
    return %arg0, %2, %c0_i32, %c0_i32_0 : i32, i32, i32, i32
  }
  func.func @transform_3(%arg0: i32, %arg1: i32) -> (i32, i32, i32) {
    %c0_i32 = arith.constant 0 : i32
    %c0_i32_0 = arith.constant 0 : i32
    %c0_i32_1 = arith.constant 0 : i32
    %c0_i32_2 = arith.constant 0 : i32
    return %c0_i32, %c0_i32_0, %c0_i32_1 : i32, i32, i32
  }
  func.func @transform_4(%arg0: i32, %arg1: i32) -> (i32, i32) {
    %c0_i32 = arith.constant 0 : i32
    %c0_i32_0 = arith.constant 0 : i32
    %c0_i32_1 = arith.constant 0 : i32
    return %c0_i32, %c0_i32_0 : i32, i32
  }
  func.func @transform_5(%arg0: i32, %arg1: i32) -> (i32, i32) {
    %c0_i32 = arith.constant 0 : i32
    %c0_i32_0 = arith.constant 0 : i32
    %c0_i32_1 = arith.constant 0 : i32
    return %c0_i32, %c0_i32_0 : i32, i32
  }
  func.func @transform_6(%arg0: i32, %arg1: i32) -> (i32, i32) {
    %c0_i32 = arith.constant 0 : i32
    %c0_i32_0 = arith.constant 0 : i32
    %c0_i32_1 = arith.constant 0 : i32
    return %c0_i32, %c0_i32_0 : i32, i32
  }
  func.func @transform_7(%arg0: i32, %arg1: i32) -> (i32, i32) {
    %c0_i32 = arith.constant 0 : i32
    %c0_i32_0 = arith.constant 0 : i32
    %c0_i32_1 = arith.constant 0 : i32
    return %c0_i32, %c0_i32_0 : i32, i32
  }
  func.func @transform_8(%arg0: i32, %arg1: i32) -> (i32, i32) {
    %c0_i32 = arith.constant 0 : i32
    %c0_i32_0 = arith.constant 0 : i32
    %c0_i32_1 = arith.constant 0 : i32
    return %c0_i32, %c0_i32_0 : i32, i32
  }
  func.func @transform_9(%arg0: i32, %arg1: i32) -> (i32, i32, i32, i32) {
    %c0_i32 = arith.constant 0 : i32
    %c0_i32_0 = arith.constant 0 : i32
    %c0_i32_1 = arith.constant 0 : i32
    return %arg0, %arg1, %c0_i32, %c0_i32_0 : i32, i32, i32, i32
  }
}

</mosaic_0001>

<bundles_post_ra>
// kernel: mc_forward.2
= control target key start
LH: loop header
LB: loop body
LE: loop exit
PB: predicated region body
PF: predicated region fallthrough
CT: control target
= control target key end

     0   :  { %s1868_s30 = smov 0   ;;  %s1870_s10 = smov 0   ;;  %s2615_s0 = inlined_call_operand.vmem [shape: f32[2,16,16,128], index: 0, kind: input, shape index: {}, may-alias: {0,1,2}]   ;;  %s2616_s1 = inlined_call_operand.vmem [shape: f32[2,16,16,128], index: 1, kind: input, shape index: {}, may-alias: {0,1,2}]   ;;  %s2617_s2 = inlined_call_operand.vmem [shape: f32[2,16,16,128], index: 2, kind: input, shape index: {}, may-alias: {0,1,2}]   ;;  %s2618_s3 = inlined_call_operand.vmem [shape: f32[3,3,128], index: 3, kind: input, shape index: {}]   ;;  %s2619_s4 = inlined_call_operand.vmem [shape: f32[1,128], index: 4, kind: input, shape index: {}]   ;;  %s2620_s5 = inlined_call_operand.vmem [shape: f32[1,128], index: 5, kind: input, shape index: {}]   ;;  %s2621_s6 = inlined_call_operand.vmem [shape: bf16[128,128], index: 6, kind: input, shape index: {}]   ;;  %s2622_s7 = inlined_call_operand.vmem [shape: f32[1,128], index: 7, kind: input, shape index: {}]   ;;  %s2623_s8 = inlined_call_operand.vmem [shape: f32[1,128], index: 8, kind: input, shape index: {}]   ;;  %s2624_s9 = inlined_call_operand.vmem [shape: bf16[2,16,16,128], index: 9, kind: output, shape index: {}]  }
   0x1   :  { %s1872_s11 = smov 0   ;;  %s1874_s12 = smov 0  }
   0x2   :  { %s1876_s13 = smov 0  }
   0x3 LB: > { %s28_s14 = sadd.s32 1, %s1808_s11  ;;  %s31_s15 = sadd.s32 1, %s1812_s12  ;;  %s1816_s13 = sphi %s1876_s13, %s19_s13   ;;  %s1812_s12 = sphi %s1874_s12, %s2663_s12   ;;  %s1808_s11 = sphi %s1872_s11, %s2662_s11   ;;  %s1804_s10 = sphi %s1870_s10, %s2661_s10   ;;  %s1800_s30 = sphi %s1868_s30, %s2660_s30  }
   0x4   : > { %p29_p0 = scmp.ge.s32.totalorder %s28_s14, 2  ;;  %p1527_p1 = scmp.ge.s32.totalorder %s1816_s13, 1 }
   0x5   : > { %p373_p2 = scmp.lt.s32.totalorder %s1816_s13, 5 }
   0x6   : > { %s2665_s14 = smov (%p29_p0, %s28_s14), 0  ;;  %s2667_s15 = smov (!%p29_p0, %s31_s15), %s1812_s12 }
   0x7   : > { %p374_p3 = pnand %p1527_p1, %p373_p2  ;;  %p33_p4 = scmp.ge.s32.totalorder %s2667_s15, 2 }
   0x9   : > { %s2669_s15 = smov (%p33_p4, %s2667_s15), 0  ;;  %377 = sbr.rel (%p374_p3) target bundleno = 364 (0x16c), region = 56 }
  0x10   : > { %v1758_v0 = vld [vmem:[%s2621_s6] sm:$0xff]   ;;  %s1904_s18 = sshll.u32 %s1800_s30, 3  ;;  %v1759_v1 = vld [vmem:[%s2621_s6 + $0x8] sm:$0xff]   ;;  %p449_p5 = scmp.lt.s32.totalorder %s1804_s10, 1  ;;  %v1760_v2 = vld [vmem:[%s2621_s6 + $0x10] sm:$0xff]   ;;  %v683_v3 = vlaneseq  ;;  %vm561_vm0 = vcmask 1040384  }
  0x11   : > { %1702 = vmatprep.subr.bf16.mxu1 %v1758_v0  ;;  %1670 = vmatprep.subr.bf16.mxu0 %v1758_v0  ;;  %p465_p6 = scmp.lt.s32.totalorder %s1904_s18, 15  ;;  %v1761_v4 = vld [vmem:[%s2621_s6 + $0x18] sm:$0xff]   ;;  %vm622_vm1 = vcmask 1046528   ;;  %v1762_v5 = vld [vmem:[%s2621_s6 + $0x20] sm:$0xff]   ;;  %s1941_s21 = sadd.s32 4294967295, %s1904_s18  ;;  %v1763_v26 = vld [vmem:[%s2621_s6 + $0x28] sm:$0xff]  }
  0x12   : > { %1710 = vmatpush3.bf16.msra.mxu1 %v1758_v0  ;;  %1671 = vmatpush3.bf16.msra.mxu0 %v1758_v0  ;;  %s2671_s10 = smov (!%p449_p5, %s1804_s10), 1  ;;  %v684_v9 = vshrl.u32 %v683_v3, 7  ;;  %p518_p7 = scmp.eq.s32.totalorder %s1800_s30, 0  ;;  %v534_v31 = vld [vmem:[%s2618_s3] sm:$0x7]  ;;  %v1764_v53 = vld [vmem:[%s2621_s6 + $0x30] sm:$0xff]  }
  0x13   : > { %1703 = vmatprep.subr.bf16.mxu1 %v1759_v1  ;;  %1672 = vmatprep.subr.bf16.mxu0 %v1759_v1  ;;  %s466_s23 = scalar_select %p465_p6, %s1904_s18, 15  ;;  %v535_v40 = vld [vmem:[%s2618_s3 + $0x4] sm:$0x7] }
  0x14   : > { %s1914_s24 = sshll.u32 %s2671_s10, 5  ;;  %p447_p8 = scmp.gt.s32.totalorder %s1941_s21, 0  ;;  %v2008_v39 = vsub.s32 0, %v684_v9  ;;  %v2019_v43 = vsub.s32 1, %v684_v9  ;;  %v2021_v44 = vsub.s32 2, %v684_v9  ;;  %v1765_v9 = vld [vmem:[%s2621_s6 + $0x38] sm:$0xff]  }
  0x15   : > { %s1539_s25 = sshll.u32 %s466_s23, 1  ;;  %p1530_p9 = scmp.lt.s32.totalorder %s1941_s21, 15 }
  0x16   : > { %1711 = vmatpush3.bf16.msra.mxu1 %v1759_v1  ;;  %1673 = vmatpush3.bf16.msra.mxu0 %v1759_v1  ;;  %s1917_s26 = sadd.s32 %s1539_s25, %s1914_s24  ;;  %s1590_s10 = sadd.s32 8, %s1904_s18  ;;  %v2039_v49 = vrot.slane %v534_v31, %v2008_v39  ;;  %v2042_v50 = vrot.slane %v534_v31, %v2019_v43  ;;  %v2045_v51 = vrot.slane %v534_v31, %v2021_v44 }
  0x17   : > { %1704 = vmatprep.subr.bf16.mxu1 %v1760_v2  ;;  %1674 = vmatprep.subr.bf16.mxu0 %v1760_v2  ;;  %s1541_s29 = sshll.u32 %s1917_s26, 3  ;;  %v2052_v54 = vrot.slane %v535_v40, %v2008_v39  ;;  %v2055_v55 = vrot.slane %v535_v40, %v2019_v43  ;;  %v2058_v56 = vrot.slane %v535_v40, %v2021_v44  ;;  %p2072_p10 = scmp.lt.s32.totalorder %s1590_s10, 15 }
  0x18   : > { %s1926_s17 = scalar_lea.vmem %s2616_s1, %s1541_s29  ;;  %p526_p11 = scmp.eq.s32.totalorder %s1800_s30, 1 }
  0x19   : > { %v1932_v6 = vld [vmem:[%s1926_s17 + $0x30] sm:$0xff]  ;;  %v1935_v7 = vld [vmem:[%s1926_s17 + $0x38] sm:$0xff]  ;;  %v1938_v8 = vld [vmem:[%s1926_s17 + $0x40] sm:$0xff]  ;;  %s448_s28 = scalar_select %p447_p8, %s1941_s21, 0 }
  0x1a   : > { %2639 = vst [vmem:[#allocation2_spill] sm:$0xff] %v1932_v6  ;;  %2640 = vst [vmem:[#allocation3_spill] sm:$0xff] %v1935_v7  ;;  %1712 = vmatpush3.bf16.msra.mxu1 %v1760_v2  ;;  %1675 = vmatpush3.bf16.msra.mxu0 %v1760_v2  ;;  %v1945_v10 = vld [vmem:[%s1926_s17 + $0x48] sm:$0xff]  ;;  %v1948_v11 = vld [vmem:[%s1926_s17 + $0x50] sm:$0xff]  ;;  %v574_v13 = vrot.slane %v1932_v6, 7  ;;  %v575_v14 = vrot.slane %v1935_v7, 7  ;;  %v731_v0 = vmul.f32 %v2042_v50, %v1932_v6 }
  0x1b   : > { %2641 = vst [vmem:[#allocation4_spill] sm:$0xff] %v1938_v8  ;;  %2642 = vst [vmem:[#allocation5_spill] sm:$0xff] %v1945_v10  ;;  %v1951_v12 = vld [vmem:[%s1926_s17 + $0x58] sm:$0xff]  ;;  %v577_v15 = vrot.slane %v1938_v8, 7  ;;  %1705 = vmatprep.subr.bf16.mxu1 %v1761_v4  ;;  %1676 = vmatprep.subr.bf16.mxu0 %v1761_v4  ;;  %v1957_v16 = vld [vmem:[%s1926_s17 + $0x60] sm:$0xff]  ;;  %v578_v18 = vrot.slane %v1945_v10, 7  ;;  %v732_v1 = vmul.f32 %v2042_v50, %v1935_v7 }
  0x1c   : > { %v1960_v17 = vld [vmem:[%s1926_s17 + $0x68] sm:$0xff]  ;;  %v580_v19 = vrot.slane %v1948_v11, 7  ;;  %v581_v20 = vrot.slane %v1951_v12, 7  ;;  %v635_v21 = vrot.slane %v1932_v6, 1  ;;  %v1967_v22 = vsel %vm561_vm0, %v574_v13, %v575_v14  ;;  %s2673_s28 = smov (!%p1530_p9, %s448_s28), 15  ;;  %s2675_s10 = smov (!%p2072_p10, %s1590_s10), 15 }
  0x1d   : > { %v583_v23 = vrot.slane %v1957_v16, 7  ;;  %v584_v24 = vrot.slane %v1960_v17, 7  ;;  %v1972_v25 = vsel %vm561_vm0, 0.0, %v574_v13  ;;  %v1980_v27 = vsel %vm561_vm0, %v577_v15, %v578_v18  ;;  %s1535_s19 = sshll.u32 %s2673_s28, 1  ;;  %s2677_s10 = smov (!%p2072_p10, %s2675_s10), 15 }
  0x1e   : > { %2643 = vst [vmem:[#allocation6_spill] sm:$0xff] %v1980_v27  ;;  %v1983_v28 = vsel %vm561_vm0, %v580_v19, %v581_v20  ;;  %v1986_v29 = vsel %vm561_vm0, 0.0, %v577_v15  ;;  %v1989_v30 = vsel %vm561_vm0, 0.0, %v580_v19  ;;  %1713 = vmatpush3.bf16.msra.mxu1 %v1761_v4  ;;  %1677 = vmatpush3.bf16.msra.mxu0 %v1761_v4  ;;  %v636_v34 = vrot.slane %v1935_v7, 1  ;;  %s455_s22 = sadd.s32 %s1914_s24, %s1535_s19  ;;  %s2136_s18 = sshll.u32 %s2677_s10, 1 }
  0x1f   : > { %2644 = vst [vmem:[#allocation7_spill] sm:$0xff] %v1986_v29  ;;  %v1995_v32 = vsel %vm561_vm0, %v583_v23, %v584_v24  ;;  %v1998_v33 = vsel %vm561_vm0, 0.0, %v583_v23  ;;  %v638_v35 = vrot.slane %v1938_v8, 1  ;;  %1706 = vmatprep.subr.bf16.mxu1 %v1762_v5  ;;  %1678 = vmatprep.subr.bf16.mxu0 %v1762_v5  ;;  %v639_v36 = vrot.slane %v1945_v10, 1  ;;  %s1537_s23 = sshll.u32 %s455_s22, 3  ;;  %s483_s21 = sadd.s32 %s2136_s18, %s1914_s24 }
  0x20   : > { %v641_v37 = vrot.slane %v1948_v11, 1  ;;  %v642_v38 = vrot.slane %v1951_v12, 1  ;;  %v2014_v41 = vsel %vm622_vm1, %v635_v21, %v636_v34  ;;  %v2017_v42 = vsel %vm622_vm1, %v636_v34, 0.0  ;;  %s2087_s29 = scalar_lea.vmem %s2615_s0, %s1537_s23  ;;  %s1552_s10 = sshll.u32 %s1917_s26, 2 }
  0x21   : > { %2645 = vst [vmem:[#allocation8_spill] sm:$0xff] %v2014_v41  ;;  %2646 = vst [vmem:[#allocation9_spill] sm:$0xff] %v2017_v42  ;;  %v2026_v45 = vsel %vm622_vm1, %v638_v35, %v639_v36  ;;  %v2032_v47 = vsel %vm622_vm1, %v639_v36, 0.0  ;;  %v644_v52 = vrot.slane %v1957_v16, 1  ;;  %v645_v57 = vrot.slane %v1960_v17, 1  ;;  %s2566_s25 = scalar_lea.vmem %s2624_s9, %s1552_s10 }
  0x22   : > { %2647 = vst [vmem:[#allocation10_spill] sm:$0xff] %v2026_v45  ;;  %v2029_v46 = vsel %vm622_vm1, %v641_v37, %v642_v38  ;;  %2648 = vst [vmem:[#allocation11_spill] sm:$0xff] %v2032_v47  ;;  %v2035_v48 = vsel %vm622_vm1, %v642_v38, 0.0  ;;  %1714 = vmatpush3.bf16.msra.mxu1 %v1762_v5  ;;  %1679 = vmatpush3.bf16.msra.mxu0 %v1762_v5  ;;  %v695_v58 = vmul.f32 %v2039_v49, %v1972_v25  ;;  %s2102_s16 = scalar_select %p518_p7, 0, 255 }
  0x23   : > { %1707 = vmatprep.subr.bf16.mxu1 %v1763_v26  ;;  %1680 = vmatprep.subr.bf16.mxu0 %v1763_v26  ;;  %v696_v59 = vmul.f32 %v2039_v49, %v1967_v22  ;;  %v697_v60 = vmul.f32 %v2039_v49, %v1986_v29  ;;  %v698_v61 = vmul.f32 %v2039_v49, %v1980_v27  ;;  %v2098_v5 = vsel %vm622_vm1, %v645_v57, 0.0  ;;  %s1773_s19 = scalar_select %p526_p11, 0, 255 }
  0x24   : > { %v699_v62 = vmul.f32 %v2039_v49, %v1989_v30  ;;  %v700_v63 = vmul.f32 %v2039_v49, %v1983_v28  ;;  %v733_v2 = vmul.f32 %v2042_v50, %v1938_v8  ;;  %v734_v3 = vmul.f32 %v2042_v50, %v1945_v10  ;;  %v2113_v23 = vld [vmem:[%s2087_s29] sm:%s2102_s16] }
  0x25   : > { %v735_v4 = vmul.f32 %v2042_v50, %v1948_v11  ;;  %v736_v13 = vmul.f32 %v2042_v50, %v1951_v12  ;;  %v747_v14 = vadd.f32 %v731_v0, %v695_v58  ;;  %v748_v15 = vadd.f32 %v732_v1, %v696_v59 }
  0x26   : > { %1715 = vmatpush3.bf16.msra.mxu1 %v1763_v26  ;;  %1681 = vmatpush3.bf16.msra.mxu0 %v1763_v26  ;;  %v749_v18 = vadd.f32 %v733_v2, %v697_v60  ;;  %v750_v19 = vadd.f32 %v734_v3, %v698_v61  ;;  %v767_v21 = vmul.f32 %v2045_v51, %v2014_v41  ;;  %v562_v59 = vrot.slane %v2113_v23, 7 }
  0x27   : > { %1708 = vmatprep.subr.bf16.mxu1 %v1764_v53  ;;  %1682 = vmatprep.subr.bf16.mxu0 %v1764_v53  ;;  %v751_v20 = vadd.f32 %v735_v4, %v699_v62  ;;  %v752_v24 = vadd.f32 %v736_v13, %v700_v63  ;;  %v768_v26 = vmul.f32 %v2045_v51, %v2017_v42 }
  0x28   : > { %v769_v31 = vmul.f32 %v2045_v51, %v2026_v45  ;;  %v770_v34 = vmul.f32 %v2045_v51, %v2032_v47  ;;  %v771_v35 = vmul.f32 %v2045_v51, %v2029_v46  ;;  %v772_v36 = vmul.f32 %v2045_v51, %v2035_v48 }
  0x29   : > { %v783_v37 = vadd.f32 %v767_v21, %v747_v14  ;;  %v784_v38 = vadd.f32 %v768_v26, %v748_v15  ;;  %v804_v62 = vmul.f32 %v2052_v54, %v1980_v27  ;;  %v805_v63 = vmul.f32 %v2052_v54, %v1989_v30  ;;  %v536_v15 = vld [vmem:[%s2618_s3 + $0x8] sm:$0x7] }
  0x2a   : > { %1716 = vmatpush3.bf16.msra.mxu1 %v1764_v53  ;;  %1683 = vmatpush3.bf16.msra.mxu0 %v1764_v53  ;;  %v785_v40 = vadd.f32 %v769_v31, %v749_v18  ;;  %v786_v58 = vadd.f32 %v770_v34, %v750_v19  ;;  %v787_v60 = vadd.f32 %v771_v35, %v751_v20 }
  0x2b   : > { %1709 = vmatprep.subr.bf16.mxu1 %v1765_v9  ;;  %1684 = vmatprep.subr.bf16.mxu0 %v1765_v9  ;;  %v788_v61 = vadd.f32 %v772_v36, %v752_v24  ;;  %v803_v53 = vmul.f32 %v2052_v54, %v1986_v29  ;;  %v806_v0 = vmul.f32 %v2052_v54, %v1983_v28 }
  0x2c   : > { %v807_v1 = vmul.f32 %v2052_v54, %v1998_v33  ;;  %v808_v2 = vmul.f32 %v2052_v54, %v1995_v32  ;;  %v820_v4 = vadd.f32 %v804_v62, %v784_v38  ;;  %v839_v13 = vmul.f32 %v2055_v55, %v1938_v8 }
  0x2d   : > { %v819_v3 = vadd.f32 %v803_v53, %v783_v37  ;;  %v840_v14 = vmul.f32 %v2055_v55, %v1945_v10  ;;  %v821_v18 = vadd.f32 %v805_v63, %v785_v40  ;;  %v822_v19 = vadd.f32 %v806_v0, %v786_v58 }
  0x2e   : > { %1717 = vmatpush3.bf16.msra.mxu1 %v1765_v9  ;;  %v2155_v20 = vadd.f32 %v807_v1, %v787_v60  ;;  %v2157_v21 = vadd.f32 %v808_v2, %v788_v61  ;;  %1685 = vmatpush3.bf16.msra.mxu0 %v1765_v9  ;;  %v841_v24 = vmul.f32 %v2055_v55, %v1948_v11 }
  0x2f   : > { %v842_v26 = vmul.f32 %v2055_v55, %v1951_v12  ;;  %v855_v31 = vadd.f32 %v839_v13, %v819_v3  ;;  %v856_v34 = vadd.f32 %v840_v14, %v820_v4  ;;  %v875_v35 = vmul.f32 %v2058_v56, %v2026_v45 }
  0x30   : > { %v876_v36 = vmul.f32 %v2058_v56, %v2032_v47  ;;  %v877_v37 = vmul.f32 %v2058_v56, %v2029_v46  ;;  %v878_v9 = vmul.f32 %v2058_v56, %v2035_v48  ;;  %v857_v38 = vadd.f32 %v841_v24, %v821_v18 }
  0x31   : > { %v858_v40 = vadd.f32 %v842_v26, %v822_v19  ;;  %v2172_v58 = vrot.slane %v536_v15, %v2008_v39  ;;  %v2175_v60 = vrot.slane %v536_v15, %v2019_v43  ;;  %v891_v61 = vadd.f32 %v875_v35, %v855_v31  ;;  %v2218_v19 = vld [vmem:[%s2619_s4] ss:$0 sm:$0xff] }
  0x32   : > { %v892_v53 = vadd.f32 %v876_v36, %v856_v34  ;;  %v2178_v62 = vrot.slane %v536_v15, %v2021_v44  ;;  %v646_v63 = vsel %vm622_vm1, %v644_v52, %v645_v57  ;;  %v893_v0 = vadd.f32 %v877_v37, %v857_v38  ;;  %v2229_v38 = vld [vmem:[%s1926_s17] sm:$0xff] }
  0x33   : > { %v894_v1 = vadd.f32 %v878_v9, %v858_v40  ;;  %v911_v39 = vmul.f32 %v2172_v58, %v1989_v30  ;;  %v912_v43 = vmul.f32 %v2172_v58, %v1983_v28  ;;  %v947_v2 = vmul.f32 %v2175_v60, %v1948_v11  ;;  %v2233_v40 = vld [vmem:[%s2087_s29 + $0x8] sm:%s2102_s16]  ;;  %s1548_s29 = sshll.u32 %s483_s21, 3 }
  0x34   : > { %v948_v44 = vmul.f32 %v2175_v60, %v1951_v12  ;;  %v983_v3 = vmul.f32 %v2178_v62, %v2029_v46  ;;  %v984_v52 = vmul.f32 %v2178_v62, %v2035_v48  ;;  %v701_v30 = vmul.f32 %v2039_v49, %v1998_v33  ;;  %s485_s16 = scalar_lea.vmem %s2617_s2, %s1548_s29 }
  0x35   : > { %v927_v57 = vadd.f32 %v911_v39, %v891_v61  ;;  %v928_v4 = vadd.f32 %v912_v43, %v892_v53  ;;  %v702_v28 = vmul.f32 %v2039_v49, %v1995_v32  ;;  %v737_v11 = vmul.f32 %v2042_v50, %v1957_v16  ;;  %v2245_v43 = vld [vmem:[%s1926_s17 + $0x8] sm:$0xff] }
  0x36   : > { %v738_v12 = vmul.f32 %v2042_v50, %v1960_v17  ;;  %v773_v46 = vmul.f32 %v2045_v51, %v646_v63  ;;  %v774_v48 = vmul.f32 %v2045_v51, %v2098_v5  ;;  %v2209_v15 = vmul.f32 %v2058_v56, %v646_v63 }
  0x37   : > { %v963_v13 = vadd.f32 %v947_v2, %v927_v57  ;;  %v964_v14 = vadd.f32 %v948_v44, %v928_v4  ;;  %v2213_v18 = vmul.f32 %v2058_v56, %v2098_v5  ;;  %v753_v24 = vadd.f32 %v737_v11, %v701_v30  ;;  %v2248_v2 = vld [vmem:[%s1926_s17 + $0x10] sm:$0xff]  ;;  %v2256_v4 = vld [vmem:[%s1926_s17 + $0x18] sm:$0xff] }
  0x38   : > { %v754_v26 = vadd.f32 %v738_v12, %v702_v28  ;;  %v913_v31 = vmul.f32 %v2172_v58, %v1998_v33  ;;  %v914_v34 = vmul.f32 %v2172_v58, %v1995_v32  ;;  %v949_v37 = vmul.f32 %v2175_v60, %v1957_v16  ;;  %v2238_v33 = vld [vmem:[%s2620_s5] ss:$0 sm:$0xff] }
  0x39   : > { %v999_v35 = vadd.f32 %v983_v3, %v963_v13  ;;  %v1000_v36 = vadd.f32 %v984_v52, %v964_v14  ;;  %v950_v9 = vmul.f32 %v2175_v60, %v1960_v17  ;;  %v2240_v32 = vadd.f32 %v773_v46, %v753_v24 }
  0x3a   : > { %v2242_v61 = vadd.f32 %v774_v48, %v754_v26  ;;  %v929_v53 = vadd.f32 %v913_v31, %v893_v0  ;;  %v930_v39 = vadd.f32 %v914_v34, %v894_v1  ;;  %v985_v52 = vmul.f32 %v2178_v62, %v646_v63  ;;  %v2259_v0 = vld [vmem:[%s1926_s17 + $0x20] sm:$0xff]  ;;  %v2266_v48 = vld [vmem:[%s1926_s17 + $0x28] sm:$0xff] }
  0x3b   : > { %v1021_v44 = vmul.f32 %v2218_v19, %v999_v35  ;;  %v1022_v3 = vmul.f32 %v2218_v19, %v1000_v36  ;;  %v986_v57 = vmul.f32 %v2178_v62, %v2098_v5  ;;  %v563_v1 = vrot.slane %v2233_v40, 7 }
  0x3c   : > { %v965_v30 = vadd.f32 %v949_v37, %v929_v53  ;;  %v966_v28 = vadd.f32 %v950_v9, %v930_v39  ;;  %v565_v11 = vrot.slane %v2229_v38, 7  ;;  %v566_v63 = vrot.slane %v2245_v43, 7 }
  0x3d   : > { %v1043_v12 = vadd.f32 %v2238_v33, %v1021_v44  ;;  %v1044_v46 = vadd.f32 %v2238_v33, %v1022_v3  ;;  %v568_v5 = vrot.slane %v2248_v2, 7  ;;  %v564_v24 = vsel %vm561_vm0, %v562_v59, %v563_v1 }
  0x3e   : > { %v1001_v13 = vadd.f32 %v985_v52, %v965_v30  ;;  %v1002_v14 = vadd.f32 %v986_v57, %v966_v28  ;;  %v569_v26 = vrot.slane %v2256_v4, 7  ;;  %v567_v35 = vsel %vm561_vm0, %v565_v11, %v566_v63 }
  0x3f   : > { %v1059_v31 = vmax.f32 %v1043_v12, 0.0  ;;  %v1060_v34 = vmax.f32 %v1044_v46, 0.0  ;;  %v571_v36 = vrot.slane %v2259_v0, 7  ;;  %v572_v39 = vrot.slane %v2266_v48, 7 }
  0x40   : > { %v1023_v37 = vmul.f32 %v2218_v19, %v1001_v13  ;;  %v1024_v9 = vmul.f32 %v2218_v19, %v1002_v14  ;;  %v2279_v53 = vsel %vm561_vm0, %v568_v5, %v569_v26  ;;  %v612_v3 = vsel %vm561_vm0, 0.0, %v562_v59 }
  0x41   : > { %v1071_v44 = vpack.c.bf16 %v1060_v34, %v1059_v31  ;;  %v613_v52 = vsel %vm561_vm0, 0.0, %v565_v11  ;;  %v2287_v57 = vsel %vm561_vm0, 0.0, %v568_v5  ;;  %v2292_v1 = vsel %vm561_vm0, %v571_v36, %v572_v39 }
  0x42   : > { %v1045_v30 = vadd.f32 %v2238_v33, %v1023_v37  ;;  %v1046_v28 = vadd.f32 %v2238_v33, %v1024_v9  ;;  %v2295_v12 = vsel %vm561_vm0, 0.0, %v571_v36  ;;  %v623_v46 = vrot.slane %v2113_v23, 1 }
  0x43   : > { %1694 = vmatprep.mubr.bf16.mxu1 %v1071_v44  ;;  %v624_v59 = vrot.slane %v2233_v40, 1  ;;  %v626_v11 = vrot.slane %v2229_v38, 1  ;;  %v627_v63 = vrot.slane %v2245_v43, 1  ;;  %v629_v14 = vrot.slane %v2248_v2, 1 }
  0x44   : > { %v1061_v5 = vmax.f32 %v1045_v30, 0.0  ;;  %v1062_v13 = vmax.f32 %v1046_v28, 0.0  ;;  %v630_v26 = vrot.slane %v2256_v4, 1  ;;  %v687_v30 = vmul.f32 %v2039_v49, %v612_v3 }
  0x45   : > { %v625_v31 = vsel %vm622_vm1, %v623_v46, %v624_v59  ;;  %v628_v34 = vsel %vm622_vm1, %v626_v11, %v627_v63  ;;  %v673_v36 = vsel %vm622_vm1, %v624_v59, 0.0  ;;  %v674_v37 = vsel %vm622_vm1, %v627_v63, 0.0 }
  0x46   : > { %v1072_v9 = vpack.c.bf16 %v1062_v13, %v1061_v5  ;;  %v2308_v39 = vsel %vm622_vm1, %v629_v14, %v630_v26  ;;  %v2311_v44 = vsel %vm622_vm1, %v630_v26, 0.0  ;;  %v688_v28 = vmul.f32 %v2039_v49, %v564_v24 }
  0x47   : > { %v689_v47 = vmul.f32 %v2039_v49, %v613_v52  ;;  %v690_v46 = vmul.f32 %v2039_v49, %v567_v35  ;;  %v691_v59 = vmul.f32 %v2039_v49, %v2287_v57  ;;  %v692_v11 = vmul.f32 %v2039_v49, %v2279_v53 }
  0x48   : > { %1695 = vmatmul.mubr.bf16.vlgmr.msra.gmra.mrb[0].mxu1 %v1072_v9  ;;  %v723_v63 = vmul.f32 %v2113_v23, %v2042_v50  ;;  %v724_v5 = vmul.f32 %v2233_v40, %v2042_v50  ;;  %v725_v24 = vmul.f32 %v2042_v50, %v2229_v38  ;;  %v726_v3 = vmul.f32 %v2042_v50, %v2245_v43 }
  0x49   : > { %v727_v13 = vmul.f32 %v2042_v50, %v2248_v2  ;;  %v728_v14 = vmul.f32 %v2042_v50, %v2256_v4  ;;  %v759_v26 = vmul.f32 %v2045_v51, %v625_v31  ;;  %v760_v10 = vmul.f32 %v2045_v51, %v673_v36 }
  0x4a   : > { %v739_v9 = vadd.f32 %v723_v63, %v687_v30  ;;  %v740_v45 = vadd.f32 %v724_v5, %v688_v28  ;;  %v741_v23 = vadd.f32 %v725_v24, %v689_v47  ;;  %v742_v40 = vadd.f32 %v726_v3, %v690_v46 }
  0x4b   : > { %v743_v8 = vadd.f32 %v727_v13, %v691_v59  ;;  %v744_v27 = vadd.f32 %v728_v14, %v692_v11  ;;  %v761_v29 = vmul.f32 %v2045_v51, %v628_v34  ;;  %v762_v42 = vmul.f32 %v2045_v51, %v674_v37 }
  0x4c   : > { %v763_v41 = vmul.f32 %v2045_v51, %v2308_v39  ;;  %v764_v7 = vmul.f32 %v2045_v51, %v2311_v44  ;;  %v775_v6 = vadd.f32 %v759_v26, %v739_v9  ;;  %v776_v31 = vadd.f32 %v760_v10, %v740_v45 }
  0x4d   : > { %v777_v30 = vadd.f32 %v761_v29, %v741_v23  ;;  %v795_v47 = vmul.f32 %v2052_v54, %v613_v52  ;;  %v796_v36 = vmul.f32 %v2052_v54, %v567_v35  ;;  %v778_v28 = vadd.f32 %v762_v42, %v742_v40 }
  0x4e   : > { %v779_v46 = vadd.f32 %v763_v41, %v743_v8  ;;  %v780_v59 = vadd.f32 %v764_v7, %v744_v27  ;;  %v797_v11 = vmul.f32 %v2052_v54, %v2287_v57  ;;  %v798_v63 = vmul.f32 %v2052_v54, %v2279_v53 }
  0x4f   : > { %v799_v5 = vmul.f32 %v2052_v54, %v2295_v12  ;;  %v800_v10 = vmul.f32 %v2052_v54, %v2292_v1  ;;  %v811_v29 = vadd.f32 %v795_v47, %v775_v6  ;;  %v812_v45 = vadd.f32 %v796_v36, %v776_v31 }
  0x50   : > { %v813_v52 = vadd.f32 %v797_v11, %v777_v30  ;;  %v831_v42 = vmul.f32 %v2055_v55, %v2229_v38  ;;  %v832_v7 = vmul.f32 %v2055_v55, %v2245_v43  ;;  %v814_v8 = vadd.f32 %v798_v63, %v778_v28 }
  0x51   : > { %v2355_v27 = vadd.f32 %v799_v5, %v779_v46  ;;  %v2357_v41 = vadd.f32 %v800_v10, %v780_v59  ;;  %v833_v35 = vmul.f32 %v2055_v55, %v2248_v2  ;;  %v834_v24 = vmul.f32 %v2055_v55, %v2256_v4 }
  0x52   : > { %v847_v6 = vadd.f32 %v831_v42, %v811_v29  ;;  %v848_v3 = vadd.f32 %v832_v7, %v812_v45  ;;  %v867_v13 = vmul.f32 %v2058_v56, %v628_v34  ;;  %v868_v14 = vmul.f32 %v2058_v56, %v674_v37 }
  0x53   : > { %v849_v38 = vadd.f32 %v833_v35, %v813_v52  ;;  %v869_v43 = vmul.f32 %v2058_v56, %v2308_v39  ;;  %v870_v26 = vmul.f32 %v2058_v56, %v2311_v44  ;;  %v850_v9 = vadd.f32 %v834_v24, %v814_v8 }
  0x54   : > { %v883_v23 = vadd.f32 %v867_v13, %v847_v6  ;;  %v903_v40 = vmul.f32 %v2172_v58, %v2287_v57  ;;  %v904_v31 = vmul.f32 %v2172_v58, %v2279_v53  ;;  %v884_v30 = vadd.f32 %v868_v14, %v848_v3  ;;  %v2413_v14 = vld [vmem:[%s1926_s17 + $0x78] sm:$0xff] }
  0x55   : > { %v885_v47 = vadd.f32 %v869_v43, %v849_v38  ;;  %v939_v34 = vmul.f32 %v2175_v60, %v2248_v2  ;;  %v940_v37 = vmul.f32 %v2175_v60, %v2256_v4  ;;  %v886_v36 = vadd.f32 %v870_v26, %v850_v9  ;;  %v2410_v38 = vld [vmem:[%s1926_s17 + $0x70] sm:$0xff] }
  0x56   : > { %v919_v28 = vadd.f32 %v903_v40, %v883_v23  ;;  %v975_v46 = vmul.f32 %v2178_v62, %v2308_v39  ;;  %v976_v57 = vmul.f32 %v2178_v62, %v2311_v44  ;;  %v920_v59 = vadd.f32 %v904_v31, %v884_v30 }
  0x57   : > { %v632_v53 = vrot.slane %v2259_v0, 1  ;;  %v633_v11 = vrot.slane %v2266_v48, 1  ;;  %v693_v2 = vmul.f32 %v2039_v49, %v2295_v12  ;;  %v694_v4 = vmul.f32 %v2039_v49, %v2292_v1 }
  0x58   : > { %v955_v63 = vadd.f32 %v939_v34, %v919_v28  ;;  %v729_v5 = vmul.f32 %v2042_v50, %v2259_v0  ;;  %v730_v39 = vmul.f32 %v2042_v50, %v2266_v48  ;;  %v956_v10 = vadd.f32 %v940_v37, %v920_v59 }
  0x59   : > { %v634_v44 = vsel %vm622_vm1, %v632_v53, %v633_v11  ;;  %v676_v29 = vsel %vm622_vm1, %v633_v11, 0.0  ;;  %v905_v45 = vmul.f32 %v2172_v58, %v2295_v12  ;;  %v906_v12 = vmul.f32 %v2172_v58, %v2292_v1 }
  0x5a   : > { %v991_v52 = vadd.f32 %v975_v46, %v955_v63  ;;  %v745_v42 = vadd.f32 %v729_v5, %v693_v2  ;;  %v746_v7 = vadd.f32 %v730_v39, %v694_v4  ;;  %v765_v49 = vmul.f32 %v2045_v51, %v634_v44 }
  0x5b   : > { %v992_v8 = vadd.f32 %v976_v57, %v956_v10  ;;  %v766_v50 = vmul.f32 %v2045_v51, %v676_v29  ;;  %v2399_v35 = vmul.f32 %v2058_v56, %v634_v44  ;;  %v2402_v24 = vmul.f32 %v2058_v56, %v676_v29 }
  0x5c   : > { %v1013_v6 = vmul.f32 %v2218_v19, %v991_v52  ;;  %v2405_v3 = vadd.f32 %v765_v49, %v745_v42  ;;  %v921_v13 = vadd.f32 %v905_v45, %v885_v47  ;;  %v941_v26 = vmul.f32 %v2175_v60, %v2259_v0 }
  0x5d   : > { %v1014_v51 = vmul.f32 %v2218_v19, %v992_v8  ;;  %v2416_v43 = vadd.f32 %v766_v50, %v746_v7  ;;  %v942_v9 = vmul.f32 %v2175_v60, %v2266_v48  ;;  %v922_v1 = vadd.f32 %v906_v12, %v886_v36 }
  0x5e   : > { %v1035_v23 = vadd.f32 %v2238_v33, %v1013_v6  ;;  %v977_v40 = vmul.f32 %v2178_v62, %v634_v44  ;;  %v978_v31 = vmul.f32 %v2178_v62, %v676_v29  ;;  %v957_v47 = vadd.f32 %v941_v26, %v921_v13  ;;  %v1774_v13 = vld [vmem:[%s485_s16] sm:%s1773_s19] }
  0x5f   : > { %v1036_v30 = vadd.f32 %v2238_v33, %v1014_v51  ;;  %v586_v34 = vrot.slane %v2410_v38, 7  ;;  %v587_v37 = vrot.slane %v2413_v14, 7  ;;  %v958_v46 = vadd.f32 %v942_v9, %v922_v1  ;;  %v1777_v9 = vld [vmem:[%s485_s16 + $0x8] sm:%s1773_s19] }
  0x60   : > { %v1051_v28 = vmax.f32 %v1035_v23, 0.0  ;;  %v647_v57 = vrot.slane %v2410_v38, 1  ;;  %v648_v59 = vrot.slane %v2413_v14, 1  ;;  %v993_v53 = vadd.f32 %v977_v40, %v957_v47 }
  0x61   : > { %v1052_v36 = vmax.f32 %v1036_v30, 0.0  ;;  %v588_v11 = vsel %vm561_vm0, %v586_v34, %v587_v37  ;;  %v620_v2 = vsel %vm561_vm0, 0.0, %v586_v34  ;;  %v994_v63 = vadd.f32 %v978_v31, %v958_v46 }
  0x62   : > { %v649_v4 = vsel %vm622_vm1, %v647_v57, %v648_v59  ;;  %v681_v5 = vsel %vm622_vm1, %v648_v59, 0.0  ;;  %v809_v39 = vmul.f32 %v2052_v54, %v620_v2  ;;  %v1015_v44 = vmul.f32 %v2218_v19, %v993_v53 }
  0x63   : > { %v1067_v10 = vpack.c.bf16 %v1052_v36, %v1051_v28  ;;  %v810_v29 = vmul.f32 %v2052_v54, %v588_v11  ;;  %v843_v45 = vmul.f32 %v2055_v55, %v1957_v16  ;;  %v1016_v52 = vmul.f32 %v2218_v19, %v994_v63 }
  0x64   : > { %v844_v42 = vmul.f32 %v2055_v55, %v1960_v17  ;;  %v881_v7 = vmul.f32 %v2058_v56, %v649_v4  ;;  %v882_v49 = vmul.f32 %v2058_v56, %v681_v5  ;;  %v1037_v8 = vadd.f32 %v2238_v33, %v1015_v44 }
  0x65   : > { %1686 = vmatprep.mubr.bf16.mxu0 %v1067_v10  ;;  %v859_v50 = vadd.f32 %v843_v45, %v2155_v20  ;;  %v915_v6 = vmul.f32 %v2172_v58, %v620_v2  ;;  %v916_v12 = vmul.f32 %v2172_v58, %v588_v11  ;;  %v1038_v16 = vadd.f32 %v2238_v33, %v1016_v52 }
  0x66   : > { %v860_v51 = vadd.f32 %v844_v42, %v2157_v21  ;;  %v951_v17 = vmul.f32 %v2175_v60, %v2410_v38  ;;  %v952_v26 = vmul.f32 %v2175_v60, %v2413_v14  ;;  %v1053_v23 = vmax.f32 %v1037_v8, 0.0 }
  0x67   : > { %v895_v1 = vadd.f32 %v2209_v15, %v859_v50  ;;  %v987_v20 = vmul.f32 %v2178_v62, %v649_v4  ;;  %v988_v40 = vmul.f32 %v2178_v62, %v681_v5  ;;  %v1054_v31 = vmax.f32 %v1038_v16, 0.0 }
  0x68   : > { %v896_v30 = vadd.f32 %v2213_v18, %v860_v51  ;;  %v589_v47 = vrot.slane %v1774_v13, 7  ;;  %v590_v21 = vrot.slane %v1777_v9, 7  ;;  %v650_v37 = vrot.slane %v1774_v13, 1 }
  0x69   : > { %v931_v34 = vadd.f32 %v915_v6, %v895_v1  ;;  %v1068_v28 = vpack.c.bf16 %v1054_v31, %v1053_v23  ;;  %v651_v59 = vrot.slane %v1777_v9, 1  ;;  %v825_v15 = vadd.f32 %v809_v39, %v2240_v32 }
  0x6a   : > { %v932_v46 = vadd.f32 %v916_v12, %v896_v30  ;;  %v621_v57 = vsel %vm561_vm0, 0.0, %v589_v47  ;;  %v591_v53 = vsel %vm561_vm0, %v589_v47, %v590_v21  ;;  %v826_v11 = vadd.f32 %v810_v29, %v2242_v61 }
  0x6b   : > { %v967_v36 = vadd.f32 %v951_v17, %v931_v34  ;;  %1687 = vmatmul.mubr.bf16.vlgmr.msra.gmra.mrb[0].mxu0 %v1068_v28  ;;  %v652_v18 = vsel %vm622_vm1, %v650_v37, %v651_v59  ;;  %v682_v63 = vsel %vm622_vm1, %v651_v59, 0.0  ;;  %v845_v4 = vmul.f32 %v2055_v55, %v2410_v38  ;;  %v2652_v37 = vld [vmem:[#allocation8_spill] sm:$0xff]  ;;  %v2653_v28 = vld [vmem:[#allocation9_spill] sm:$0xff] }
  0x6c   : > { %v968_v2 = vadd.f32 %v952_v26, %v932_v46  ;;  %v846_v10 = vmul.f32 %v2055_v55, %v2413_v14  ;;  %v917_v44 = vmul.f32 %v2172_v58, %v621_v57  ;;  %v918_v45 = vmul.f32 %v2172_v58, %v591_v53 }
  0x6d   : > { %v1003_v5 = vadd.f32 %v987_v20, %v967_v36  ;;  %v861_v39 = vadd.f32 %v845_v4, %v825_v15  ;;  %v953_v61 = vmul.f32 %v1774_v13, %v2175_v60  ;;  %v954_v29 = vmul.f32 %v1777_v9, %v2175_v60  ;;  %v2650_v20 = vld [vmem:[#allocation2_spill] sm:$0xff] }
  0x6e   : > { %v1004_v32 = vadd.f32 %v988_v40, %v968_v2  ;;  %v862_v42 = vadd.f32 %v846_v10, %v826_v11  ;;  %v989_v8 = vmul.f32 %v2178_v62, %v652_v18  ;;  %v990_v38 = vmul.f32 %v2178_v62, %v682_v63  ;;  %v2651_v40 = vld [vmem:[#allocation3_spill] sm:$0xff] }
  0x6f   : > { %v1025_v52 = vmul.f32 %v2218_v19, %v1003_v5  ;;  %v897_v14 = vadd.f32 %v881_v7, %v861_v39  ;;  %v835_v6 = vmul.f32 %v2055_v55, %v2259_v0  ;;  %v836_v12 = vmul.f32 %v2055_v55, %v2266_v48 }
  0x70   : > { %v1026_v50 = vmul.f32 %v2218_v19, %v1004_v32  ;;  %v898_v16 = vadd.f32 %v882_v49, %v862_v42  ;;  %v907_v51 = vmul.f32 %v2172_v58, %v1972_v25  ;;  %v908_v17 = vmul.f32 %v2172_v58, %v1967_v22 }
  0x71   : > { %v1047_v13 = vadd.f32 %v2238_v33, %v1025_v52  ;;  %v933_v9 = vadd.f32 %v917_v44, %v897_v14  ;;  %v851_v7 = vadd.f32 %v835_v6, %v2355_v27  ;;  %v852_v23 = vadd.f32 %v836_v12, %v2357_v41  ;;  %v2656_v12 = vld [vmem:[#allocation4_spill] sm:$0xff] }
  0x72   : > { %v1048_v26 = vadd.f32 %v2238_v33, %v1026_v50  ;;  %v934_v1 = vadd.f32 %v918_v45, %v898_v16  ;;  %v943_v48 = vmul.f32 %v2175_v60, %v2650_v20  ;;  %v944_v49 = vmul.f32 %v2175_v60, %v2651_v40 }
  0x73   : > { %v1063_v0 = vmax.f32 %v1047_v13, 0.0  ;;  %v969_v30 = vadd.f32 %v953_v61, %v933_v9  ;;  %v887_v47 = vadd.f32 %v2399_v35, %v851_v7  ;;  %v888_v34 = vadd.f32 %v2402_v24, %v852_v23 }
  0x74   : > { %v1064_v31 = vmax.f32 %v1048_v26, 0.0  ;;  %v970_v21 = vadd.f32 %v954_v29, %v934_v1  ;;  %v979_v27 = vmul.f32 %v2178_v62, %v2652_v37  ;;  %v980_v41 = vmul.f32 %v2178_v62, %v2653_v28  ;;  %v2658_v26 = vld [vmem:[#allocation10_spill] sm:$0xff] }
  0x75   : > { %v801_v46 = vmul.f32 %v2052_v54, %v1972_v25  ;;  %v1005_v59 = vadd.f32 %v989_v8, %v969_v30  ;;  %v923_v36 = vadd.f32 %v907_v51, %v887_v47  ;;  %v924_v53 = vadd.f32 %v908_v17, %v888_v34  ;;  %v2655_v8 = vld [vmem:[#allocation6_spill] sm:$0xff]  ;;  %v2657_v51 = vld [vmem:[#allocation5_spill] sm:$0xff] }
  0x76   : > { %v1073_v57 = vpack.c.bf16 %v1064_v31, %v1063_v0  ;;  %v1006_v15 = vadd.f32 %v990_v38, %v970_v21  ;;  %v802_v35 = vmul.f32 %v2052_v54, %v1967_v22  ;;  %v837_v11 = vmul.f32 %v2055_v55, %v2650_v20 }
  0x77   : > { %v817_v24 = vadd.f32 %v801_v46, %v2405_v3  ;;  %v1027_v2 = vmul.f32 %v2218_v19, %v1005_v59  ;;  %v959_v18 = vadd.f32 %v943_v48, %v923_v36  ;;  %v960_v63 = vadd.f32 %v944_v49, %v924_v53 }
  0x78   : > { %1698 = vmatprep.mubr.bf16.mxu1 %v1073_v57  ;;  %v838_v25 = vmul.f32 %v2055_v55, %v2651_v40  ;;  %v1028_v4 = vmul.f32 %v2218_v19, %v1006_v15  ;;  %v818_v5 = vadd.f32 %v802_v35, %v2416_v43  ;;  %v873_v22 = vmul.f32 %v2058_v56, %v2652_v37  ;;  %v2654_v55 = vld [vmem:[#allocation7_spill] sm:$0xff] }
  0x79   : > { %v853_v10 = vadd.f32 %v837_v11, %v817_v24  ;;  %v1049_v54 = vadd.f32 %v2238_v33, %v1027_v2  ;;  %v995_v3 = vadd.f32 %v979_v27, %v959_v18  ;;  %v996_v44 = vadd.f32 %v980_v41, %v960_v63  ;;  %v2552_v41 = vld [vmem:[%s2623_s8] ss:$0 sm:$0xff] }
  0x7a   : > { %v874_v45 = vmul.f32 %v2058_v56, %v2653_v28  ;;  %v1050_v32 = vadd.f32 %v2238_v33, %v1028_v4  ;;  %v854_v39 = vadd.f32 %v838_v25, %v818_v5  ;;  %v909_v29 = vmul.f32 %v2172_v58, %v2654_v55  ;;  %v2547_v28 = vld [vmem:[%s2622_s7] ss:$0 sm:$0xff] }
  0x7b   : > { %v889_v61 = vadd.f32 %v873_v22, %v853_v10  ;;  %v1065_v52 = vmax.f32 %v1049_v54, 0.0  ;;  %v1017_v43 = vmul.f32 %v2218_v19, %v995_v3  ;;  %v1018_v42 = vmul.f32 %v2218_v19, %v996_v44 }
  0x7c   : > { %v910_v38 = vmul.f32 %v2172_v58, %v2655_v8  ;;  %v1066_v50 = vmax.f32 %v1050_v32, 0.0  ;;  %v890_v14 = vadd.f32 %v874_v45, %v854_v39  ;;  %v945_v56 = vmul.f32 %v2175_v60, %v2656_v12  ;;  %v2659_v58 = vld [vmem:[#allocation11_spill] sm:$0xff] }
  0x7d   : > { %v925_v6 = vadd.f32 %v909_v29, %v889_v61  ;;  %v1039_v13 = vadd.f32 %v2238_v33, %v1017_v43  ;;  %v1040_v16 = vadd.f32 %v2238_v33, %v1018_v42  ;;  %v946_v17 = vmul.f32 %v2175_v60, %v2657_v51 }
  0x7e   : > { %v981_v9 = vmul.f32 %v2178_v62, %v2658_v26  ;;  %v1074_v7 = vpack.c.bf16 %v1066_v50, %v1065_v52  ;;  %v926_v23 = vadd.f32 %v910_v38, %v890_v14  ;;  %v982_v1 = vmul.f32 %v2178_v62, %v2659_v58 }
  0x7f   : > { %v961_v0 = vadd.f32 %v945_v56, %v925_v6  ;;  %v1055_v20 = vmax.f32 %v1039_v13, 0.0  ;;  %v1056_v48 = vmax.f32 %v1040_v16, 0.0 }
  0x80   : > { %1699 = vmatmul.mubr.bf16.gmra.mrb[4].mxu1 %v1074_v7  ;;  %v962_v40 = vadd.f32 %v946_v17, %v926_v23 }
  0x81   : > { %v997_v49 = vadd.f32 %v981_v9, %v961_v0  ;;  %v1069_v31 = vpack.c.bf16 %v1056_v48, %v1055_v20 }
  0x82   : > { %v998_v30 = vadd.f32 %v982_v1, %v962_v40 }
  0x83   : > { %v1019_v47 = vmul.f32 %v2218_v19, %v997_v49  ;;  %1690 = vmatprep.mubr.bf16.mxu0 %v1069_v31 }
  0x84   : > { %v1020_v60 = vmul.f32 %v2218_v19, %v998_v30 }
  0x85   : > { %v1041_v34 = vadd.f32 %v2238_v33, %v1019_v47 }
  0x86   : > { %v1042_v21 = vadd.f32 %v2238_v33, %v1020_v60 }
  0x87   : > { %v1057_v37 = vmax.f32 %v1041_v34, 0.0 }
  0x88   : > { %v1058_v27 = vmax.f32 %v1042_v21, 0.0 }
  0x8a   : > { %v1070_v62 = vpack.c.bf16 %v1058_v27, %v1057_v37 }
  0x8c   : > { %1691 = vmatmul.mubr.bf16.gmra.mrb[4].mxu0 %v1070_v62 }
 0x11b   : > { %v1696_v19 = vpop.f32.mrb[0].mxu1 }
 0x11c   : > { %v1252_v46 = vmul.f32 %v1696_v19, %v2547_v28  ;;  %v1205_v57 = vpop.f32.mrb[1].mxu1 }
 0x11d   : > { %v1250_v33 = vmul.f32 %v2547_v28, %v1205_v57  ;;  %v1697_v59 = vpop.f32.mrb[2].mxu1 }
 0x11e   : > { %v1274_v36 = vadd.f32 %v2552_v41, %v1252_v46  ;;  %v1253_v53 = vmul.f32 %v1697_v59, %v2547_v28  ;;  %v1208_v15 = vpop.f32.mrb[3].mxu1 }
 0x11f   : > { %v1272_v35 = vadd.f32 %v2552_v41, %v1250_v33  ;;  %v1251_v24 = vmul.f32 %v2547_v28, %v1208_v15 }
 0x120   : > { %v1290_v11 = vmax.f32 %v1274_v36, 0.0  ;;  %v1275_v2 = vadd.f32 %v2552_v41, %v1253_v53 }
 0x121   : > { %v1288_v18 = vmax.f32 %v1272_v35, 0.0  ;;  %v1273_v63 = vadd.f32 %v2552_v41, %v1251_v24 }
 0x122   : > { %v1291_v25 = vmax.f32 %v1275_v2, 0.0 }
 0x123   : > { %v1289_v4 = vmax.f32 %v1273_v63, 0.0 }
 0x124   : > { %v1635_v5 = vpack.c.bf16 %v1291_v25, %v1290_v11 }
 0x125   : > { %v1630_v10 = vpack.c.bf16 %v1289_v4, %v1288_v18 }
 0x126   : > { %1651 = vst [vmem:[%s2566_s25 + $0x28] sm:$0xff] %v1635_v5  }
 0x127   : > { %1650 = vst [vmem:[%s2566_s25 + $0x20] sm:$0xff] %v1630_v10  }
 0x13e   : > { %v1688_v22 = vpop.f32.mrb[0].mxu0 }
 0x13f   : > { %v1244_v54 = vmul.f32 %v1688_v22, %v2547_v28  ;;  %v1173_v3 = vpop.f32.mrb[1].mxu0 }
 0x140   : > { %v1242_v44 = vmul.f32 %v2547_v28, %v1173_v3  ;;  %v1689_v45 = vpop.f32.mrb[2].mxu0 }
 0x141   : > { %v1266_v32 = vadd.f32 %v2552_v41, %v1244_v54  ;;  %v1245_v39 = vmul.f32 %v1689_v45, %v2547_v28  ;;  %v1176_v61 = vpop.f32.mrb[3].mxu0 }
 0x142   : > { %v1264_v55 = vadd.f32 %v2552_v41, %v1242_v44  ;;  %v1243_v29 = vmul.f32 %v2547_v28, %v1176_v61 }
 0x143   : > { %v1267_v52 = vadd.f32 %v2552_v41, %v1245_v39  ;;  %v1282_v42 = vmax.f32 %v1266_v32, 0.0 }
 0x144   : > { %v1265_v43 = vadd.f32 %v2552_v41, %v1243_v29  ;;  %v1280_v38 = vmax.f32 %v1264_v55, 0.0 }
 0x145   : > { %v1283_v8 = vmax.f32 %v1267_v52, 0.0 }
 0x146   : > { %v1281_v50 = vmax.f32 %v1265_v43, 0.0 }
 0x147   : > { %v1615_v14 = vpack.c.bf16 %v1283_v8, %v1282_v42 }
 0x148   : > { %v1610_v6 = vpack.c.bf16 %v1281_v50, %v1280_v38 }
 0x149   : > { %1647 = vst [vmem:[%s2566_s25 + $0x8] sm:$0xff] %v1615_v14  }
 0x14a   : > { %1611 = vst [vmem:[%s2566_s25] sm:$0xff] %v1610_v6  }
 0x153   : > { %v1700_v12 = vpop.f32.mrb[4].mxu1 }
 0x154   : > { %v1256_v56 = vmul.f32 %v1700_v12, %v2547_v28  ;;  %v1221_v13 = vpop.f32.mrb[5].mxu1 }
 0x155   : > { %v1254_v16 = vmul.f32 %v2547_v28, %v1221_v13  ;;  %v1701_v51 = vpop.f32.mrb[6].mxu1 }
 0x156   : > { %v1278_v17 = vadd.f32 %v2552_v41, %v1256_v56  ;;  %v1257_v26 = vmul.f32 %v1701_v51, %v2547_v28  ;;  %v1224_v9 = vpop.f32.mrb[7].mxu1 }
 0x157   : > { %v1276_v7 = vadd.f32 %v2552_v41, %v1254_v16  ;;  %v1255_v23 = vmul.f32 %v2547_v28, %v1224_v9 }
 0x158   : > { %v1294_v0 = vmax.f32 %v1278_v17, 0.0  ;;  %v1279_v58 = vadd.f32 %v2552_v41, %v1257_v26 }
 0x159   : > { %v1292_v1 = vmax.f32 %v1276_v7, 0.0  ;;  %v1277_v20 = vadd.f32 %v2552_v41, %v1255_v23 }
 0x15a   : > { %v1295_v48 = vmax.f32 %v1279_v58, 0.0 }
 0x15b   : > { %v1293_v40 = vmax.f32 %v1277_v20, 0.0 }
 0x15c   : > { %v1645_v49 = vpack.c.bf16 %v1295_v48, %v1294_v0 }
 0x15d   : > { %v1640_v31 = vpack.c.bf16 %v1293_v40, %v1292_v1 }
 0x15e   : > { %1653 = vst [vmem:[%s2566_s25 + $0x38] sm:$0xff] %v1645_v49  }
 0x15f   : > { %v1692_v30 = vpop.f32.mrb[4].mxu0  ;;  %1652 = vst [vmem:[%s2566_s25 + $0x30] sm:$0xff] %v1640_v31  }
 0x160   : > { %v1248_v47 = vmul.f32 %v1692_v30, %v2547_v28  ;;  %v1189_v60 = vpop.f32.mrb[5].mxu0 }
 0x161   : > { %v1246_v34 = vmul.f32 %v2547_v28, %v1189_v60  ;;  %v1693_v21 = vpop.f32.mrb[6].mxu0 }
 0x162   : > { %v1270_v37 = vadd.f32 %v2552_v41, %v1248_v47  ;;  %v1249_v27 = vmul.f32 %v1693_v21, %v2547_v28  ;;  %v1192_v62 = vpop.f32.mrb[7].mxu0 }
 0x163   : > { %v1268_v19 = vadd.f32 %v2552_v41, %v1246_v34  ;;  %v1247_v46 = vmul.f32 %v2547_v28, %v1192_v62 }
 0x164   : > { %v1271_v57 = vadd.f32 %v2552_v41, %v1249_v27  ;;  %v1286_v59 = vmax.f32 %v1270_v37, 0.0 }
 0x165   : > { %v1269_v33 = vadd.f32 %v2552_v41, %v1247_v46  ;;  %v1284_v53 = vmax.f32 %v1268_v19, 0.0 }
 0x166   : > { %v1287_v36 = vmax.f32 %v1271_v57, 0.0 }
 0x167   : > { %v1285_v15 = vmax.f32 %v1269_v33, 0.0 }
 0x168   : > { %v1625_v35 = vpack.c.bf16 %v1287_v36, %v1286_v59 }
 0x169   : > { %v1620_v24 = vpack.c.bf16 %v1285_v15, %v1284_v53 }
 0x16a   : > { %1649 = vst [vmem:[%s2566_s25 + $0x18] sm:$0xff] %v1625_v35  }
 0x16b   : > { %1648 = vst [vmem:[%s2566_s25 + $0x10] sm:$0xff] %v1620_v24  }
 0x16c PF: > { %s19_s13 = sadd.s32 1, %s1816_s13   ;;  %s2660_s30 = smov %s1808_s11 }
 0x16d   : > { %p16_p12 = scmp.ge.s32.totalorder %s19_s13, 6   ;;  %s2661_s10 = smov %s1812_s12 }
 0x16e   : > { %s2662_s11 = smov %s2665_s14  ;;  %s2663_s12 = smov %s2669_s15 }
 0x16f   :  { %18 = sbr.rel (!%p16_p12) target bundleno = 3 (0x3), region = 92 }

// kernel: mc_forward.3
= control target key start
LH: loop header
LB: loop body
LE: loop exit
PB: predicated region body
PF: predicated region fallthrough
CT: control target
= control target key end

     0   :  { %s2500_s30 = smov 0   ;;  %s2502_s10 = smov 0   ;;  %s3630_s0 = inlined_call_operand.vmem [shape: bf16[2,16,16,128], index: 0, kind: input, shape index: {}, may-alias: {0,1,2}]   ;;  %s3631_s1 = inlined_call_operand.vmem [shape: bf16[2,16,16,128], index: 1, kind: input, shape index: {}, may-alias: {0,1,2}]   ;;  %s3632_s2 = inlined_call_operand.vmem [shape: bf16[2,16,16,128], index: 2, kind: input, shape index: {}, may-alias: {0,1,2}]   ;;  %s3633_s3 = inlined_call_operand.vmem [shape: f32[3,3,128], index: 3, kind: input, shape index: {}]   ;;  %s3634_s4 = inlined_call_operand.vmem [shape: f32[1,128], index: 4, kind: input, shape index: {}]   ;;  %s3635_s5 = inlined_call_operand.vmem [shape: f32[1,128], index: 5, kind: input, shape index: {}]   ;;  %s3636_s6 = inlined_call_operand.vmem [shape: bf16[128,128], index: 6, kind: input, shape index: {}]   ;;  %s3637_s7 = inlined_call_operand.vmem [shape: f32[1,128], index: 7, kind: input, shape index: {}]   ;;  %s3638_s8 = inlined_call_operand.vmem [shape: f32[1,128], index: 8, kind: input, shape index: {}]   ;;  %s3639_s9 = inlined_call_operand.vmem [shape: f32[2,32,16,256], index: 9, kind: output, shape index: {}]  }
   0x1   :  { %s2504_s11 = smov 0   ;;  %s2506_s12 = smov 0  }
   0x2   :  { %s2508_s13 = smov 0  }
   0x3 LB: > { %s28_s14 = sadd.s32 1, %s2440_s11  ;;  %s31_s15 = sadd.s32 1, %s2444_s12  ;;  %s2448_s13 = sphi %s2508_s13, %s19_s13   ;;  %s2444_s12 = sphi %s2506_s12, %s3687_s12   ;;  %s2440_s11 = sphi %s2504_s11, %s3686_s11   ;;  %s2436_s10 = sphi %s2502_s10, %s3685_s10   ;;  %s2432_s30 = sphi %s2500_s30, %s3684_s30  }
   0x4   : > { %p29_p0 = scmp.ge.s32.totalorder %s28_s14, 2  ;;  %p2195_p1 = scmp.ge.s32.totalorder %s2448_s13, 1 }
   0x5   : > { %p377_p2 = scmp.lt.s32.totalorder %s2448_s13, 5 }
   0x6   : > { %s3689_s14 = smov (%p29_p0, %s28_s14), 0  ;;  %s3691_s15 = smov (!%p29_p0, %s31_s15), %s2444_s12 }
   0x7   : > { %p378_p3 = pnand %p2195_p1, %p377_p2  ;;  %p33_p4 = scmp.ge.s32.totalorder %s3691_s15, 2 }
   0x9   : > { %s3693_s15 = smov (%p33_p4, %s3691_s15), 0  ;;  %381 = sbr.rel (%p378_p3) target bundleno = 442 (0x1ba), region = 56 }
  0x10   : > { %v2402_v0 = vld [vmem:[%s3636_s6] sm:$0xff]   ;;  %p456_p5 = scmp.lt.s32.totalorder %s2436_s10, 1  ;;  %v2403_v1 = vld [vmem:[%s3636_s6 + $0x8] sm:$0xff]   ;;  %s2202_s20 = sshll.u32 %s2432_s30, 3  ;;  %v2404_v2 = vld [vmem:[%s3636_s6 + $0x10] sm:$0xff]   ;;  %v753_v3 = vlaneseq  ;;  %vm607_vm0 = vcmask 1040384  }
  0x11   : > { %2346 = vmatprep.subr.bf16.mxu1 %v2402_v0  ;;  %2310 = vmatprep.subr.bf16.mxu0 %v2402_v0  ;;  %p473_p6 = scmp.lt.s32.totalorder %s2202_s20, 15  ;;  %v2405_v4 = vld [vmem:[%s3636_s6 + $0x18] sm:$0xff]   ;;  %s2196_s18 = sshll.u32 %s2432_s30, 2  ;;  %vm680_vm1 = vcmask 1046528   ;;  %v2406_v9 = vld [vmem:[%s3636_s6 + $0x20] sm:$0xff]   ;;  %v2407_v27 = vld [vmem:[%s3636_s6 + $0x28] sm:$0xff]  }
  0x12   : > { %s3695_s10 = smov (!%p456_p5, %s2436_s10), 1  ;;  %2354 = vmatpush3.bf16.msra.mxu1 %v2402_v0  ;;  %2311 = vmatpush3.bf16.msra.mxu0 %v2402_v0  ;;  %v754_v8 = vshrl.u32 %v753_v3, 7  ;;  %s2582_s21 = sadd.s32 4294967295, %s2196_s18  ;;  %v576_v32 = vld [vmem:[%s3633_s3] sm:$0x7]  ;;  %v2408_v47 = vld [vmem:[%s3636_s6 + $0x30] sm:$0xff]  }
  0x13   : > { %2347 = vmatprep.subr.bf16.mxu1 %v2403_v1  ;;  %2312 = vmatprep.subr.bf16.mxu0 %v2403_v1  ;;  %s2545_s23 = sshll.u32 %s3695_s10, 5  ;;  %s3697_s20 = smov (!%p473_p6, %s2202_s20), 15  ;;  %v2626_v37 = vld [vmem:[%s3633_s3 + $0x4] sm:$0x7]  ;;  %v2635_v42 = vld [vmem:[%s3633_s3 + $0x8] sm:$0x7] }
  0x14   : > { %s2203_s24 = sshll.u32 %s3697_s20, 1  ;;  %p453_p7 = scmp.gt.s32.totalorder %s2582_s21, 0  ;;  %v755_v45 = vsub.s32 0, %v754_v8  ;;  %v2639_v46 = vsub.s32 1, %v754_v8  ;;  %v2672_v56 = vsub.s32 2, %v754_v8  ;;  %v2409_v0 = vld [vmem:[%s3636_s6 + $0x38] sm:$0xff]  }
  0x15   : > { %s477_s27 = sadd.s32 %s2203_s24, %s2545_s23  ;;  %p544_p9 = scmp.eq.s32.totalorder %s2432_s30, 0 }
  0x16   : > { %2355 = vmatpush3.bf16.msra.mxu1 %v2403_v1  ;;  %2313 = vmatpush3.bf16.msra.mxu0 %v2403_v1  ;;  %s2205_s28 = sshll.u32 %s477_s27, 2  ;;  %s3699_s21 = smov (!%p453_p7, %s2582_s21), 0  ;;  %v2667_v54 = vrot.slane %v576_v32, %v755_v45  ;;  %v2670_v55 = vrot.slane %v576_v32, %v2639_v46  ;;  %v2675_v57 = vrot.slane %v2626_v37, %v755_v45 }
  0x17   : > { %2348 = vmatprep.subr.bf16.mxu1 %v2404_v2  ;;  %2314 = vmatprep.subr.bf16.mxu0 %v2404_v2  ;;  %s2554_s17 = scalar_lea.vmem %s3631_s1, %s2205_s28  ;;  %v2679_v58 = vrot.slane %v2626_v37, %v2639_v46  ;;  %v2682_v59 = vrot.slane %v2635_v42, %v755_v45  ;;  %s2198_s25 = sshll.u32 %s3699_s21, 1 }
  0x18   : > { %v2286_v5 = vld [vmem:[%s2554_s17 + $0x20] sm:$0xff]   ;;  %v2287_v6 = vld [vmem:[%s2554_s17 + $0x28] sm:$0xff]   ;;  %v2288_v7 = vld [vmem:[%s2554_s17 + $0x30] sm:$0xff]   ;;  %p2721_p8 = scmp.lt.s32.totalorder %s2198_s25, 15  ;;  %p560_p12 = scmp.eq.s32.totalorder %s2432_s30, 1 }
  0x19   : > { %v2563_v10 = vunpack.c.l.bf16 %v2286_v5  ;;  %v2565_v11 = vunpack.c.h.bf16 %v2286_v5  ;;  %v2567_v12 = vunpack.c.l.bf16 %v2287_v6  ;;  %v2569_v13 = vunpack.c.h.bf16 %v2287_v6  ;;  %v2289_v14 = vld [vmem:[%s2554_s17 + $0x38] sm:$0xff]   ;;  %s553_s26 = scalar_select %p544_p9, 1, 0 }
  0x1a   : > { %2356 = vmatpush3.bf16.msra.mxu1 %v2404_v2  ;;  %2315 = vmatpush3.bf16.msra.mxu0 %v2404_v2  ;;  %v2572_v15 = vunpack.c.l.bf16 %v2288_v7  ;;  %v2574_v16 = vunpack.c.h.bf16 %v2288_v7  ;;  %v2576_v17 = vunpack.c.l.bf16 %v2289_v14  ;;  %v2578_v18 = vunpack.c.h.bf16 %v2289_v14  ;;  %s3701_s25 = smov (!%p2721_p8, %s2198_s25), 15 }
  0x1b   : > { %2349 = vmatprep.subr.bf16.mxu1 %v2405_v4  ;;  %2316 = vmatprep.subr.bf16.mxu0 %v2405_v4  ;;  %3656 = vst [vmem:[#allocation2_spill] sm:$0xff] %v2563_v10  ;;  %3657 = vst [vmem:[#allocation3_spill] sm:$0xff] %v2565_v11  ;;  %v626_v19 = vrot.slane %v2563_v10, 7  ;;  %v627_v20 = vrot.slane %v2565_v11, 7  ;;  %v629_v21 = vrot.slane %v2567_v12, 7  ;;  %v630_v22 = vrot.slane %v2569_v13, 7 }
  0x1c   : > { %3658 = vst [vmem:[#allocation4_spill] sm:$0xff] %v2567_v12  ;;  %3659 = vst [vmem:[#allocation5_spill] sm:$0xff] %v2569_v13  ;;  %v632_v23 = vrot.slane %v2572_v15, 7  ;;  %v633_v24 = vrot.slane %v2574_v16, 7  ;;  %v635_v25 = vrot.slane %v2576_v17, 7  ;;  %v636_v26 = vrot.slane %v2578_v18, 7 }
  0x1d   : > { %v2596_v28 = vsel %vm607_vm0, %v626_v19, %v627_v20  ;;  %v2599_v29 = vsel %vm607_vm0, %v629_v21, %v630_v22  ;;  %v2602_v30 = vsel %vm607_vm0, 0.0, %v626_v19  ;;  %v2605_v31 = vsel %vm607_vm0, 0.0, %v629_v21  ;;  %s2199_s21 = sshll.u32 %s3701_s25, 1 }
  0x1e   : > { %2357 = vmatpush3.bf16.msra.mxu1 %v2405_v4  ;;  %2317 = vmatpush3.bf16.msra.mxu0 %v2405_v4  ;;  %3660 = vst [vmem:[#allocation6_spill] sm:$0xff] %v2599_v29  ;;  %3661 = vst [vmem:[#allocation7_spill] sm:$0xff] %v2605_v31  ;;  %v2612_v33 = vsel %vm607_vm0, %v632_v23, %v633_v24  ;;  %v2615_v34 = vsel %vm607_vm0, %v635_v25, %v636_v26  ;;  %v2618_v35 = vsel %vm607_vm0, 0.0, %v632_v23  ;;  %s462_s27 = sadd.s32 %s2545_s23, %s2199_s21  ;;  %s2869_s21 = sadd.s32 4, %s2196_s18 }
  0x1f   : > { %2350 = vmatprep.subr.bf16.mxu1 %v2406_v9  ;;  %2318 = vmatprep.subr.bf16.mxu0 %v2406_v9  ;;  %v2621_v36 = vsel %vm607_vm0, 0.0, %v635_v25  ;;  %v699_v38 = vrot.slane %v2563_v10, 1  ;;  %v700_v39 = vrot.slane %v2565_v11, 1  ;;  %v702_v40 = vrot.slane %v2567_v12, 1  ;;  %s2201_s28 = sshll.u32 %s462_s27, 2  ;;  %p483_p10 = scmp.lt.s32.totalorder %s2869_s21, 7 }
  0x20   : > { %v703_v41 = vrot.slane %v2569_v13, 1  ;;  %v705_v43 = vrot.slane %v2572_v15, 1  ;;  %v706_v44 = vrot.slane %v2574_v16, 1  ;;  %v769_v60 = vmul.f32 %v2667_v54, %v2602_v30  ;;  %s464_s22 = scalar_lea.vmem %s3630_s0, %s2201_s28 }
  0x21   : > { %v2645_v48 = vsel %vm680_vm1, %v699_v38, %v700_v39  ;;  %v2651_v50 = vsel %vm680_vm1, %v700_v39, 0.0  ;;  %v770_v61 = vmul.f32 %v2667_v54, %v2596_v28  ;;  %v771_v62 = vmul.f32 %v2667_v54, %v2605_v31  ;;  %s3703_s21 = smov (!%p483_p10, %s2869_s21), 7 }
  0x22   : > { %2358 = vmatpush3.bf16.msra.mxu1 %v2406_v9  ;;  %2319 = vmatpush3.bf16.msra.mxu0 %v2406_v9  ;;  %3662 = vst [vmem:[#allocation8_spill] sm:$0xff] %v2645_v48  ;;  %v2648_v49 = vsel %vm680_vm1, %v702_v40, %v703_v41  ;;  %3664 = vst [vmem:[#allocation10_spill] sm:$0xff] %v2651_v50  ;;  %v2654_v51 = vsel %vm680_vm1, %v703_v41, 0.0  ;;  %v2662_v52 = vsel %vm680_vm1, %v705_v43, %v706_v44  ;;  %s2207_s18 = sshll.u32 %s3703_s21, 1 }
  0x23   : > { %2351 = vmatprep.subr.bf16.mxu1 %v2407_v27  ;;  %2320 = vmatprep.subr.bf16.mxu0 %v2407_v27  ;;  %3663 = vst [vmem:[#allocation9_spill] sm:$0xff] %v2648_v49  ;;  %3665 = vst [vmem:[#allocation11_spill] sm:$0xff] %v2654_v51  ;;  %v2665_v53 = vsel %vm680_vm1, %v706_v44, 0.0  ;;  %v708_v63 = vrot.slane %v2576_v17, 1  ;;  %v772_v1 = vmul.f32 %v2667_v54, %v2599_v29  ;;  %v709_v4 = vrot.slane %v2578_v18, 1  ;;  %p2950_p11 = scmp.lt.s32.totalorder %s2207_s18, 15 }
  0x24   : > { %v773_v2 = vmul.f32 %v2667_v54, %v2618_v35  ;;  %v774_v3 = vmul.f32 %v2667_v54, %v2612_v33  ;;  %v813_v5 = vmul.f32 %v2563_v10, %v2670_v55  ;;  %v814_v6 = vmul.f32 %v2565_v11, %v2670_v55 }
  0x25   : > { %v815_v7 = vmul.f32 %v2567_v12, %v2670_v55  ;;  %v816_v8 = vmul.f32 %v2569_v13, %v2670_v55  ;;  %v817_v9 = vmul.f32 %v2572_v15, %v2670_v55  ;;  %v818_v14 = vmul.f32 %v2574_v16, %v2670_v55  ;;  %s3705_s18 = smov (!%p2950_p11, %s2207_s18), 15 }
  0x26   : > { %2359 = vmatpush3.bf16.msra.mxu1 %v2407_v27  ;;  %2321 = vmatpush3.bf16.msra.mxu0 %v2407_v27  ;;  %v2715_v19 = vrot.slane %v576_v32, %v2672_v56  ;;  %v901_v20 = vmul.f32 %v2675_v57, %v2605_v31  ;;  %v833_v21 = vadd.f32 %v813_v5, %v769_v60  ;;  %s2208_s28 = sshll.u32 %s3705_s18, 1  ;;  %s2213_s18 = sshll.u32 %s3695_s10, 7 }
  0x27   : > { %2352 = vmatprep.subr.bf16.mxu1 %v2408_v47  ;;  %2322 = vmatprep.subr.bf16.mxu0 %v2408_v47  ;;  %v834_v22 = vadd.f32 %v814_v6, %v770_v61  ;;  %v835_v23 = vadd.f32 %v815_v7, %v771_v62  ;;  %v836_v24 = vadd.f32 %v816_v8, %v772_v1  ;;  %s492_s29 = sadd.s32 %s2208_s28, %s2545_s23 }
  0x28   : > { %v837_v25 = vadd.f32 %v817_v9, %v773_v2  ;;  %v838_v26 = vadd.f32 %v818_v14, %v774_v3  ;;  %v857_v27 = vmul.f32 %v2715_v19, %v2645_v48  ;;  %v858_v32 = vmul.f32 %v2715_v19, %v2651_v50  ;;  %s2210_s23 = sshll.u32 %s492_s29, 2 }
  0x29   : > { %v859_v38 = vmul.f32 %v2715_v19, %v2648_v49  ;;  %v860_v39 = vmul.f32 %v2715_v19, %v2654_v51  ;;  %v861_v40 = vmul.f32 %v2715_v19, %v2662_v52  ;;  %v862_v41 = vmul.f32 %v2715_v19, %v2665_v53  ;;  %s3034_s20 = scalar_lea.vmem %s3632_s2, %s2210_s23 }
  0x2a   : > { %2360 = vmatpush3.bf16.msra.mxu1 %v2408_v47  ;;  %2323 = vmatpush3.bf16.msra.mxu0 %v2408_v47  ;;  %v877_v43 = vadd.f32 %v857_v27, %v833_v21  ;;  %v878_v44 = vadd.f32 %v858_v32, %v834_v22  ;;  %v902_v45 = vmul.f32 %v2675_v57, %v2599_v29 }
  0x2b   : > { %2353 = vmatprep.subr.bf16.mxu1 %v2409_v0  ;;  %v903_v60 = vmul.f32 %v2675_v57, %v2618_v35  ;;  %2324 = vmatprep.subr.bf16.mxu0 %v2409_v0  ;;  %v879_v61 = vadd.f32 %v859_v38, %v835_v23  ;;  %v880_v62 = vadd.f32 %v860_v39, %v836_v24 }
  0x2c   : > { %v881_v1 = vadd.f32 %v861_v40, %v837_v25  ;;  %v882_v2 = vadd.f32 %v862_v41, %v838_v26  ;;  %v904_v47 = vmul.f32 %v2675_v57, %v2612_v33  ;;  %v905_v3 = vmul.f32 %v2675_v57, %v2621_v36 }
  0x2d   : > { %v906_v5 = vmul.f32 %v2675_v57, %v2615_v34  ;;  %v921_v6 = vadd.f32 %v901_v20, %v877_v43  ;;  %v922_v7 = vadd.f32 %v902_v45, %v878_v44  ;;  %v923_v8 = vadd.f32 %v903_v60, %v879_v61 }
  0x2e   : > { %2361 = vmatpush3.bf16.msra.mxu1 %v2409_v0  ;;  %v945_v9 = vmul.f32 %v2567_v12, %v2679_v58  ;;  %v946_v14 = vmul.f32 %v2569_v13, %v2679_v58  ;;  %2325 = vmatpush3.bf16.msra.mxu0 %v2409_v0  ;;  %v924_v21 = vadd.f32 %v904_v47, %v880_v62 }
  0x2f   : > { %v2757_v22 = vadd.f32 %v905_v3, %v881_v1  ;;  %v2759_v23 = vadd.f32 %v906_v5, %v882_v2  ;;  %v947_v24 = vmul.f32 %v2572_v15, %v2679_v58  ;;  %v948_v20 = vmul.f32 %v2574_v16, %v2679_v58 }
  0x30   : > { %v965_v25 = vadd.f32 %v945_v9, %v921_v6  ;;  %v966_v26 = vadd.f32 %v946_v14, %v922_v7  ;;  %v2767_v27 = vrot.slane %v2626_v37, %v2672_v56  ;;  %v1033_v32 = vmul.f32 %v2682_v59, %v2618_v35  ;;  %v2826_v9 = vld [vmem:[%s3634_s4] ss:$0 sm:$0xff] }
  0x31   : > { %v967_v0 = vadd.f32 %v947_v24, %v923_v8  ;;  %v1034_v38 = vmul.f32 %v2682_v59, %v2612_v33  ;;  %v2776_v39 = vrot.slane %v2635_v42, %v2639_v46  ;;  %v968_v40 = vadd.f32 %v948_v20, %v924_v21 }
  0x32   : > { %v989_v41 = vmul.f32 %v2767_v27, %v2648_v49  ;;  %v990_v37 = vmul.f32 %v2767_v27, %v2654_v51  ;;  %v991_v43 = vmul.f32 %v2767_v27, %v2662_v52  ;;  %v992_v35 = vmul.f32 %v2767_v27, %v2665_v53 }
  0x33   : > { %v1077_v33 = vmul.f32 %v2572_v15, %v2776_v39  ;;  %v1078_v46 = vmul.f32 %v2574_v16, %v2776_v39  ;;  %v2792_v44 = vrot.slane %v2635_v42, %v2672_v56  ;;  %v710_v62 = vsel %vm680_vm1, %v708_v63, %v709_v4 }
  0x34   : > { %v1009_v45 = vadd.f32 %v989_v41, %v965_v25  ;;  %v1010_v60 = vadd.f32 %v990_v37, %v966_v26  ;;  %v1011_v61 = vadd.f32 %v991_v43, %v967_v0  ;;  %v1012_v1 = vadd.f32 %v992_v35, %v968_v40  ;;  %v2283_v43 = vld [vmem:[%s2554_s17 + $0x8] sm:$0xff]  }
  0x35   : > { %v1121_v15 = vmul.f32 %v2792_v44, %v2662_v52  ;;  %v1122_v16 = vmul.f32 %v2792_v44, %v2665_v53  ;;  %v750_v42 = vsel %vm680_vm1, %v709_v4, 0.0  ;;  %v775_v47 = vmul.f32 %v2667_v54, %v2621_v36 }
  0x36   : > { %v1053_v56 = vadd.f32 %v1033_v32, %v1009_v45  ;;  %v1054_v2 = vadd.f32 %v1034_v38, %v1010_v60  ;;  %v776_v3 = vmul.f32 %v2667_v54, %v2615_v34  ;;  %v819_v52 = vmul.f32 %v2576_v17, %v2670_v55  ;;  %v2236_v38 = vld [vmem:[%s2554_s17] sm:$0xff]  }
  0x37   : > { %v820_v53 = vmul.f32 %v2578_v18, %v2670_v55  ;;  %v863_v63 = vmul.f32 %v2715_v19, %v710_v62  ;;  %v864_v4 = vmul.f32 %v2715_v19, %v750_v42  ;;  %v2818_v7 = vmul.f32 %v2767_v27, %v710_v62  ;;  %v2268_v60 = vld [vmem:[%s464_s22] sm:$0xff]  }
  0x38   : > { %v1097_v5 = vadd.f32 %v1077_v33, %v1053_v56  ;;  %v1098_v6 = vadd.f32 %v1078_v46, %v1054_v2  ;;  %v2821_v8 = vmul.f32 %v2767_v27, %v750_v42  ;;  %v839_v14 = vadd.f32 %v819_v52, %v775_v47  ;;  %v2290_v47 = vld [vmem:[%s464_s22 + $0x8] sm:$0xff]   ;;  %s569_s22 = scalar_select %p560_p12, 1, 0 }
  0x39   : > { %v840_v21 = vadd.f32 %v820_v53, %v776_v3  ;;  %v1035_v24 = vmul.f32 %v2682_v59, %v2621_v36  ;;  %v1036_v20 = vmul.f32 %v2682_v59, %v2615_v34  ;;  %v1079_v0 = vmul.f32 %v2576_v17, %v2776_v39  ;;  %v2844_v36 = vld [vmem:[%s3635_s5] ss:$0 sm:$0xff] }
  0x3a   : > { %v1141_v25 = vadd.f32 %v1121_v15, %v1097_v5  ;;  %v1142_v26 = vadd.f32 %v1122_v16, %v1098_v6  ;;  %v1080_v32 = vmul.f32 %v2578_v18, %v2776_v39  ;;  %v2846_v34 = vadd.f32 %v863_v63, %v839_v14 }
  0x3b   : > { %v2848_v40 = vadd.f32 %v864_v4, %v840_v21  ;;  %v1055_v41 = vadd.f32 %v1035_v24, %v1011_v61  ;;  %v1056_v37 = vadd.f32 %v1036_v20, %v1012_v1  ;;  %v1123_v46 = vmul.f32 %v2792_v44, %v710_v62 }
  0x3c   : > { %v1167_v35 = vmul.f32 %v2826_v9, %v1141_v25  ;;  %v1168_v33 = vmul.f32 %v2826_v9, %v1142_v26  ;;  %v1124_v45 = vmul.f32 %v2792_v44, %v750_v42  ;;  %v2855_v56 = vunpack.c.l.bf16 %v2236_v38 }
  0x3d   : > { %v1099_v15 = vadd.f32 %v1079_v0, %v1055_v41  ;;  %v1100_v16 = vadd.f32 %v1080_v32, %v1056_v37  ;;  %v2857_v2 = vunpack.c.h.bf16 %v2236_v38  ;;  %v2863_v3 = vunpack.c.l.bf16 %v2283_v43 }
  0x3e   : > { %v1193_v61 = vadd.f32 %v2844_v36, %v1167_v35  ;;  %v1194_v1 = vadd.f32 %v2844_v36, %v1168_v33  ;;  %v2865_v62 = vunpack.c.h.bf16 %v2283_v43  ;;  %v2269_v53 = vunpack.c.l.bf16 %v2268_v60 }
  0x3f   : > { %v1143_v42 = vadd.f32 %v1123_v46, %v1099_v15  ;;  %v1144_v52 = vadd.f32 %v1124_v45, %v1100_v16  ;;  %v2270_v63 = vunpack.c.h.bf16 %v2268_v60  ;;  %v2273_v6 = vunpack.c.l.bf16 %v2290_v47 }
  0x40   : > { %v1213_v4 = vmax.f32 %v1193_v61, 0.0  ;;  %v1214_v5 = vmax.f32 %v1194_v1, 0.0  ;;  %v2274_v14 = vunpack.c.h.bf16 %v2290_v47  ;;  %v554_v20 = vstv %s553_s26 }
  0x41   : > { %v1169_v21 = vmul.f32 %v2826_v9, %v1143_v42  ;;  %v1170_v24 = vmul.f32 %v2826_v9, %v1144_v52  ;;  %v614_v25 = vrot.slane %v2855_v56, 7  ;;  %vm2874_vm2 = vcmp.eq.s32.totalorder %v554_v20, 1 }
  0x42   : > { %v1227_v26 = vpack.c.bf16 %v1214_v5, %v1213_v4  ;;  %v3667_v0 = vmov 0  ;;  %v615_v32 = vrot.slane %v2857_v2, 7  ;;  %v617_v38 = vrot.slane %v2863_v3, 7 }
  0x43   : > { %v3668_v0 = vsel %vm2874_vm2, 4294967295, %v3667_v0  ;;  %v1195_v41 = vadd.f32 %v2844_v36, %v1169_v21  ;;  %v1196_v37 = vadd.f32 %v2844_v36, %v1170_v24  ;;  %v556_v43 = vsel %vm2874_vm2, 0.0, %v2269_v53 }
  0x44   : > { %3669 = vst [vmem:[#allocation12_spill] sm:$0xff] %v3668_v0  ;;  %v557_v35 = vsel %vm2874_vm2, 0.0, %v2270_v63  ;;  %2338 = vmatprep.mubr.bf16.mxu1 %v1227_v26  ;;  %v2889_v33 = vsel %vm2874_vm2, 0.0, %v2273_v6  ;;  %v2893_v46 = vsel %vm2874_vm2, 0.0, %v2274_v14  ;;  %v608_v45 = vrot.slane %v556_v43, 7 }
  0x45   : > { %v609_v60 = vrot.slane %v557_v35, 7  ;;  %v1215_v15 = vmax.f32 %v1195_v41, 0.0  ;;  %v1216_v16 = vmax.f32 %v1196_v37, 0.0  ;;  %v611_v47 = vrot.slane %v2889_v33, 7 }
  0x46   : > { %v612_v61 = vrot.slane %v2893_v46, 7  ;;  %v2899_v42 = vsel %vm607_vm0, %v614_v25, %v615_v32  ;;  %v618_v52 = vrot.slane %v2865_v62, 7  ;;  %v668_v53 = vsel %vm607_vm0, 0.0, %v608_v45 }
  0x47   : > { %v610_v1 = vsel %vm607_vm0, %v608_v45, %v609_v60  ;;  %v1228_v63 = vpack.c.bf16 %v1216_v16, %v1215_v15  ;;  %v669_v5 = vsel %vm607_vm0, 0.0, %v611_v47  ;;  %v2911_v6 = vsel %vm607_vm0, 0.0, %v614_v25 }
  0x48   : > { %v613_v4 = vsel %vm607_vm0, %v611_v47, %v612_v61  ;;  %v2914_v14 = vsel %vm607_vm0, %v617_v38, %v618_v52  ;;  %v2917_v21 = vsel %vm607_vm0, 0.0, %v617_v38  ;;  %v681_v24 = vrot.slane %v556_v43, 1 }
  0x49   : > { %v682_v20 = vrot.slane %v557_v35, 1  ;;  %2339 = vmatmul.mubr.bf16.vlgmr.msra.gmra.mrb[0].mxu1 %v1228_v63  ;;  %v684_v26 = vrot.slane %v2889_v33, 1  ;;  %v685_v32 = vrot.slane %v2893_v46, 1  ;;  %v687_v41 = vrot.slane %v2855_v56, 1 }
  0x4a   : > { %v688_v37 = vrot.slane %v2857_v2, 1  ;;  %v757_v60 = vmul.f32 %v2667_v54, %v668_v53  ;;  %v758_v38 = vmul.f32 %v2667_v54, %v610_v1  ;;  %v759_v52 = vmul.f32 %v2667_v54, %v669_v5 }
  0x4b   : > { %v683_v25 = vsel %vm680_vm1, %v681_v24, %v682_v20  ;;  %v741_v45 = vsel %vm680_vm1, %v682_v20, 0.0  ;;  %v686_v15 = vsel %vm680_vm1, %v684_v26, %v685_v32  ;;  %v742_v47 = vsel %vm680_vm1, %v685_v32, 0.0 }
  0x4c   : > { %v2930_v16 = vsel %vm680_vm1, %v687_v41, %v688_v37  ;;  %v2934_v61 = vsel %vm680_vm1, %v688_v37, 0.0  ;;  %v760_v63 = vmul.f32 %v2667_v54, %v613_v4  ;;  %v761_v53 = vmul.f32 %v2667_v54, %v2911_v6 }
  0x4d   : > { %v762_v1 = vmul.f32 %v2667_v54, %v2899_v42  ;;  %v801_v24 = vmul.f32 %v2670_v55, %v556_v43  ;;  %v802_v20 = vmul.f32 %v2670_v55, %v557_v35  ;;  %v803_v26 = vmul.f32 %v2670_v55, %v2889_v33 }
  0x4e   : > { %v804_v32 = vmul.f32 %v2670_v55, %v2893_v46  ;;  %v805_v41 = vmul.f32 %v2855_v56, %v2670_v55  ;;  %v806_v43 = vmul.f32 %v2857_v2, %v2670_v55  ;;  %v845_v35 = vmul.f32 %v2715_v19, %v683_v25 }
  0x4f   : > { %v846_v37 = vmul.f32 %v2715_v19, %v741_v45  ;;  %v821_v0 = vadd.f32 %v801_v24, %v757_v60  ;;  %v822_v51 = vadd.f32 %v802_v20, %v758_v38  ;;  %v823_v49 = vadd.f32 %v803_v26, %v759_v52 }
  0x50   : > { %v824_v13 = vadd.f32 %v804_v32, %v760_v63  ;;  %v825_v12 = vadd.f32 %v805_v41, %v761_v53  ;;  %v826_v29 = vadd.f32 %v806_v43, %v762_v1  ;;  %v847_v31 = vmul.f32 %v2715_v19, %v686_v15 }
  0x51   : > { %v848_v50 = vmul.f32 %v2715_v19, %v742_v47  ;;  %v849_v48 = vmul.f32 %v2715_v19, %v2930_v16  ;;  %v850_v11 = vmul.f32 %v2715_v19, %v2934_v61  ;;  %v865_v10 = vadd.f32 %v845_v35, %v821_v0 }
  0x52   : > { %v866_v25 = vadd.f32 %v846_v37, %v822_v51  ;;  %v867_v45 = vadd.f32 %v847_v31, %v823_v49  ;;  %v889_v38 = vmul.f32 %v2675_v57, %v669_v5  ;;  %v890_v52 = vmul.f32 %v2675_v57, %v613_v4 }
  0x53   : > { %v868_v60 = vadd.f32 %v848_v50, %v824_v13  ;;  %v869_v63 = vadd.f32 %v849_v48, %v825_v12  ;;  %v870_v53 = vadd.f32 %v850_v11, %v826_v29  ;;  %v891_v1 = vmul.f32 %v2675_v57, %v2911_v6 }
  0x54   : > { %v892_v0 = vmul.f32 %v2675_v57, %v2899_v42  ;;  %v893_v51 = vmul.f32 %v2675_v57, %v2917_v21  ;;  %v894_v31 = vmul.f32 %v2675_v57, %v2914_v14  ;;  %v909_v49 = vadd.f32 %v889_v38, %v865_v10 }
  0x55   : > { %v910_v13 = vadd.f32 %v890_v52, %v866_v25  ;;  %v911_v50 = vadd.f32 %v891_v1, %v867_v45  ;;  %v933_v11 = vmul.f32 %v2679_v58, %v2889_v33  ;;  %v934_v12 = vmul.f32 %v2679_v58, %v2893_v46 }
  0x56   : > { %v912_v5 = vadd.f32 %v892_v0, %v868_v60  ;;  %v2987_v29 = vadd.f32 %v893_v51, %v869_v63  ;;  %v2989_v48 = vadd.f32 %v894_v31, %v870_v53  ;;  %v935_v4 = vmul.f32 %v2855_v56, %v2679_v58 }
  0x57   : > { %v936_v10 = vmul.f32 %v2857_v2, %v2679_v58  ;;  %v953_v24 = vadd.f32 %v933_v11, %v909_v49  ;;  %v954_v20 = vadd.f32 %v934_v12, %v910_v13  ;;  %v977_v26 = vmul.f32 %v2767_v27, %v686_v15 }
  0x58   : > { %v978_v33 = vmul.f32 %v2767_v27, %v742_v47  ;;  %v955_v32 = vadd.f32 %v935_v4, %v911_v50  ;;  %v979_v46 = vmul.f32 %v2767_v27, %v2930_v16  ;;  %v980_v43 = vmul.f32 %v2767_v27, %v2934_v61 }
  0x59   : > { %v956_v41 = vadd.f32 %v936_v10, %v912_v5  ;;  %v997_v35 = vadd.f32 %v977_v26, %v953_v24  ;;  %v1021_v25 = vmul.f32 %v2682_v59, %v2911_v6  ;;  %v1022_v45 = vmul.f32 %v2682_v59, %v2899_v42 }
  0x5a   : > { %v998_v37 = vadd.f32 %v978_v33, %v954_v20  ;;  %v999_v15 = vadd.f32 %v979_v46, %v955_v32  ;;  %v1065_v47 = vmul.f32 %v2855_v56, %v2776_v39  ;;  %v1066_v38 = vmul.f32 %v2857_v2, %v2776_v39 }
  0x5b   : > { %v1000_v60 = vadd.f32 %v980_v43, %v956_v41  ;;  %v1041_v52 = vadd.f32 %v1021_v25, %v997_v35  ;;  %v1109_v53 = vmul.f32 %v2792_v44, %v2930_v16  ;;  %v1110_v6 = vmul.f32 %v2792_v44, %v2934_v61  ;;  %v2276_v41 = vld [vmem:[%s3034_s20] sm:$0xff]  }
  0x5c   : > { %v1042_v63 = vadd.f32 %v1022_v45, %v998_v37  ;;  %v690_v42 = vrot.slane %v2863_v3, 1  ;;  %v691_v1 = vrot.slane %v2865_v62, 1  ;;  %v763_v0 = vmul.f32 %v2667_v54, %v2917_v21 }
  0x5d   : > { %v764_v56 = vmul.f32 %v2667_v54, %v2914_v14  ;;  %v1085_v2 = vadd.f32 %v1065_v47, %v1041_v52  ;;  %v807_v31 = vmul.f32 %v2863_v3, %v2670_v55  ;;  %v808_v16 = vmul.f32 %v2865_v62, %v2670_v55 }
  0x5e   : > { %v1086_v51 = vadd.f32 %v1066_v38, %v1042_v63  ;;  %v692_v61 = vsel %vm680_vm1, %v690_v42, %v691_v1  ;;  %v744_v49 = vsel %vm680_vm1, %v691_v1, 0.0  ;;  %v1023_v13 = vmul.f32 %v2682_v59, %v2917_v21 }
  0x5f   : > { %v1024_v50 = vmul.f32 %v2682_v59, %v2914_v14  ;;  %v1129_v5 = vadd.f32 %v1109_v53, %v1085_v2  ;;  %v827_v12 = vadd.f32 %v807_v31, %v763_v0  ;;  %v828_v4 = vadd.f32 %v808_v16, %v764_v56 }
  0x60   : > { %v1130_v11 = vadd.f32 %v1110_v6, %v1086_v51  ;;  %v851_v10 = vmul.f32 %v2715_v19, %v692_v61  ;;  %v852_v24 = vmul.f32 %v2715_v19, %v744_v49  ;;  %v3039_v21 = vmul.f32 %v2767_v27, %v692_v61 }
  0x61   : > { %v3042_v20 = vmul.f32 %v2767_v27, %v744_v49  ;;  %v1155_v14 = vmul.f32 %v2826_v9, %v1129_v5  ;;  %v1043_v33 = vadd.f32 %v1023_v13, %v999_v15  ;;  %v1044_v32 = vadd.f32 %v1024_v50, %v1000_v60 }
  0x62   : > { %v1156_v26 = vmul.f32 %v2826_v9, %v1130_v11  ;;  %v3049_v46 = vadd.f32 %v851_v10, %v827_v12  ;;  %v3051_v43 = vadd.f32 %v852_v24, %v828_v4  ;;  %v1067_v35 = vmul.f32 %v2863_v3, %v2776_v39 }
  0x63   : > { %v1068_v37 = vmul.f32 %v2865_v62, %v2776_v39  ;;  %v1181_v25 = vadd.f32 %v2844_v36, %v1155_v14  ;;  %v1111_v15 = vmul.f32 %v2792_v44, %v692_v61  ;;  %v1112_v60 = vmul.f32 %v2792_v44, %v744_v49 }
  0x64   : > { %v1182_v45 = vadd.f32 %v2844_v36, %v1156_v26  ;;  %v1087_v47 = vadd.f32 %v1067_v35, %v1043_v33  ;;  %v2277_v52 = vunpack.c.l.bf16 %v2276_v41  ;;  %v2278_v63 = vunpack.c.h.bf16 %v2276_v41 }
  0x65   : > { %v1088_v38 = vadd.f32 %v1068_v37, %v1044_v32  ;;  %v1201_v53 = vmax.f32 %v1181_v25, 0.0  ;;  %v570_v42 = vstv %s569_s22  ;;  %v949_v1 = vmul.f32 %v2576_v17, %v2679_v58  ;;  %v2291_v25 = vld [vmem:[%s3034_s20 + $0x8] sm:$0xff]  }
  0x66   : > { %v1202_v6 = vmax.f32 %v1182_v45, 0.0  ;;  %v1131_v0 = vadd.f32 %v1111_v15, %v1087_v47  ;;  %vm3063_vm3 = vcmp.eq.s32.totalorder %v570_v42, 1  ;;  %v950_v51 = vmul.f32 %v2578_v18, %v2679_v58 }
  0x67   : > { %v1132_v56 = vadd.f32 %v1112_v60, %v1088_v38  ;;  %v572_v16 = vsel %vm3063_vm3, 0.0, %v2277_v52  ;;  %v573_v61 = vsel %vm3063_vm3, 0.0, %v2278_v63  ;;  %v969_v49 = vadd.f32 %v949_v1, %v2757_v22 }
  0x68   : > { %v1221_v31 = vpack.c.bf16 %v1202_v6, %v1201_v53  ;;  %v1157_v17 = vmul.f32 %v2826_v9, %v1131_v0  ;;  %v638_v50 = vrot.slane %v572_v16, 7  ;;  %v639_v5 = vrot.slane %v573_v61, 7 }
  0x69   : > { %v1158_v13 = vmul.f32 %v2826_v9, %v1132_v56  ;;  %v711_v11 = vrot.slane %v572_v16, 1  ;;  %v712_v12 = vrot.slane %v573_v61, 1  ;;  %v970_v18 = vadd.f32 %v950_v51, %v2759_v23 }
  0x6a   : > { %2326 = vmatprep.mubr.bf16.mxu0 %v1221_v31  ;;  %v1013_v4 = vadd.f32 %v2818_v7, %v969_v49  ;;  %v1183_v10 = vadd.f32 %v2844_v36, %v1157_v17  ;;  %v640_v22 = vsel %vm607_vm0, %v638_v50, %v639_v5  ;;  %v678_v14 = vsel %vm607_vm0, 0.0, %v638_v50 }
  0x6b   : > { %v1184_v24 = vadd.f32 %v2844_v36, %v1158_v13  ;;  %v713_v26 = vsel %vm680_vm1, %v711_v11, %v712_v12  ;;  %v751_v33 = vsel %vm680_vm1, %v712_v12, 0.0  ;;  %v907_v32 = vmul.f32 %v2675_v57, %v678_v14 }
  0x6c   : > { %v908_v41 = vmul.f32 %v2675_v57, %v640_v22  ;;  %v1203_v35 = vmax.f32 %v1183_v10, 0.0  ;;  %v995_v7 = vmul.f32 %v2767_v27, %v713_v26  ;;  %v996_v37 = vmul.f32 %v2767_v27, %v751_v33 }
  0x6d   : > { %v1204_v23 = vmax.f32 %v1184_v24, 0.0  ;;  %v1014_v45 = vadd.f32 %v2821_v8, %v970_v18  ;;  %v1037_v15 = vmul.f32 %v2682_v59, %v678_v14  ;;  %v1038_v60 = vmul.f32 %v2682_v59, %v640_v22 }
  0x6e   : > { %v1081_v47 = vmul.f32 %v2776_v39, %v572_v16  ;;  %v1082_v52 = vmul.f32 %v2776_v39, %v573_v61  ;;  %v1125_v63 = vmul.f32 %v2792_v44, %v713_v26  ;;  %v1126_v53 = vmul.f32 %v2792_v44, %v751_v33 }
  0x6f   : > { %v1222_v38 = vpack.c.bf16 %v1204_v23, %v1203_v35  ;;  %v1057_v6 = vadd.f32 %v1037_v15, %v1013_v4  ;;  %v1058_v42 = vadd.f32 %v1038_v60, %v1014_v45  ;;  %v2281_v1 = vunpack.c.l.bf16 %v2291_v25 }
  0x70   : > { %v2282_v0 = vunpack.c.h.bf16 %v2291_v25  ;;  %v927_v8 = vadd.f32 %v907_v32, %v2846_v34  ;;  %v928_v56 = vadd.f32 %v908_v41, %v2848_v40  ;;  %v951_v51 = vmul.f32 %v2679_v58, %v572_v16  ;;  %v2284_v41 = vld [vmem:[%s2554_s17 + $0x10] sm:$0xff]  }
  0x71   : > { %2327 = vmatmul.mubr.bf16.vlgmr.msra.gmra.mrb[0].mxu0 %v1222_v38  ;;  %v952_v31 = vmul.f32 %v2679_v58, %v573_v61  ;;  %v1101_v49 = vadd.f32 %v1081_v47, %v1057_v6  ;;  %v1102_v17 = vadd.f32 %v1082_v52, %v1058_v42  ;;  %v574_v13 = vsel %vm3063_vm3, 0.0, %v2281_v1 }
  0x72   : > { %v575_v50 = vsel %vm3063_vm3, 0.0, %v2282_v0  ;;  %v641_v5 = vrot.slane %v574_v13, 7  ;;  %v714_v12 = vrot.slane %v574_v13, 1  ;;  %v971_v40 = vadd.f32 %v951_v51, %v927_v8 }
  0x73   : > { %v642_v11 = vrot.slane %v575_v50, 7  ;;  %v715_v18 = vrot.slane %v575_v50, 1  ;;  %v1145_v34 = vadd.f32 %v1125_v63, %v1101_v49  ;;  %v1146_v4 = vadd.f32 %v1126_v53, %v1102_v17 }
  0x74   : > { %v972_v10 = vadd.f32 %v952_v31, %v928_v56  ;;  %v679_v61 = vsel %vm607_vm0, 0.0, %v641_v5  ;;  %v1015_v33 = vadd.f32 %v995_v7, %v971_v40  ;;  %v1083_v25 = vmul.f32 %v2776_v39, %v574_v13 }
  0x75   : > { %v643_v16 = vsel %vm607_vm0, %v641_v5, %v642_v11  ;;  %v716_v24 = vsel %vm680_vm1, %v714_v12, %v715_v18  ;;  %v752_v22 = vsel %vm680_vm1, %v715_v18, 0.0  ;;  %v1171_v14 = vmul.f32 %v2826_v9, %v1145_v34 }
  0x76   : > { %v1172_v26 = vmul.f32 %v2826_v9, %v1146_v4  ;;  %v1016_v32 = vadd.f32 %v996_v37, %v972_v10  ;;  %v1039_v35 = vmul.f32 %v2682_v59, %v679_v61  ;;  %v1040_v23 = vmul.f32 %v2682_v59, %v643_v16 }
  0x77   : > { %v1084_v45 = vmul.f32 %v2776_v39, %v575_v50  ;;  %v1197_v15 = vadd.f32 %v2844_v36, %v1171_v14  ;;  %v1127_v47 = vmul.f32 %v2792_v44, %v716_v24  ;;  %v1128_v38 = vmul.f32 %v2792_v44, %v752_v22 }
  0x78   : > { %v1198_v60 = vadd.f32 %v2844_v36, %v1172_v26  ;;  %v1059_v52 = vadd.f32 %v1039_v35, %v1015_v33  ;;  %v1060_v7 = vadd.f32 %v1040_v23, %v1016_v32  ;;  %v2245_v37 = vunpack.c.l.bf16 %v2284_v41 }
  0x79   : > { %v2246_v63 = vunpack.c.h.bf16 %v2284_v41  ;;  %v1217_v53 = vmax.f32 %v1197_v15, 0.0  ;;  %v937_v42 = vmul.f32 %v2863_v3, %v2679_v58  ;;  %v938_v1 = vmul.f32 %v2865_v62, %v2679_v58 }
  0x7a   : > { %v1218_v6 = vmax.f32 %v1198_v60, 0.0  ;;  %v1103_v0 = vadd.f32 %v1083_v25, %v1059_v52  ;;  %v1104_v8 = vadd.f32 %v1084_v45, %v1060_v7  ;;  %v620_v56 = vrot.slane %v2245_v37, 7  ;;  %v2285_v52 = vld [vmem:[%s2554_s17 + $0x18] sm:$0xff]   ;;  %s2211_s17 = sshll.u32 %s2432_s30, 4 }
  0x7b   : > { %v621_v51 = vrot.slane %v2246_v63, 7  ;;  %v693_v49 = vrot.slane %v2245_v37, 1  ;;  %v694_v17 = vrot.slane %v2246_v63, 1  ;;  %v809_v13 = vmul.f32 %v2245_v37, %v2670_v55  ;;  %p503_p13 = scmp.lt.s32.totalorder %s2211_s17, 31 }
  0x7c   : > { %v1229_v31 = vpack.c.bf16 %v1218_v6, %v1217_v53  ;;  %v1147_v50 = vadd.f32 %v1127_v47, %v1103_v0  ;;  %v1148_v5 = vadd.f32 %v1128_v38, %v1104_v8  ;;  %v672_v12 = vsel %vm607_vm0, 0.0, %v620_v56 }
  0x7d   : > { %v622_v11 = vsel %vm607_vm0, %v620_v56, %v621_v51  ;;  %v695_v3 = vsel %vm680_vm1, %v693_v49, %v694_v17  ;;  %v745_v62 = vsel %vm680_vm1, %v694_v17, 0.0  ;;  %v765_v18 = vmul.f32 %v2667_v54, %v672_v12  ;;  %s3707_s17 = smov (!%p503_p13, %s2211_s17), 31 }
  0x7e   : > { %2342 = vmatprep.mubr.bf16.mxu1 %v1229_v31  ;;  %v766_v34 = vmul.f32 %v2667_v54, %v622_v11  ;;  %v1173_v4 = vmul.f32 %v2826_v9, %v1147_v50  ;;  %v1174_v40 = vmul.f32 %v2826_v9, %v1148_v5  ;;  %v810_v10 = vmul.f32 %v2246_v63, %v2670_v55  ;;  %s2212_s30 = sshll.u32 %s3707_s17, 2 }
  0x7f   : > { %v853_v16 = vmul.f32 %v2715_v19, %v695_v3  ;;  %v829_v61 = vadd.f32 %v809_v13, %v765_v18  ;;  %v854_v24 = vmul.f32 %v2715_v19, %v745_v62  ;;  %v895_v22 = vmul.f32 %v2675_v57, %v672_v12  ;;  %s507_s27 = sadd.s32 %s2213_s18, %s2212_s30 }
  0x80   : > { %v896_v14 = vmul.f32 %v2675_v57, %v622_v11  ;;  %v1199_v26 = vadd.f32 %v2844_v36, %v1173_v4  ;;  %v1200_v33 = vadd.f32 %v2844_v36, %v1174_v40  ;;  %v830_v32 = vadd.f32 %v810_v10, %v766_v34  ;;  %s2214_s10 = sshll.u32 %s507_s27, 3 }
  0x81   : > { %v957_v41 = vadd.f32 %v937_v42, %v2987_v29  ;;  %v3140_v35 = vadd.f32 %v853_v16, %v829_v61  ;;  %v958_v23 = vadd.f32 %v938_v1, %v2989_v48  ;;  %v983_v25 = vmul.f32 %v2767_v27, %v695_v3  ;;  %s3287_s23 = scalar_lea.vmem %s3639_s9, %s2214_s10 }
  0x82   : > { %v984_v45 = vmul.f32 %v2767_v27, %v745_v62  ;;  %v1219_v15 = vmax.f32 %v1199_v26, 0.0  ;;  %v1220_v60 = vmax.f32 %v1200_v33, 0.0  ;;  %v3145_v47 = vadd.f32 %v854_v24, %v830_v32 }
  0x83   : > { %v1001_v38 = vadd.f32 %v3039_v21, %v957_v41  ;;  %v1002_v7 = vadd.f32 %v3042_v20, %v958_v23  ;;  %v1025_v53 = vmul.f32 %v2682_v59, %v672_v12  ;;  %v1026_v29 = vmul.f32 %v2682_v59, %v622_v11 }
  0x84   : > { %v1069_v6 = vmul.f32 %v2245_v37, %v2776_v39  ;;  %v1230_v48 = vpack.c.bf16 %v1220_v60, %v1219_v15  ;;  %v1070_v42 = vmul.f32 %v2246_v63, %v2776_v39  ;;  %v1113_v1 = vmul.f32 %v2792_v44, %v695_v3 }
  0x85   : > { %v1114_v0 = vmul.f32 %v2792_v44, %v745_v62  ;;  %v1045_v8 = vadd.f32 %v1025_v53, %v1001_v38  ;;  %v1046_v56 = vadd.f32 %v1026_v29, %v1002_v7  ;;  %v2249_v51 = vunpack.c.l.bf16 %v2285_v52 }
  0x86   : > { %v2250_v21 = vunpack.c.h.bf16 %v2285_v52  ;;  %2343 = vmatmul.mubr.bf16.gmra.mrb[4].mxu1 %v1230_v48  ;;  %v915_v20 = vadd.f32 %v895_v22, %v3049_v46  ;;  %v916_v31 = vadd.f32 %v896_v14, %v3051_v43  ;;  %v939_v49 = vmul.f32 %v2245_v37, %v2679_v58 }
  0x87   : > { %v940_v17 = vmul.f32 %v2246_v63, %v2679_v58  ;;  %v1089_v13 = vadd.f32 %v1069_v6, %v1045_v8  ;;  %v1090_v50 = vadd.f32 %v1070_v42, %v1046_v56  ;;  %v623_v5 = vrot.slane %v2249_v51, 7 }
  0x88   : > { %v624_v11 = vrot.slane %v2250_v21, 7  ;;  %v696_v12 = vrot.slane %v2249_v51, 1  ;;  %v697_v3 = vrot.slane %v2250_v21, 1  ;;  %v811_v62 = vmul.f32 %v2249_v51, %v2670_v55 }
  0x89   : > { %v812_v18 = vmul.f32 %v2250_v21, %v2670_v55  ;;  %v1133_v34 = vadd.f32 %v1113_v1, %v1089_v13  ;;  %v1134_v4 = vadd.f32 %v1114_v0, %v1090_v50  ;;  %v673_v43 = vsel %vm607_vm0, 0.0, %v623_v5 }
  0x8a   : > { %v625_v46 = vsel %vm607_vm0, %v623_v5, %v624_v11  ;;  %v698_v37 = vsel %vm680_vm1, %v696_v12, %v697_v3  ;;  %v746_v63 = vsel %vm680_vm1, %v697_v3, 0.0  ;;  %v767_v40 = vmul.f32 %v2667_v54, %v673_v43  ;;  %v3673_v5 = vld [vmem:[#allocation2_spill] sm:$0xff] }
  0x8b   : > { %v768_v10 = vmul.f32 %v2667_v54, %v625_v46  ;;  %v1159_v16 = vmul.f32 %v2826_v9, %v1133_v34  ;;  %v1160_v61 = vmul.f32 %v2826_v9, %v1134_v4  ;;  %v855_v55 = vmul.f32 %v2715_v19, %v698_v37 }
  0x8c   : > { %v856_v24 = vmul.f32 %v2715_v19, %v746_v63  ;;  %v831_v22 = vadd.f32 %v811_v62, %v767_v40  ;;  %v897_v26 = vmul.f32 %v2675_v57, %v673_v43  ;;  %v898_v33 = vmul.f32 %v2675_v57, %v625_v46  ;;  %v3674_v62 = vld [vmem:[#allocation3_spill] sm:$0xff] }
  0x8d   : > { %v832_v14 = vadd.f32 %v812_v18, %v768_v10  ;;  %v1185_v32 = vadd.f32 %v2844_v36, %v1159_v16  ;;  %v1186_v41 = vadd.f32 %v2844_v36, %v1160_v61  ;;  %v959_v23 = vadd.f32 %v939_v49, %v915_v20 }
  0x8e   : > { %v960_v54 = vadd.f32 %v940_v17, %v916_v31  ;;  %v875_v15 = vadd.f32 %v855_v55, %v831_v22  ;;  %v985_v38 = vmul.f32 %v2767_v27, %v698_v37  ;;  %v986_v52 = vmul.f32 %v2767_v27, %v746_v63 }
  0x8f   : > { %v876_v60 = vadd.f32 %v856_v24, %v832_v14  ;;  %v1205_v7 = vmax.f32 %v1185_v32, 0.0  ;;  %v1206_v19 = vmax.f32 %v1186_v41, 0.0  ;;  %v1003_v53 = vadd.f32 %v983_v25, %v959_v23 }
  0x90   : > { %v1004_v29 = vadd.f32 %v984_v45, %v960_v54  ;;  %v1027_v6 = vmul.f32 %v2682_v59, %v673_v43  ;;  %v1028_v48 = vmul.f32 %v2682_v59, %v625_v46  ;;  %v1071_v42 = vmul.f32 %v2249_v51, %v2776_v39 }
  0x91   : > { %v1072_v1 = vmul.f32 %v2250_v21, %v2776_v39  ;;  %v1223_v0 = vpack.c.bf16 %v1206_v19, %v1205_v7  ;;  %v1115_v8 = vmul.f32 %v2792_v44, %v698_v37  ;;  %v1116_v56 = vmul.f32 %v2792_v44, %v746_v63 }
  0x92   : > { %v917_v20 = vadd.f32 %v897_v26, %v3140_v35  ;;  %v1047_v31 = vadd.f32 %v1027_v6, %v1003_v53  ;;  %v1048_v49 = vadd.f32 %v1028_v48, %v1004_v29  ;;  %v918_v25 = vadd.f32 %v898_v33, %v3145_v47 }
  0x93   : > { %v941_v45 = vmul.f32 %v2249_v51, %v2679_v58  ;;  %2330 = vmatprep.mubr.bf16.mxu0 %v1223_v0  ;;  %v942_v17 = vmul.f32 %v2250_v21, %v2679_v58  ;;  %v1029_v13 = vmul.f32 %v2682_v59, %v2602_v30  ;;  %v1030_v50 = vmul.f32 %v2682_v59, %v2596_v28  ;;  %v3675_v51 = vld [vmem:[#allocation8_spill] sm:$0xff]  ;;  %v3676_v21 = vld [vmem:[#allocation10_spill] sm:$0xff]  ;;  %v3680_v0 = vld [vmem:[#allocation5_spill] sm:$0xff] }
  0x94   : > { %v1073_v11 = vmul.f32 %v3673_v5, %v2776_v39  ;;  %v1091_v12 = vadd.f32 %v1071_v42, %v1047_v31  ;;  %v1092_v35 = vadd.f32 %v1072_v1, %v1048_v49  ;;  %v1074_v47 = vmul.f32 %v3674_v62, %v2776_v39  ;;  %v3679_v42 = vld [vmem:[#allocation4_spill] sm:$0xff]  ;;  %v3681_v49 = vld [vmem:[#allocation9_spill] sm:$0xff] }
  0x95   : > { %v961_v3 = vadd.f32 %v941_v45, %v917_v20  ;;  %v962_v18 = vadd.f32 %v942_v17, %v918_v25  ;;  %v1117_v34 = vmul.f32 %v2792_v44, %v3675_v51  ;;  %v1118_v4 = vmul.f32 %v2792_v44, %v3676_v21  ;;  %v3682_v17 = vld [vmem:[#allocation11_spill] sm:$0xff] }
  0x96   : > { %v899_v46 = vmul.f32 %v2675_v57, %v2602_v30  ;;  %v1135_v43 = vadd.f32 %v1115_v8, %v1091_v12  ;;  %v1136_v37 = vadd.f32 %v1116_v56, %v1092_v35  ;;  %v900_v40 = vmul.f32 %v2675_v57, %v2596_v28 }
  0x97   : > { %v1005_v63 = vadd.f32 %v985_v38, %v961_v3  ;;  %v1006_v10 = vadd.f32 %v986_v52, %v962_v18  ;;  %v943_v61 = vmul.f32 %v3673_v5, %v2679_v58  ;;  %v944_v55 = vmul.f32 %v3674_v62, %v2679_v58  ;;  %v3677_v38 = vld [vmem:[#allocation7_spill] sm:$0xff] }
  0x98   : > { %v919_v16 = vadd.f32 %v899_v46, %v875_v15  ;;  %v1161_v24 = vmul.f32 %v2826_v9, %v1135_v43  ;;  %v1162_v22 = vmul.f32 %v2826_v9, %v1136_v37  ;;  %v920_v30 = vadd.f32 %v900_v40, %v876_v60  ;;  %v3678_v60 = vld [vmem:[#allocation6_spill] sm:$0xff] }
  0x99   : > { %v1049_v14 = vadd.f32 %v1029_v13, %v1005_v63  ;;  %v1050_v26 = vadd.f32 %v1030_v50, %v1006_v10  ;;  %v987_v32 = vmul.f32 %v2767_v27, %v3675_v51  ;;  %v988_v28 = vmul.f32 %v2767_v27, %v3676_v21  ;;  %v3240_v46 = vld [vmem:[%s3637_s7] ss:$0 sm:$0xff] }
  0x9a   : > { %v963_v33 = vadd.f32 %v943_v61, %v919_v16  ;;  %v1187_v57 = vadd.f32 %v2844_v36, %v1161_v24  ;;  %v1188_v41 = vadd.f32 %v2844_v36, %v1162_v22  ;;  %v964_v58 = vadd.f32 %v944_v55, %v920_v30 }
  0x9b   : > { %v1093_v23 = vadd.f32 %v1073_v11, %v1049_v14  ;;  %v1094_v54 = vadd.f32 %v1074_v47, %v1050_v26  ;;  %v1031_v52 = vmul.f32 %v2682_v59, %v3677_v38  ;;  %v1032_v7 = vmul.f32 %v2682_v59, %v3678_v60 }
  0x9c   : > { %v1007_v15 = vadd.f32 %v987_v32, %v963_v33  ;;  %v1207_v19 = vmax.f32 %v1187_v57, 0.0  ;;  %v1208_v53 = vmax.f32 %v1188_v41, 0.0  ;;  %v1008_v6 = vadd.f32 %v988_v28, %v964_v58 }
  0x9d   : > { %v1137_v29 = vadd.f32 %v1117_v34, %v1093_v23  ;;  %v1138_v48 = vadd.f32 %v1118_v4, %v1094_v54  ;;  %v1075_v1 = vmul.f32 %v3679_v42, %v2776_v39  ;;  %v1076_v8 = vmul.f32 %v3680_v0, %v2776_v39 }
  0x9e   : > { %v1051_v27 = vadd.f32 %v1031_v52, %v1007_v15  ;;  %v1224_v56 = vpack.c.bf16 %v1208_v53, %v1207_v19  ;;  %v1052_v31 = vadd.f32 %v1032_v7, %v1008_v6  ;;  %v1119_v25 = vmul.f32 %v2792_v44, %v3681_v49 }
  0x9f   : > { %v1163_v20 = vmul.f32 %v2826_v9, %v1137_v29  ;;  %v1164_v59 = vmul.f32 %v2826_v9, %v1138_v48  ;;  %v1120_v13 = vmul.f32 %v2792_v44, %v3682_v17 }
  0xa0   : > { %v1095_v45 = vadd.f32 %v1075_v1, %v1051_v27  ;;  %2331 = vmatmul.mubr.bf16.gmra.mrb[4].mxu0 %v1224_v56  ;;  %v1096_v5 = vadd.f32 %v1076_v8, %v1052_v31 }
  0xa1   : > { %v1189_v50 = vadd.f32 %v2844_v36, %v1163_v20  ;;  %v1190_v39 = vadd.f32 %v2844_v36, %v1164_v59 }
  0xa2   : > { %v1139_v11 = vadd.f32 %v1119_v25, %v1095_v45  ;;  %v1140_v35 = vadd.f32 %v1120_v13, %v1096_v5 }
  0xa3   : > { %v1209_v12 = vmax.f32 %v1189_v50, 0.0  ;;  %v1210_v3 = vmax.f32 %v1190_v39, 0.0 }
  0xa4   : > { %v1165_v62 = vmul.f32 %v2826_v9, %v1139_v11  ;;  %v1166_v47 = vmul.f32 %v2826_v9, %v1140_v35 }
  0xa5   : > { %v1225_v18 = vpack.c.bf16 %v1210_v3, %v1209_v12 }
  0xa6   : > { %v1191_v51 = vadd.f32 %v2844_v36, %v1165_v62  ;;  %v1192_v44 = vadd.f32 %v2844_v36, %v1166_v47  ;;  %v3246_v36 = vld [vmem:[%s3638_s8] ss:$0 sm:$0xff] }
  0xa7   : > { %2334 = vmatprep.mubr.bf16.mxu0 %v1225_v18 }
  0xa8   : > { %v1211_v34 = vmax.f32 %v1191_v51, 0.0  ;;  %v1212_v21 = vmax.f32 %v1192_v44, 0.0 }
  0xaa   : > { %v1226_v4 = vpack.c.bf16 %v1212_v21, %v1211_v34 }
  0xac   : > { %2335 = vmatmul.mubr.bf16.gmra.mrb[8].mxu0 %v1226_v4 }
 0x11c   : > { %v2340_v43 = vpop.f32.mrb[0].mxu1 }
 0x11d   : > { %v1428_v9 = vmul.f32 %v2340_v43, %v3240_v46  ;;  %v1377_v37 = vpop.f32.mrb[1].mxu1 }
 0x11e   : > { %v1426_v63 = vmul.f32 %v3240_v46, %v1377_v37  ;;  %v2341_v40 = vpop.f32.mrb[2].mxu1 }
 0x11f   : > { %v1454_v10 = vadd.f32 %v3246_v36, %v1428_v9  ;;  %v1429_v16 = vmul.f32 %v2341_v40, %v3240_v46  ;;  %v1380_v61 = vpop.f32.mrb[3].mxu1 }
 0x120   : > { %v1452_v55 = vadd.f32 %v3246_v36, %v1426_v63  ;;  %v1427_v24 = vmul.f32 %v3240_v46, %v1380_v61 }
 0x121   : > { %v1474_v22 = vmax.f32 %v1454_v10, 0.0  ;;  %v1455_v14 = vadd.f32 %v3246_v36, %v1429_v16 }
 0x122   : > { %v1472_v30 = vmax.f32 %v1452_v55, 0.0  ;;  %v1453_v26 = vadd.f32 %v3246_v36, %v1427_v24 }
 0x123   : > { %v3255_v33 = vmul.f32 0.25, %v1474_v22  ;;  %v3257_v32 = vmul.f32 0.75, %v1474_v22  ;;  %v1475_v28 = vmax.f32 %v1455_v14, 0.0 }
 0x124   : > { %v3259_v57 = vmul.f32 0.25, %v1472_v30  ;;  %v3261_v41 = vmul.f32 0.75, %v1472_v30  ;;  %v1473_v23 = vmax.f32 %v1453_v26, 0.0 }
 0x125   : > { %v3264_v58 = vmul.f32 0.25, %v1475_v28  ;;  %v3266_v54 = vmul.f32 0.75, %v1475_v28 }
 0x126   : > { %v1560_v15 = vadd.f32 %v3257_v32, %v3259_v57  ;;  %v1590_v38 = vadd.f32 %v3261_v41, %v3255_v33  ;;  %v3272_v52 = vmul.f32 0.25, %v1473_v23  ;;  %v3274_v60 = vmul.f32 0.75, %v1473_v23 }
 0x128   : > { %v1630_v7 = vrot.slane %v1560_v15, 7  ;;  %v1678_v19 = vrot.slane %v1560_v15, 1  ;;  %v1819_v53 = vrot.slane %v1590_v38, 7  ;;  %v1736_v29 = vmul.f32 0.75, %v1560_v15 }
 0x129   : > { %v1926_v6 = vmul.f32 0.75, %v1590_v38  ;;  %v1561_v48 = vadd.f32 %v3266_v54, %v3272_v52  ;;  %v1591_v27 = vadd.f32 %v3274_v60, %v3264_v58  ;;  %v1867_v0 = vrot.slane %v1590_v38, 1 }
 0x12a   : > { %v1658_v42 = vsel %vm607_vm0, %v1560_v15, %v1630_v7  ;;  %v1849_v1 = vsel %vm607_vm0, %v1590_v38, %v1819_v53 }
 0x12b   : > { %v1720_v8 = vmul.f32 0.25, %v1658_v42  ;;  %v1910_v56 = vmul.f32 0.25, %v1849_v1  ;;  %v1631_v20 = vrot.slane %v1561_v48, 7  ;;  %v1679_v31 = vrot.slane %v1561_v48, 1 }
 0x12c   : > { %v1737_v49 = vmul.f32 0.75, %v1561_v48  ;;  %v1820_v25 = vrot.slane %v1591_v27, 7  ;;  %v1868_v59 = vrot.slane %v1591_v27, 1  ;;  %v1927_v45 = vmul.f32 0.75, %v1591_v27 }
 0x12d   : > { %v1752_v17 = vadd.f32 %v1736_v29, %v1720_v8  ;;  %v1942_v13 = vadd.f32 %v1926_v6, %v1910_v56  ;;  %v1632_v50 = vsel %vm607_vm0, %v1630_v7, %v1631_v20  ;;  %v1680_v5 = vsel %vm680_vm1, %v1678_v19, %v1679_v31 }
 0x12e   : > { %v1706_v39 = vsel %vm680_vm1, %v1679_v31, %v1561_v48  ;;  %v1721_v11 = vmul.f32 0.25, %v1632_v50  ;;  %v1768_v12 = vmul.f32 0.25, %v1680_v5  ;;  %v1821_v35 = vsel %vm607_vm0, %v1819_v53, %v1820_v25 }
 0x12f   : > { %2024 = vst [vmem:[%s3287_s23 + $0x160] sm:$0xff] %v1942_v13  ;;  %2028 = vst [vmem:[%s3287_s23 + $0x180] sm:$0xff] %v1752_v17  ;;  %v1769_v3 = vmul.f32 0.25, %v1706_v39  ;;  %v1869_v62 = vsel %vm680_vm1, %v1867_v0, %v1868_v59  ;;  %v1897_v47 = vsel %vm680_vm1, %v1868_v59, %v1591_v27  ;;  %v1911_v18 = vmul.f32 0.25, %v1821_v35 }
 0x130   : > { %v1753_v51 = vadd.f32 %v1737_v49, %v1721_v11  ;;  %v1784_v44 = vadd.f32 %v1768_v12, %v1736_v29  ;;  %v1958_v34 = vmul.f32 0.25, %v1869_v62  ;;  %v1959_v21 = vmul.f32 0.25, %v1897_v47 }
 0x131   : > { %v1785_v4 = vadd.f32 %v1769_v3, %v1737_v49  ;;  %v1943_v43 = vadd.f32 %v1927_v45, %v1911_v18 }
 0x132   : > { %v1974_v9 = vadd.f32 %v1958_v34, %v1926_v6  ;;  %v1975_v37 = vadd.f32 %v1959_v21, %v1927_v45  ;;  %2029 = vst [vmem:[%s3287_s23 + $0x188] sm:$0xff] %v1784_v44  ;;  %2030 = vst [vmem:[%s3287_s23 + $0x190] sm:$0xff] %v1753_v51 }
 0x133   : > { %2026 = vst [vmem:[%s3287_s23 + $0x170] sm:$0xff] %v1943_v43  ;;  %2031 = vst [vmem:[%s3287_s23 + $0x198] sm:$0xff] %v1785_v4 }
 0x134   : > { %2025 = vst [vmem:[%s3287_s23 + $0x168] sm:$0xff] %v1974_v9  ;;  %2027 = vst [vmem:[%s3287_s23 + $0x178] sm:$0xff] %v1975_v37 }
 0x144   : > { %v2328_v63 = vpop.f32.mrb[0].mxu0 }
 0x145   : > { %v1416_v40 = vmul.f32 %v2328_v63, %v3240_v46  ;;  %v1329_v10 = vpop.f32.mrb[1].mxu0 }
 0x146   : > { %v1414_v16 = vmul.f32 %v3240_v46, %v1329_v10  ;;  %v2329_v61 = vpop.f32.mrb[2].mxu0 }
 0x147   : > { %v1442_v55 = vadd.f32 %v3246_v36, %v1416_v40  ;;  %v1417_v24 = vmul.f32 %v2329_v61, %v3240_v46  ;;  %v1332_v22 = vpop.f32.mrb[3].mxu0 }
 0x148   : > { %v1440_v14 = vadd.f32 %v3246_v36, %v1414_v16  ;;  %v1415_v30 = vmul.f32 %v3240_v46, %v1332_v22 }
 0x149   : > { %v3307_v26 = vmax.f32 %v1442_v55, 0.0  ;;  %v1443_v28 = vadd.f32 %v3246_v36, %v1417_v24 }
 0x14a   : > { %v1460_v23 = vmax.f32 %v1440_v14, 0.0  ;;  %v1441_v15 = vadd.f32 %v3246_v36, %v1415_v30 }
 0x14b   : > { %v3311_v38 = vmax.f32 %v1443_v28, 0.0  ;;  %v3317_v29 = vmul.f32 0.75, %v3307_v26 }
 0x14c   : > { %v1482_v19 = vsel %vm2874_vm2, %v3307_v26, %v1460_v23  ;;  %v1461_v53 = vmax.f32 %v1441_v15, 0.0 }
 0x14d   : > { %v1516_v6 = vmul.f32 0.25, %v1482_v19  ;;  %v3324_v42 = vmul.f32 0.75, %v3311_v38 }
 0x14e   : > { %v1483_v48 = vsel %vm2874_vm2, %v3311_v38, %v1461_v53 }
 0x14f   : > { %v1548_v27 = vadd.f32 %v3317_v29, %v1516_v6  ;;  %v1517_v1 = vmul.f32 0.25, %v1483_v48 }
 0x151   : > { %v1612_v0 = vrot.slane %v1548_v27, 7  ;;  %v1549_v8 = vadd.f32 %v3324_v42, %v1517_v1  ;;  %v1660_v20 = vrot.slane %v1548_v27, 1  ;;  %v1724_v59 = vmul.f32 0.75, %v1548_v27 }
 0x153   : > { %v1652_v56 = vsel %vm607_vm0, %v1548_v27, %v1612_v0  ;;  %v1613_v31 = vrot.slane %v1549_v8, 7  ;;  %v1661_v49 = vrot.slane %v1549_v8, 1  ;;  %v1725_v50 = vmul.f32 0.75, %v1549_v8 }
 0x154   : > { %v1708_v25 = vmul.f32 0.25, %v1652_v56 }
 0x155   : > { %v1614_v45 = vsel %vm607_vm0, %v1612_v0, %v1613_v31  ;;  %v1662_v17 = vsel %vm680_vm1, %v1660_v20, %v1661_v49  ;;  %v1700_v13 = vsel %vm680_vm1, %v1661_v49, %v1549_v8 }
 0x156   : > { %v1740_v5 = vadd.f32 %v1724_v59, %v1708_v25  ;;  %v1709_v39 = vmul.f32 0.25, %v1614_v45  ;;  %v1756_v11 = vmul.f32 0.25, %v1662_v17  ;;  %v1757_v12 = vmul.f32 0.25, %v1700_v13 }
 0x158   : > { %1980 = vst [vmem:[%s3287_s23] sm:$0xff] %v1740_v5  ;;  %v1741_v35 = vadd.f32 %v1725_v50, %v1709_v39  ;;  %v1772_v3 = vadd.f32 %v1756_v11, %v1724_v59  ;;  %v1773_v62 = vadd.f32 %v1757_v12, %v1725_v50 }
 0x159   : > { %v2344_v47 = vpop.f32.mrb[4].mxu1 }
 0x15a   : > { %1981 = vst [vmem:[%s3287_s23 + $0x8] sm:$0xff] %v1772_v3  ;;  %1982 = vst [vmem:[%s3287_s23 + $0x10] sm:$0xff] %v1741_v35  ;;  %v1432_v18 = vmul.f32 %v2344_v47, %v3240_v46  ;;  %v1393_v51 = vpop.f32.mrb[5].mxu1 }
 0x15b   : > { %1983 = vst [vmem:[%s3287_s23 + $0x18] sm:$0xff] %v1773_v62  ;;  %v1430_v44 = vmul.f32 %v3240_v46, %v1393_v51  ;;  %v2345_v34 = vpop.f32.mrb[6].mxu1 }
 0x15c   : > { %v1458_v21 = vadd.f32 %v3246_v36, %v1432_v18  ;;  %v1433_v4 = vmul.f32 %v2345_v34, %v3240_v46  ;;  %v1396_v43 = vpop.f32.mrb[7].mxu1 }
 0x15d   : > { %v1456_v9 = vadd.f32 %v3246_v36, %v1430_v44  ;;  %v1431_v37 = vmul.f32 %v3240_v46, %v1396_v43 }
 0x15e   : > { %v1478_v63 = vmax.f32 %v1458_v21, 0.0  ;;  %v1459_v40 = vadd.f32 %v3246_v36, %v1433_v4 }
 0x15f   : > { %v1476_v10 = vmax.f32 %v1456_v9, 0.0  ;;  %v1457_v16 = vadd.f32 %v3246_v36, %v1431_v37 }
 0x160   : > { %v1479_v61 = vmax.f32 %v1459_v40, 0.0 }
 0x161   : > { %v1514_v55 = vsel %vm3063_vm3, %v1476_v10, %v1478_v63  ;;  %v1546_v24 = vmul.f32 0.75, %v1476_v10  ;;  %v1576_v22 = vmul.f32 0.25, %v1476_v10  ;;  %v1477_v14 = vmax.f32 %v1457_v16, 0.0 }
 0x162   : > { %v1578_v30 = vmul.f32 0.25, %v1514_v55 }
 0x163   : > { %v1562_v28 = vadd.f32 %v1546_v24, %v3255_v33  ;;  %v1592_v23 = vadd.f32 %v1576_v22, %v3257_v32  ;;  %v1515_v15 = vsel %vm3063_vm3, %v1477_v14, %v1479_v61  ;;  %v1547_v7 = vmul.f32 0.75, %v1477_v14 }
 0x164   : > { %v1594_v19 = vadd.f32 %v1578_v30, %v1546_v24  ;;  %v1577_v53 = vmul.f32 0.25, %v1477_v14  ;;  %v1579_v6 = vmul.f32 0.25, %v1515_v15 }
 0x165   : > { %v1633_v48 = vrot.slane %v1562_v28, 7  ;;  %v1681_v27 = vrot.slane %v1562_v28, 1  ;;  %v1738_v1 = vmul.f32 0.75, %v1562_v28  ;;  %v1822_v0 = vrot.slane %v1592_v23, 7 }
 0x166   : > { %v1825_v8 = vrot.slane %v1594_v19, 7  ;;  %v1870_v56 = vrot.slane %v1592_v23, 1  ;;  %v1873_v20 = vrot.slane %v1594_v19, 1  ;;  %v1928_v31 = vmul.f32 0.75, %v1592_v23 }
 0x167   : > { %v1659_v49 = vsel %vm607_vm0, %v1562_v28, %v1633_v48  ;;  %v1850_v33 = vsel %vm607_vm0, %v1592_v23, %v1822_v0  ;;  %v1930_v32 = vmul.f32 0.75, %v1594_v19  ;;  %v1563_v2 = vadd.f32 %v1547_v7, %v3264_v58 }
 0x168   : > { %v1722_v25 = vmul.f32 0.25, %v1659_v49  ;;  %v1851_v59 = vsel %vm607_vm0, %v1594_v19, %v1825_v8  ;;  %v1912_v45 = vmul.f32 0.25, %v1850_v33  ;;  %v1593_v17 = vadd.f32 %v1577_v53, %v3266_v54 }
 0x169   : > { %v1914_v13 = vmul.f32 0.25, %v1851_v59  ;;  %v1595_v50 = vadd.f32 %v1579_v6, %v1547_v7  ;;  %v1634_v5 = vrot.slane %v1563_v2, 7  ;;  %v1682_v39 = vrot.slane %v1563_v2, 1 }
 0x16a   : > { %v1754_v11 = vadd.f32 %v1738_v1, %v1722_v25  ;;  %v1944_v12 = vadd.f32 %v1928_v31, %v1912_v45  ;;  %v1739_v35 = vmul.f32 0.75, %v1563_v2  ;;  %v1823_v3 = vrot.slane %v1593_v17, 7 }
 0x16b   : > { %v1946_v62 = vadd.f32 %v1930_v32, %v1914_v13  ;;  %v1635_v58 = vsel %vm607_vm0, %v1633_v48, %v1634_v5  ;;  %v1683_v47 = vsel %vm680_vm1, %v1681_v27, %v1682_v39  ;;  %v1707_v18 = vsel %vm680_vm1, %v1682_v39, %v1563_v2 }
 0x16c   : > { %2032 = vst [vmem:[%s3287_s23 + $0x1a0] sm:$0xff] %v1944_v12  ;;  %2036 = vst [vmem:[%s3287_s23 + $0x1c0] sm:$0xff] %v1754_v11  ;;  %v1723_v51 = vmul.f32 0.25, %v1635_v58  ;;  %v1770_v54 = vmul.f32 0.25, %v1683_v47  ;;  %v1771_v44 = vmul.f32 0.25, %v1707_v18  ;;  %v1824_v34 = vsel %vm607_vm0, %v1822_v0, %v1823_v3 }
 0x16d   : > { %2040 = vst [vmem:[%s3287_s23 + $0x1e0] sm:$0xff] %v1946_v62  ;;  %v1826_v21 = vrot.slane %v1595_v50, 7  ;;  %v1871_v4 = vrot.slane %v1593_v17, 1  ;;  %v1874_v43 = vrot.slane %v1595_v50, 1  ;;  %v1913_v9 = vmul.f32 0.25, %v1824_v34 }
 0x16e   : > { %v1755_v37 = vadd.f32 %v1739_v35, %v1723_v51  ;;  %v1786_v63 = vadd.f32 %v1770_v54, %v1738_v1  ;;  %v1787_v40 = vadd.f32 %v1771_v44, %v1739_v35  ;;  %v1929_v10 = vmul.f32 0.75, %v1593_v17 }
 0x16f   : > { %v1827_v16 = vsel %vm607_vm0, %v1825_v8, %v1826_v21  ;;  %v1872_v61 = vsel %vm680_vm1, %v1870_v56, %v1871_v4  ;;  %v1875_v55 = vsel %vm680_vm1, %v1873_v20, %v1874_v43  ;;  %v1898_v24 = vsel %vm680_vm1, %v1871_v4, %v1593_v17 }
 0x170   : > { %v1899_v22 = vsel %vm680_vm1, %v1874_v43, %v1595_v50  ;;  %v1915_v14 = vmul.f32 0.25, %v1827_v16  ;;  %v1931_v30 = vmul.f32 0.75, %v1595_v50  ;;  %v1945_v28 = vadd.f32 %v1929_v10, %v1913_v9  ;;  %2037 = vst [vmem:[%s3287_s23 + $0x1c8] sm:$0xff] %v1786_v63  ;;  %2038 = vst [vmem:[%s3287_s23 + $0x1d0] sm:$0xff] %v1755_v37 }
 0x171   : > { %2039 = vst [vmem:[%s3287_s23 + $0x1d8] sm:$0xff] %v1787_v40  ;;  %v1960_v23 = vmul.f32 0.25, %v1872_v61  ;;  %v1961_v15 = vmul.f32 0.25, %v1898_v24  ;;  %v1962_v7 = vmul.f32 0.25, %v1875_v55  ;;  %v1963_v19 = vmul.f32 0.25, %v1899_v22 }
 0x172   : > { %v1947_v53 = vadd.f32 %v1931_v30, %v1915_v14  ;;  %2034 = vst [vmem:[%s3287_s23 + $0x1b0] sm:$0xff] %v1945_v28  ;;  %v1518_v11 = vmul.f32 0.25, %v3307_v26  ;;  %v1519_v62 = vmul.f32 0.25, %v3311_v38 }
 0x173   : > { %v1976_v6 = vadd.f32 %v1960_v23, %v1928_v31  ;;  %v1977_v48 = vadd.f32 %v1961_v15, %v1929_v10  ;;  %v1978_v27 = vadd.f32 %v1962_v7, %v1930_v32  ;;  %v1979_v1 = vadd.f32 %v1963_v19, %v1931_v30  ;;  %v2332_v0 = vpop.f32.mrb[4].mxu0 }
 0x174   : > { %2042 = vst [vmem:[%s3287_s23 + $0x1f0] sm:$0xff] %v1947_v53  ;;  %v1420_v8 = vmul.f32 %v2332_v0, %v3240_v46  ;;  %v1345_v56 = vpop.f32.mrb[5].mxu0 }
 0x175   : > { %2033 = vst [vmem:[%s3287_s23 + $0x1a8] sm:$0xff] %v1976_v6  ;;  %2035 = vst [vmem:[%s3287_s23 + $0x1b8] sm:$0xff] %v1977_v48  ;;  %v1418_v20 = vmul.f32 %v3240_v46, %v1345_v56  ;;  %v2333_v49 = vpop.f32.mrb[6].mxu0 }
 0x176   : > { %2041 = vst [vmem:[%s3287_s23 + $0x1e8] sm:$0xff] %v1978_v27  ;;  %2043 = vst [vmem:[%s3287_s23 + $0x1f8] sm:$0xff] %v1979_v1  ;;  %v1446_v33 = vadd.f32 %v3246_v36, %v1420_v8  ;;  %v1421_v2 = vmul.f32 %v2333_v49, %v3240_v46  ;;  %v1348_v31 = vpop.f32.mrb[7].mxu0 }
 0x177   : > { %v1444_v32 = vadd.f32 %v3246_v36, %v1418_v20  ;;  %v1419_v25 = vmul.f32 %v3240_v46, %v1348_v31 }
 0x178   : > { %v1466_v59 = vmax.f32 %v1446_v33, 0.0  ;;  %v1447_v45 = vadd.f32 %v3246_v36, %v1421_v2 }
 0x179   : > { %v1464_v17 = vmax.f32 %v1444_v32, 0.0  ;;  %v1445_v13 = vadd.f32 %v3246_v36, %v1419_v25 }
 0x17a   : > { %v3383_v50 = vmul.f32 0.25, %v1466_v59  ;;  %v3385_v5 = vmul.f32 0.75, %v1466_v59  ;;  %v1467_v39 = vmax.f32 %v1447_v45, 0.0 }
 0x17b   : > { %v1520_v12 = vmul.f32 0.25, %v1464_v17  ;;  %v1534_v35 = vmul.f32 0.75, %v1464_v17  ;;  %v1465_v3 = vmax.f32 %v1445_v13, 0.0 }
 0x17c   : > { %v3396_v54 = vmul.f32 0.25, %v1467_v39  ;;  %v3398_v44 = vmul.f32 0.75, %v1467_v39 }
 0x17d   : > { %v1550_v58 = vadd.f32 %v1534_v35, %v1518_v11  ;;  %v1552_v47 = vadd.f32 %v3385_v5, %v1520_v12  ;;  %v3391_v18 = vadd.f32 %v3317_v29, %v1520_v12  ;;  %v3394_v51 = vadd.f32 %v1534_v35, %v3383_v50 }
 0x17e   : > { %v1521_v34 = vmul.f32 0.25, %v1465_v3  ;;  %v1535_v26 = vmul.f32 0.75, %v1465_v3 }
 0x17f   : > { %v1615_v21 = vrot.slane %v1550_v58, 7  ;;  %v1618_v4 = vrot.slane %v1552_v47, 7  ;;  %v1663_v43 = vrot.slane %v1550_v58, 1  ;;  %v1666_v9 = vrot.slane %v1552_v47, 1  ;;  %v3400_v38 = vpop.f32.mrb[8].mxu0 }
 0x180   : > { %v1726_v37 = vmul.f32 0.75, %v1550_v58  ;;  %v1728_v63 = vmul.f32 0.75, %v1552_v47  ;;  %v1804_v29 = vrot.slane %v3391_v18, 7  ;;  %v1807_v40 = vrot.slane %v3394_v51, 7  ;;  %v3404_v10 = vpop.f32.mrb[9].mxu0 }
 0x181   : > { %v1653_v16 = vsel %vm607_vm0, %v1550_v58, %v1615_v21  ;;  %v1654_v61 = vsel %vm607_vm0, %v1552_v47, %v1618_v4  ;;  %v1852_v55 = vrot.slane %v3391_v18, 1  ;;  %v1855_v24 = vrot.slane %v3394_v51, 1  ;;  %v3410_v22 = vpop.f32.mrb[10].mxu0 }
 0x182   : > { %v1710_v14 = vmul.f32 0.25, %v1653_v16  ;;  %v1712_v30 = vmul.f32 0.25, %v1654_v61  ;;  %v1844_v28 = vsel %vm607_vm0, %v3391_v18, %v1804_v29  ;;  %v1845_v23 = vsel %vm607_vm0, %v3394_v51, %v1807_v40  ;;  %v3416_v15 = vpop.f32.mrb[11].mxu0 }
 0x183   : > { %v1900_v7 = vmul.f32 0.25, %v1844_v28  ;;  %v1902_v19 = vmul.f32 0.25, %v1845_v23  ;;  %v3419_v53 = vmul.f32 0.75, %v3391_v18  ;;  %v3422_v6 = vmul.f32 0.75, %v3394_v51 }
 0x184   : > { %v1742_v48 = vadd.f32 %v1726_v37, %v1710_v14  ;;  %v1744_v27 = vadd.f32 %v1728_v63, %v1712_v30  ;;  %v1551_v1 = vadd.f32 %v1535_v26, %v1519_v62  ;;  %v1553_v0 = vadd.f32 %v3398_v44, %v1521_v34 }
 0x185   : > { %v1932_v8 = vadd.f32 %v3419_v53, %v1900_v7  ;;  %v1934_v56 = vadd.f32 %v3422_v6, %v1902_v19  ;;  %v1581_v20 = vadd.f32 %v3324_v42, %v1521_v34  ;;  %v1583_v49 = vadd.f32 %v1535_v26, %v3396_v54 }
 0x186   : > { %1988 = vst [vmem:[%s3287_s23 + $0x40] sm:$0xff] %v1742_v48  ;;  %1996 = vst [vmem:[%s3287_s23 + $0x80] sm:$0xff] %v1744_v27  ;;  %v1616_v33 = vrot.slane %v1551_v1, 7  ;;  %v1619_v2 = vrot.slane %v1553_v0, 7  ;;  %v1664_v31 = vrot.slane %v1551_v1, 1  ;;  %v1667_v32 = vrot.slane %v1553_v0, 1 }
 0x187   : > { %1984 = vst [vmem:[%s3287_s23 + $0x20] sm:$0xff] %v1932_v8  ;;  %1992 = vst [vmem:[%s3287_s23 + $0x60] sm:$0xff] %v1934_v56  ;;  %v1727_v25 = vmul.f32 0.75, %v1551_v1  ;;  %v1729_v59 = vmul.f32 0.75, %v1553_v0  ;;  %v1805_v45 = vrot.slane %v1581_v20, 7  ;;  %v1808_v17 = vrot.slane %v1583_v49, 7 }
 0x188   : > { %v1617_v13 = vsel %vm607_vm0, %v1615_v21, %v1616_v33  ;;  %v1620_v39 = vsel %vm607_vm0, %v1618_v4, %v1619_v2  ;;  %v1665_v42 = vsel %vm680_vm1, %v1663_v43, %v1664_v31  ;;  %v1668_v11 = vsel %vm680_vm1, %v1666_v9, %v1667_v32 }
 0x189   : > { %v1701_v12 = vsel %vm680_vm1, %v1664_v31, %v1551_v1  ;;  %v1702_v35 = vsel %vm680_vm1, %v1667_v32, %v1553_v0  ;;  %v1711_v3 = vmul.f32 0.25, %v1617_v13  ;;  %v1713_v62 = vmul.f32 0.25, %v1620_v39 }
 0x18a   : > { %v1758_v58 = vmul.f32 0.25, %v1665_v42  ;;  %v1759_v47 = vmul.f32 0.25, %v1701_v12  ;;  %v1760_v34 = vmul.f32 0.25, %v1668_v11  ;;  %v1761_v26 = vmul.f32 0.25, %v1702_v35 }
 0x18b   : > { %v1743_v16 = vadd.f32 %v1727_v25, %v1711_v3  ;;  %v1745_v21 = vadd.f32 %v1729_v59, %v1713_v62  ;;  %v1806_v4 = vsel %vm607_vm0, %v1804_v29, %v1805_v45  ;;  %v1809_v43 = vsel %vm607_vm0, %v1807_v40, %v1808_v17 }
 0x18c   : > { %v1774_v9 = vadd.f32 %v1758_v58, %v1726_v37  ;;  %v1775_v61 = vadd.f32 %v1759_v47, %v1727_v25  ;;  %v1776_v14 = vadd.f32 %v1760_v34, %v1728_v63  ;;  %v1777_v30 = vadd.f32 %v1761_v26, %v1729_v59 }
 0x18d   : > { %v1853_v28 = vrot.slane %v1581_v20, 1  ;;  %v1856_v23 = vrot.slane %v1583_v49, 1  ;;  %v1901_v7 = vmul.f32 0.25, %v1806_v4  ;;  %v1903_v19 = vmul.f32 0.25, %v1809_v43  ;;  %1990 = vst [vmem:[%s3287_s23 + $0x50] sm:$0xff] %v1743_v16  ;;  %1998 = vst [vmem:[%s3287_s23 + $0x90] sm:$0xff] %v1745_v21 }
 0x18e   : > { %v1917_v48 = vmul.f32 0.75, %v1581_v20  ;;  %v1919_v27 = vmul.f32 0.75, %v1583_v49  ;;  %1989 = vst [vmem:[%s3287_s23 + $0x48] sm:$0xff] %v1774_v9  ;;  %1991 = vst [vmem:[%s3287_s23 + $0x58] sm:$0xff] %v1775_v61  ;;  %v1424_v29 = vmul.f32 %v3400_v38, %v3240_v46  ;;  %v1422_v37 = vmul.f32 %v3240_v46, %v3404_v10 }
 0x18f   : > { %1997 = vst [vmem:[%s3287_s23 + $0x88] sm:$0xff] %v1776_v14  ;;  %1999 = vst [vmem:[%s3287_s23 + $0x98] sm:$0xff] %v1777_v30  ;;  %v1854_v63 = vsel %vm680_vm1, %v1852_v55, %v1853_v28  ;;  %v1857_v40 = vsel %vm680_vm1, %v1855_v24, %v1856_v23  ;;  %v1892_v1 = vsel %vm680_vm1, %v1853_v28, %v1581_v20 }
 0x190   : > { %v1893_v0 = vsel %vm680_vm1, %v1856_v23, %v1583_v49  ;;  %v1933_v8 = vadd.f32 %v1917_v48, %v1901_v7  ;;  %v1935_v56 = vadd.f32 %v1919_v27, %v1903_v19  ;;  %v1948_v38 = vmul.f32 0.25, %v1854_v63 }
 0x191   : > { %v1949_v33 = vmul.f32 0.25, %v1892_v1  ;;  %v1950_v10 = vmul.f32 0.25, %v1857_v40  ;;  %v1951_v2 = vmul.f32 0.25, %v1893_v0  ;;  %v1450_v18 = vadd.f32 %v3246_v36, %v1424_v29 }
 0x192   : > { %v1448_v55 = vadd.f32 %v3246_v36, %v1422_v37  ;;  %v1964_v51 = vadd.f32 %v1948_v38, %v3419_v53  ;;  %1986 = vst [vmem:[%s3287_s23 + $0x30] sm:$0xff] %v1933_v8  ;;  %1994 = vst [vmem:[%s3287_s23 + $0x70] sm:$0xff] %v1935_v56  ;;  %v1425_v20 = vmul.f32 %v3410_v22, %v3240_v46 }
 0x193   : > { %v1965_v24 = vadd.f32 %v1949_v33, %v1917_v48  ;;  %v1423_v49 = vmul.f32 %v3240_v46, %v3416_v15  ;;  %v1966_v31 = vadd.f32 %v1950_v10, %v3422_v6  ;;  %v1967_v32 = vadd.f32 %v1951_v2, %v1919_v27 }
 0x194   : > { %v1470_v25 = vmax.f32 %v1450_v18, 0.0  ;;  %v1468_v59 = vmax.f32 %v1448_v55, 0.0  ;;  %1985 = vst [vmem:[%s3287_s23 + $0x28] sm:$0xff] %v1964_v51  ;;  %v1451_v45 = vadd.f32 %v3246_v36, %v1425_v20 }
 0x195   : > { %1987 = vst [vmem:[%s3287_s23 + $0x38] sm:$0xff] %v1965_v24  ;;  %v1449_v53 = vadd.f32 %v3246_v36, %v1423_v49  ;;  %1993 = vst [vmem:[%s3287_s23 + $0x68] sm:$0xff] %v1966_v31 }
 0x196   : > { %1995 = vst [vmem:[%s3287_s23 + $0x78] sm:$0xff] %v1967_v32  ;;  %v1526_v17 = vmul.f32 0.25, %v1470_v25  ;;  %v1540_v13 = vmul.f32 0.75, %v1470_v25  ;;  %v1524_v39 = vmul.f32 0.25, %v1468_v59  ;;  %v1538_v22 = vmul.f32 0.75, %v1468_v59 }
 0x197   : > { %v1471_v42 = vmax.f32 %v1451_v45, 0.0  ;;  %v1469_v35 = vmax.f32 %v1449_v53, 0.0 }
 0x198   : > { %v3476_v46 = vadd.f32 %v3261_v41, %v1526_v17  ;;  %v3479_v15 = vadd.f32 %v1540_v13, %v3259_v57  ;;  %v3482_v6 = vadd.f32 %v1538_v22, %v3383_v50  ;;  %v3484_v11 = vadd.f32 %v1540_v13, %v1524_v39 }
 0x199   : > { %v3487_v36 = vadd.f32 %v3385_v5, %v1524_v39  ;;  %v3489_v12 = vadd.f32 %v1538_v22, %v1526_v17  ;;  %v3493_v41 = vmul.f32 0.25, %v1471_v42  ;;  %v1541_v58 = vmul.f32 0.75, %v1471_v42 }
 0x19a   : > { %v1627_v3 = vrot.slane %v3476_v46, 7  ;;  %v1816_v62 = vrot.slane %v3479_v15, 7  ;;  %v1675_v57 = vrot.slane %v3476_v46, 1  ;;  %v1734_v50 = vmul.f32 0.75, %v3476_v46 }
 0x19b   : > { %v1621_v47 = vrot.slane %v3482_v6, 7  ;;  %v1624_v34 = vrot.slane %v3484_v11, 7  ;;  %v1864_v16 = vrot.slane %v3479_v15, 1  ;;  %v3505_v21 = vmul.f32 0.75, %v3479_v15 }
 0x19c   : > { %v1657_v5 = vsel %vm607_vm0, %v3476_v46, %v1627_v3  ;;  %v1848_v26 = vsel %vm607_vm0, %v3479_v15, %v1816_v62  ;;  %v3516_v28 = vmul.f32 0.75, %v3482_v6  ;;  %v3519_v23 = vmul.f32 0.75, %v3484_v11 }
 0x19d   : > { %v1718_v4 = vmul.f32 0.25, %v1657_v5  ;;  %v1908_v43 = vmul.f32 0.25, %v1848_v26  ;;  %v1655_v9 = vsel %vm607_vm0, %v3482_v6, %v1621_v47  ;;  %v1656_v61 = vsel %vm607_vm0, %v3484_v11, %v1624_v34 }
 0x19e   : > { %v1714_v14 = vmul.f32 0.25, %v1655_v9  ;;  %v1716_v30 = vmul.f32 0.25, %v1656_v61  ;;  %v1810_v48 = vrot.slane %v3487_v36, 7  ;;  %v1813_v27 = vrot.slane %v3489_v12, 7 }
 0x19f   : > { %v1750_v7 = vadd.f32 %v1734_v50, %v1718_v4  ;;  %v1940_v19 = vadd.f32 %v3505_v21, %v1908_v43  ;;  %v1669_v29 = vrot.slane %v3482_v6, 1  ;;  %v1672_v37 = vrot.slane %v3484_v11, 1 }
 0x1a0   : > { %v1746_v63 = vadd.f32 %v3516_v28, %v1714_v14  ;;  %v1748_v40 = vadd.f32 %v3519_v23, %v1716_v30  ;;  %v1846_v1 = vsel %vm607_vm0, %v3487_v36, %v1810_v48  ;;  %v1847_v0 = vsel %vm607_vm0, %v3489_v12, %v1813_v27 }
 0x1a1   : > { %2016 = vst [vmem:[%s3287_s23 + $0x120] sm:$0xff] %v1940_v19  ;;  %2020 = vst [vmem:[%s3287_s23 + $0x140] sm:$0xff] %v1750_v7  ;;  %v3539_v8 = vmul.f32 0.75, %v3487_v36  ;;  %v3542_v56 = vmul.f32 0.75, %v3489_v12  ;;  %v1904_v38 = vmul.f32 0.25, %v1846_v1  ;;  %v1906_v33 = vmul.f32 0.25, %v1847_v0 }
 0x1a2   : > { %2004 = vst [vmem:[%s3287_s23 + $0xc0] sm:$0xff] %v1746_v63  ;;  %2012 = vst [vmem:[%s3287_s23 + $0x100] sm:$0xff] %v1748_v40  ;;  %v1559_v10 = vadd.f32 %v3274_v60, %v3493_v41  ;;  %v1589_v2 = vadd.f32 %v1541_v58, %v3272_v52  ;;  %v1858_v18 = vrot.slane %v3487_v36, 1  ;;  %v1861_v55 = vrot.slane %v3489_v12, 1 }
 0x1a3   : > { %v1525_v51 = vmul.f32 0.25, %v1469_v35  ;;  %v1539_v24 = vmul.f32 0.75, %v1469_v35  ;;  %v1936_v20 = vadd.f32 %v3539_v8, %v1904_v38  ;;  %v1938_v49 = vadd.f32 %v3542_v56, %v1906_v33 }
 0x1a4   : > { %v1628_v31 = vrot.slane %v1559_v10, 7  ;;  %v1676_v32 = vrot.slane %v1559_v10, 1  ;;  %v1735_v25 = vmul.f32 0.75, %v1559_v10  ;;  %v1817_v59 = vrot.slane %v1589_v2, 7 }
 0x1a5   : > { %v1865_v45 = vrot.slane %v1589_v2, 1  ;;  %v1925_v53 = vmul.f32 0.75, %v1589_v2  ;;  %2000 = vst [vmem:[%s3287_s23 + $0xa0] sm:$0xff] %v1936_v20  ;;  %2008 = vst [vmem:[%s3287_s23 + $0xe0] sm:$0xff] %v1938_v49  ;;  %v1555_v13 = vadd.f32 %v1539_v24, %v3396_v54  ;;  %v1585_v61 = vadd.f32 %v3398_v44, %v1525_v51 }
 0x1a6   : > { %v1629_v52 = vsel %vm607_vm0, %v1627_v3, %v1628_v31  ;;  %v1677_v60 = vsel %vm680_vm1, %v1675_v57, %v1676_v32  ;;  %v1705_v17 = vsel %vm680_vm1, %v1676_v32, %v1559_v10  ;;  %v1818_v46 = vsel %vm607_vm0, %v1816_v62, %v1817_v59 }
 0x1a7   : > { %v1719_v39 = vmul.f32 0.25, %v1629_v52  ;;  %v1766_v22 = vmul.f32 0.25, %v1677_v60  ;;  %v1767_v42 = vmul.f32 0.25, %v1705_v17  ;;  %v1866_v15 = vsel %vm680_vm1, %v1864_v16, %v1865_v45 }
 0x1a8   : > { %v1896_v35 = vsel %vm680_vm1, %v1865_v45, %v1589_v2  ;;  %v1909_v5 = vmul.f32 0.25, %v1818_v46  ;;  %v1557_v3 = vadd.f32 %v1541_v58, %v1525_v51  ;;  %v1956_v43 = vmul.f32 0.25, %v1866_v15 }
 0x1a9   : > { %v1751_v26 = vadd.f32 %v1735_v25, %v1719_v39  ;;  %v1782_v57 = vadd.f32 %v1766_v22, %v1734_v50  ;;  %v1783_v4 = vadd.f32 %v1767_v42, %v1735_v25  ;;  %v1957_v9 = vmul.f32 0.25, %v1896_v35 }
 0x1aa   : > { %v1941_v54 = vadd.f32 %v1925_v53, %v1909_v5  ;;  %v1587_v14 = vadd.f32 %v1539_v24, %v3493_v41  ;;  %v1972_v62 = vadd.f32 %v1956_v43, %v3505_v21  ;;  %v1622_v16 = vrot.slane %v1555_v13, 7 }
 0x1ab   : > { %2021 = vst [vmem:[%s3287_s23 + $0x148] sm:$0xff] %v1782_v57  ;;  %2022 = vst [vmem:[%s3287_s23 + $0x150] sm:$0xff] %v1751_v26  ;;  %v1625_v58 = vrot.slane %v1557_v3, 7  ;;  %v1670_v30 = vrot.slane %v1555_v13, 1  ;;  %v1973_v7 = vadd.f32 %v1957_v9, %v1925_v53  ;;  %v1673_v50 = vrot.slane %v1557_v3, 1 }
 0x1ac   : > { %2023 = vst [vmem:[%s3287_s23 + $0x158] sm:$0xff] %v1783_v4  ;;  %2018 = vst [vmem:[%s3287_s23 + $0x130] sm:$0xff] %v1941_v54  ;;  %v1731_v19 = vmul.f32 0.75, %v1555_v13  ;;  %v1733_v63 = vmul.f32 0.75, %v1557_v3  ;;  %v1623_v44 = vsel %vm607_vm0, %v1621_v47, %v1622_v16  ;;  %v1814_v24 = vrot.slane %v1587_v14, 7 }
 0x1ad   : > { %2017 = vst [vmem:[%s3287_s23 + $0x128] sm:$0xff] %v1972_v62  ;;  %v1626_v41 = vsel %vm607_vm0, %v1624_v34, %v1625_v58  ;;  %v1671_v21 = vsel %vm680_vm1, %v1669_v29, %v1670_v30  ;;  %v1703_v40 = vsel %vm680_vm1, %v1670_v30, %v1555_v13  ;;  %2019 = vst [vmem:[%s3287_s23 + $0x138] sm:$0xff] %v1973_v7  ;;  %v1715_v38 = vmul.f32 0.25, %v1623_v44 }
 0x1ae   : > { %v1674_v1 = vsel %vm680_vm1, %v1672_v37, %v1673_v50  ;;  %v1704_v0 = vsel %vm680_vm1, %v1673_v50, %v1557_v3  ;;  %v1717_v33 = vmul.f32 0.25, %v1626_v41  ;;  %v1762_v47 = vmul.f32 0.25, %v1671_v21 }
 0x1af   : > { %v1763_v10 = vmul.f32 0.25, %v1703_v40  ;;  %v1764_v34 = vmul.f32 0.25, %v1674_v1  ;;  %v1765_v2 = vmul.f32 0.25, %v1704_v0  ;;  %v1747_v6 = vadd.f32 %v1731_v19, %v1715_v38 }
 0x1b0   : > { %v1749_v51 = vadd.f32 %v1733_v63, %v1717_v33  ;;  %v1811_v29 = vrot.slane %v1585_v61, 7  ;;  %v1778_v11 = vadd.f32 %v1762_v47, %v3516_v28  ;;  %v1815_v32 = vsel %vm607_vm0, %v1813_v27, %v1814_v24 }
 0x1b1   : > { %v1779_v37 = vadd.f32 %v1763_v10, %v1731_v19  ;;  %v1780_v20 = vadd.f32 %v1764_v34, %v3519_v23  ;;  %v1781_v49 = vadd.f32 %v1765_v2, %v1733_v63  ;;  %v1859_v25 = vrot.slane %v1585_v61, 1  ;;  %2006 = vst [vmem:[%s3287_s23 + $0xd0] sm:$0xff] %v1747_v6 }
 0x1b2   : > { %v1812_v31 = vsel %vm607_vm0, %v1810_v48, %v1811_v29  ;;  %v1862_v59 = vrot.slane %v1587_v14, 1  ;;  %2014 = vst [vmem:[%s3287_s23 + $0x110] sm:$0xff] %v1749_v51  ;;  %v1907_v28 = vmul.f32 0.25, %v1815_v32  ;;  %v1921_v53 = vmul.f32 0.75, %v1585_v61  ;;  %2005 = vst [vmem:[%s3287_s23 + $0xc8] sm:$0xff] %v1778_v11 }
 0x1b3   : > { %v1905_v45 = vmul.f32 0.25, %v1812_v31  ;;  %v1923_v52 = vmul.f32 0.75, %v1587_v14  ;;  %2007 = vst [vmem:[%s3287_s23 + $0xd8] sm:$0xff] %v1779_v37  ;;  %2013 = vst [vmem:[%s3287_s23 + $0x108] sm:$0xff] %v1780_v20  ;;  %v1860_v23 = vsel %vm680_vm1, %v1858_v18, %v1859_v25  ;;  %v1894_v27 = vsel %vm680_vm1, %v1859_v25, %v1585_v61 }
 0x1b4   : > { %2015 = vst [vmem:[%s3287_s23 + $0x118] sm:$0xff] %v1781_v49  ;;  %v1863_v48 = vsel %vm680_vm1, %v1861_v55, %v1862_v59  ;;  %v1895_v60 = vsel %vm680_vm1, %v1862_v59, %v1587_v14  ;;  %v1952_v39 = vmul.f32 0.25, %v1860_v23  ;;  %v1953_v22 = vmul.f32 0.25, %v1894_v27 }
 0x1b5   : > { %v1937_v17 = vadd.f32 %v1921_v53, %v1905_v45  ;;  %v1939_v13 = vadd.f32 %v1923_v52, %v1907_v28  ;;  %v1954_v42 = vmul.f32 0.25, %v1863_v48  ;;  %v1955_v36 = vmul.f32 0.25, %v1895_v60 }
 0x1b6   : > { %v1968_v18 = vadd.f32 %v1952_v39, %v3539_v8  ;;  %v1969_v46 = vadd.f32 %v1953_v22, %v1921_v53 }
 0x1b7   : > { %2002 = vst [vmem:[%s3287_s23 + $0xb0] sm:$0xff] %v1937_v17  ;;  %2010 = vst [vmem:[%s3287_s23 + $0xf0] sm:$0xff] %v1939_v13  ;;  %v1970_v12 = vadd.f32 %v1954_v42, %v3542_v56  ;;  %v1971_v55 = vadd.f32 %v1955_v36, %v1923_v52 }
 0x1b8   : > { %2001 = vst [vmem:[%s3287_s23 + $0xa8] sm:$0xff] %v1968_v18  ;;  %2003 = vst [vmem:[%s3287_s23 + $0xb8] sm:$0xff] %v1969_v46 }
 0x1b9   : > { %2009 = vst [vmem:[%s3287_s23 + $0xe8] sm:$0xff] %v1970_v12  ;;  %2011 = vst [vmem:[%s3287_s23 + $0xf8] sm:$0xff] %v1971_v55 }
 0x1ba PF: > { %s19_s13 = sadd.s32 1, %s2448_s13   ;;  %s3684_s30 = smov %s2440_s11 }
 0x1bb   : > { %p16_p0 = scmp.ge.s32.totalorder %s19_s13, 6   ;;  %s3685_s10 = smov %s2444_s12 }
 0x1bc   : > { %s3686_s11 = smov %s3689_s14  ;;  %s3687_s12 = smov %s3693_s15 }
 0x1bd   :  { %18 = sbr.rel (!%p16_p0) target bundleno = 3 (0x3), region = 92 }

</bundles_post_ra>
